<compile_context>
chip_gen: v7x
topology: tpu7x:2x2x1
jax: 0.10.0
libtpu: 0.0.40
codegen_flags: <defaults>
</compile_context>

<pallas_src>
import jax
import jax.numpy as jnp
from jax.experimental import pallas as pl
from jax.experimental.pallas import tpu as pltpu

FILTERING_SIZE = 75
ENVELOPE_SIZE = 75
BN_EPS = 1e-5


def envelope_kernel(x_ref, w1_ref, w2_ref, b2_ref, o_ref):
    # x_ref : (N, Cb, L)    NCL block: all batch rows of Cb channels
    # w1_ref: (Cb, K1)      depthwise filtering weights (no bias)
    # w2_ref: (Cb, K2)      depthwise envelope weights
    # b2_ref: (Cb, 1)       envelope bias
    # o_ref : (N, Cb, L2p)  lane-dense (padded) output block
    N, Cb, L = x_ref.shape
    K1 = w1_ref.shape[1]
    K2 = w2_ref.shape[1]
    L1 = L - K1 + 1                    # valid length after conv_filtering
    L2 = L1 - K2 + 1                   # valid length after conv_envelope
    L2p = o_ref.shape[2]               # lane-dense padded output length

    x = x_ref[...].astype(jnp.float32)     # (N, Cb, L)
    w1 = w1_ref[...].astype(jnp.float32)   # (Cb, K1)
    w2 = w2_ref[...].astype(jnp.float32)   # (Cb, K2)
    b2 = b2_ref[...].astype(jnp.float32)   # (Cb, 1)

    # ---- conv_filtering: depthwise valid cross-correlation, no bias --------
    acc1 = jnp.zeros((N, Cb, L1), jnp.float32)
    for k in range(K1):                         # static unroll (tiny live set)
        acc1 = acc1 + x[:, :, k:k + L1] * w1[:, k:k + 1][None, :, :]

    # ---- pre_envelope_batchnorm (affine=False, training-mode batch stats) --
    # Per-channel statistics over (N, L1); biased variance, as PyTorch BN.
    mean = jnp.mean(acc1, axis=(0, 2), keepdims=True)            # (1, Cb, 1)
    var = jnp.mean((acc1 - mean) ** 2, axis=(0, 2), keepdims=True)
    y = (acc1 - mean) * jax.lax.rsqrt(var + BN_EPS)

    # ---- abs ----------------------------------------------------------------
    y = jnp.abs(y)

    # ---- conv_envelope: depthwise valid cross-correlation + bias ------------
    acc2 = jnp.zeros((N, Cb, L2), jnp.float32)
    for k in range(K2):
        acc2 = acc2 + y[:, :, k:k + L2] * w2[:, k:k + 1][None, :, :]
    out = acc2 + b2[None, :, :]

    # ---- lane-dense store: pad valid L2 columns up to L2p and store full ----
    if L2p > L2:
        out = jnp.concatenate(
            [out, jnp.zeros((N, Cb, L2p - L2), jnp.float32)], axis=-1)
    o_ref[...] = out.astype(o_ref.dtype)


def _pick_channel_block(C):
    # Keep the sublane block either the full channel count (small C) or a
    # multiple of 8 so the (8, 128) block-shape rule is always satisfied.
    if C <= 8:
        return C
    if C % 8 == 0:
        return 8
    return C


def envelope_detector(x_ncl, w1, w2, b2, *, block_channels=None):
    """x_ncl: (N, C, L).  w1: (C,1,K1), w2: (C,1,K2), b2: (C,).  Returns (N, C, L2)."""
    N, C, L = x_ncl.shape
    K1 = w1.shape[-1]
    K2 = w2.shape[-1]
    L1 = L - K1 + 1
    L2 = L1 - K2 + 1
    assert L2 > 0, "sequence too short for two valid 75-tap convolutions"

    # Pad stored output lane dimension to a multiple of 128 (unmasked stores).
    L2p = ((L2 + 127) // 128) * 128

    Cb = _pick_channel_block(C) if block_channels is None else block_channels
    assert C % Cb == 0

    x = x_ncl.astype(jnp.float32)                              # (N, C, L) — no transpose
    w1r = w1.reshape(C, K1).astype(jnp.float32)                # (C, K1)
    w2r = w2.reshape(C, K2).astype(jnp.float32)                # (C, K2)
    b2r = b2.reshape(C, 1).astype(jnp.float32)                 # (C, 1)

    out_padded = pl.pallas_call(
        envelope_kernel,
        out_shape=jax.ShapeDtypeStruct((N, C, L2p), jnp.float32),
        grid=(C // Cb,),
        in_specs=[
            pl.BlockSpec((N, Cb, L), lambda c: (0, c, 0)),     # NCL block, channels→sublanes
            pl.BlockSpec((Cb, K1), lambda c: (c, 0)),
            pl.BlockSpec((Cb, K2), lambda c: (c, 0)),
            pl.BlockSpec((Cb, 1), lambda c: (c, 0)),
        ],
        out_specs=pl.BlockSpec((N, Cb, L2p), lambda c: (0, c, 0)),
        compiler_params=pltpu.CompilerParams(
            dimension_semantics=("parallel",),
            vmem_limit_bytes=32 * 1024 * 1024,
        ),
    )(x, w1r, w2r, b2r)

    # Slice off the lane padding (cheap: output is small relative to input).
    return out_padded[:, :, :L2]


def reference(x, w1, w2, b2):
    """Pure-JAX reference replicating the PyTorch forward (training-mode BN)."""
    C = x.shape[1]
    dn = ("NCH", "OIH", "NCH")
    y = jax.lax.conv_general_dilated(
        x, w1, window_strides=(1,), padding="VALID",
        dimension_numbers=dn, feature_group_count=C)
    mean = jnp.mean(y, axis=(0, 2), keepdims=True)
    var = jnp.mean((y - mean) ** 2, axis=(0, 2), keepdims=True)
    y = (y - mean) / jnp.sqrt(var + BN_EPS)
    y = jnp.abs(y)
    z = jax.lax.conv_general_dilated(
        y, w2, window_strides=(1,), padding="VALID",
        dimension_numbers=dn, feature_group_count=C)
    return z + b2.reshape(1, C, 1)


if __name__ == "__main__":
    # Small shapes consistent with the module: batch=2, in_channels=4, seq=256.
    N, C, L = 2, 4, 256
    key = jax.random.PRNGKey(0)
    kx, kw1, kw2, kb2 = jax.random.split(key, 4)

    x = jax.random.normal(kx, (N, C, L), dtype=jnp.float32)
    # PyTorch depthwise Conv1d weight shape is (C, 1, K).
    w1 = jax.random.normal(kw1, (C, 1, FILTERING_SIZE), dtype=jnp.float32) * 0.1
    w2 = jax.random.normal(kw2, (C, 1, ENVELOPE_SIZE), dtype=jnp.float32) * 0.1
    b2 = jax.random.normal(kb2, (C,), dtype=jnp.float32) * 0.1

    out = envelope_detector(x, w1, w2, b2)
    out = jax.block_until_ready(out)

    ref = jax.block_until_ready(reference(x, w1, w2, b2))
    assert out.shape == (N, C, L - FILTERING_SIZE - ENVELOPE_SIZE + 2)
    assert jnp.allclose(out, ref, rtol=1e-3, atol=1e-3)

    print("KERNEL_OK")
</pallas_src>

<mosaic_0001>
module attributes {stable_mosaic.version = 11 : i64} {
  func.func @envelope_kernel(%arg0: i32, %arg1: memref<2x4x256xf32, #tpu.memory_space<vmem>>, %arg2: memref<4x75xf32, #tpu.memory_space<vmem>>, %arg3: memref<4x75xf32, #tpu.memory_space<vmem>>, %arg4: memref<4x1xf32, #tpu.memory_space<vmem>>, %arg5: memref<2x4x128xf32, #tpu.memory_space<vmem>>) attributes {dimension_semantics = [#tpu.dimension_semantics<parallel>], iteration_bounds = array<i64: 1>, scalar_prefetch = 0 : i64, scratch_operands = 0 : i64, tpu.core_type = #tpu.core_type<tc>, window_params = [{transform_indices = @transform_0, window_bounds = array<i64: 2, 4, 256>}, {transform_indices = @transform_1, window_bounds = array<i64: 4, 75>}, {transform_indices = @transform_2, window_bounds = array<i64: 4, 75>}, {transform_indices = @transform_3, window_bounds = array<i64: 4, 1>}, {transform_indices = @transform_4, window_bounds = array<i64: 2, 4, 128>}]} {
    %c0 = arith.constant 0 : index
    %c0_0 = arith.constant 0 : index
    %c0_1 = arith.constant 0 : index
    %0 = vector.load %arg1[%c0, %c0_0, %c0_1] : memref<2x4x256xf32, #tpu.memory_space<vmem>>, vector<2x4x256xf32>
    %c0_2 = arith.constant 0 : index
    %c0_3 = arith.constant 0 : index
    %1 = vector.load %arg2[%c0_2, %c0_3] : memref<4x75xf32, #tpu.memory_space<vmem>>, vector<4x75xf32>
    %c0_4 = arith.constant 0 : index
    %c0_5 = arith.constant 0 : index
    %2 = vector.load %arg3[%c0_4, %c0_5] : memref<4x75xf32, #tpu.memory_space<vmem>>, vector<4x75xf32>
    %c0_6 = arith.constant 0 : index
    %c0_7 = arith.constant 0 : index
    %3 = vector.load %arg4[%c0_6, %c0_7] : memref<4x1xf32, #tpu.memory_space<vmem>>, vector<4x1xf32>
    %cst = arith.constant 0.000000e+00 : f32
    %4 = vector.broadcast %cst : f32 to vector<2x4x182xf32>
    %5 = vector.extract_strided_slice %0 {offsets = [0, 0, 0], sizes = [2, 4, 182], strides = [1, 1, 1]} : vector<2x4x256xf32> to vector<2x4x182xf32>
    %6 = vector.extract_strided_slice %1 {offsets = [0, 0], sizes = [4, 1], strides = [1, 1]} : vector<4x75xf32> to vector<4x1xf32>
    %7 = vector.shape_cast %6 : vector<4x1xf32> to vector<1x4x1xf32>
    %8 = vector.broadcast %7 : vector<1x4x1xf32> to vector<2x4x182xf32>
    %9 = arith.mulf %5, %8 : vector<2x4x182xf32>
    %10 = arith.addf %4, %9 : vector<2x4x182xf32>
    %11 = vector.extract_strided_slice %0 {offsets = [0, 0, 1], sizes = [2, 4, 182], strides = [1, 1, 1]} : vector<2x4x256xf32> to vector<2x4x182xf32>
    %12 = vector.extract_strided_slice %1 {offsets = [0, 1], sizes = [4, 1], strides = [1, 1]} : vector<4x75xf32> to vector<4x1xf32>
    %13 = vector.shape_cast %12 : vector<4x1xf32> to vector<1x4x1xf32>
    %14 = vector.broadcast %13 : vector<1x4x1xf32> to vector<2x4x182xf32>
    %15 = arith.mulf %11, %14 : vector<2x4x182xf32>
    %16 = arith.addf %10, %15 : vector<2x4x182xf32>
    %17 = vector.extract_strided_slice %0 {offsets = [0, 0, 2], sizes = [2, 4, 182], strides = [1, 1, 1]} : vector<2x4x256xf32> to vector<2x4x182xf32>
    %18 = vector.extract_strided_slice %1 {offsets = [0, 2], sizes = [4, 1], strides = [1, 1]} : vector<4x75xf32> to vector<4x1xf32>
    %19 = vector.shape_cast %18 : vector<4x1xf32> to vector<1x4x1xf32>
    %20 = vector.broadcast %19 : vector<1x4x1xf32> to vector<2x4x182xf32>
    %21 = arith.mulf %17, %20 : vector<2x4x182xf32>
    %22 = arith.addf %16, %21 : vector<2x4x182xf32>
    %23 = vector.extract_strided_slice %0 {offsets = [0, 0, 3], sizes = [2, 4, 182], strides = [1, 1, 1]} : vector<2x4x256xf32> to vector<2x4x182xf32>
    %24 = vector.extract_strided_slice %1 {offsets = [0, 3], sizes = [4, 1], strides = [1, 1]} : vector<4x75xf32> to vector<4x1xf32>
    %25 = vector.shape_cast %24 : vector<4x1xf32> to vector<1x4x1xf32>
    %26 = vector.broadcast %25 : vector<1x4x1xf32> to vector<2x4x182xf32>
    %27 = arith.mulf %23, %26 : vector<2x4x182xf32>
    %28 = arith.addf %22, %27 : vector<2x4x182xf32>
    %29 = vector.extract_strided_slice %0 {offsets = [0, 0, 4], sizes = [2, 4, 182], strides = [1, 1, 1]} : vector<2x4x256xf32> to vector<2x4x182xf32>
    %30 = vector.extract_strided_slice %1 {offsets = [0, 4], sizes = [4, 1], strides = [1, 1]} : vector<4x75xf32> to vector<4x1xf32>
    %31 = vector.shape_cast %30 : vector<4x1xf32> to vector<1x4x1xf32>
    %32 = vector.broadcast %31 : vector<1x4x1xf32> to vector<2x4x182xf32>
    %33 = arith.mulf %29, %32 : vector<2x4x182xf32>
    %34 = arith.addf %28, %33 : vector<2x4x182xf32>
    %35 = vector.extract_strided_slice %0 {offsets = [0, 0, 5], sizes = [2, 4, 182], strides = [1, 1, 1]} : vector<2x4x256xf32> to vector<2x4x182xf32>
    %36 = vector.extract_strided_slice %1 {offsets = [0, 5], sizes = [4, 1], strides = [1, 1]} : vector<4x75xf32> to vector<4x1xf32>
    %37 = vector.shape_cast %36 : vector<4x1xf32> to vector<1x4x1xf32>
    %38 = vector.broadcast %37 : vector<1x4x1xf32> to vector<2x4x182xf32>
    %39 = arith.mulf %35, %38 : vector<2x4x182xf32>
    %40 = arith.addf %34, %39 : vector<2x4x182xf32>
    %41 = vector.extract_strided_slice %0 {offsets = [0, 0, 6], sizes = [2, 4, 182], strides = [1, 1, 1]} : vector<2x4x256xf32> to vector<2x4x182xf32>
    %42 = vector.extract_strided_slice %1 {offsets = [0, 6], sizes = [4, 1], strides = [1, 1]} : vector<4x75xf32> to vector<4x1xf32>
    %43 = vector.shape_cast %42 : vector<4x1xf32> to vector<1x4x1xf32>
    %44 = vector.broadcast %43 : vector<1x4x1xf32> to vector<2x4x182xf32>
    %45 = arith.mulf %41, %44 : vector<2x4x182xf32>
    %46 = arith.addf %40, %45 : vector<2x4x182xf32>
    %47 = vector.extract_strided_slice %0 {offsets = [0, 0, 7], sizes = [2, 4, 182], strides = [1, 1, 1]} : vector<2x4x256xf32> to vector<2x4x182xf32>
    %48 = vector.extract_strided_slice %1 {offsets = [0, 7], sizes = [4, 1], strides = [1, 1]} : vector<4x75xf32> to vector<4x1xf32>
    %49 = vector.shape_cast %48 : vector<4x1xf32> to vector<1x4x1xf32>
    %50 = vector.broadcast %49 : vector<1x4x1xf32> to vector<2x4x182xf32>
    %51 = arith.mulf %47, %50 : vector<2x4x182xf32>
    %52 = arith.addf %46, %51 : vector<2x4x182xf32>
    %53 = vector.extract_strided_slice %0 {offsets = [0, 0, 8], sizes = [2, 4, 182], strides = [1, 1, 1]} : vector<2x4x256xf32> to vector<2x4x182xf32>
    %54 = vector.extract_strided_slice %1 {offsets = [0, 8], sizes = [4, 1], strides = [1, 1]} : vector<4x75xf32> to vector<4x1xf32>
    %55 = vector.shape_cast %54 : vector<4x1xf32> to vector<1x4x1xf32>
    %56 = vector.broadcast %55 : vector<1x4x1xf32> to vector<2x4x182xf32>
    %57 = arith.mulf %53, %56 : vector<2x4x182xf32>
    %58 = arith.addf %52, %57 : vector<2x4x182xf32>
    %59 = vector.extract_strided_slice %0 {offsets = [0, 0, 9], sizes = [2, 4, 182], strides = [1, 1, 1]} : vector<2x4x256xf32> to vector<2x4x182xf32>
    %60 = vector.extract_strided_slice %1 {offsets = [0, 9], sizes = [4, 1], strides = [1, 1]} : vector<4x75xf32> to vector<4x1xf32>
    %61 = vector.shape_cast %60 : vector<4x1xf32> to vector<1x4x1xf32>
    %62 = vector.broadcast %61 : vector<1x4x1xf32> to vector<2x4x182xf32>
    %63 = arith.mulf %59, %62 : vector<2x4x182xf32>
    %64 = arith.addf %58, %63 : vector<2x4x182xf32>
    %65 = vector.extract_strided_slice %0 {offsets = [0, 0, 10], sizes = [2, 4, 182], strides = [1, 1, 1]} : vector<2x4x256xf32> to vector<2x4x182xf32>
    %66 = vector.extract_strided_slice %1 {offsets = [0, 10], sizes = [4, 1], strides = [1, 1]} : vector<4x75xf32> to vector<4x1xf32>
    %67 = vector.shape_cast %66 : vector<4x1xf32> to vector<1x4x1xf32>
    %68 = vector.broadcast %67 : vector<1x4x1xf32> to vector<2x4x182xf32>
    %69 = arith.mulf %65, %68 : vector<2x4x182xf32>
    %70 = arith.addf %64, %69 : vector<2x4x182xf32>
    %71 = vector.extract_strided_slice %0 {offsets = [0, 0, 11], sizes = [2, 4, 182], strides = [1, 1, 1]} : vector<2x4x256xf32> to vector<2x4x182xf32>
    %72 = vector.extract_strided_slice %1 {offsets = [0, 11], sizes = [4, 1], strides = [1, 1]} : vector<4x75xf32> to vector<4x1xf32>
    %73 = vector.shape_cast %72 : vector<4x1xf32> to vector<1x4x1xf32>
    %74 = vector.broadcast %73 : vector<1x4x1xf32> to vector<2x4x182xf32>
    %75 = arith.mulf %71, %74 : vector<2x4x182xf32>
    %76 = arith.addf %70, %75 : vector<2x4x182xf32>
    %77 = vector.extract_strided_slice %0 {offsets = [0, 0, 12], sizes = [2, 4, 182], strides = [1, 1, 1]} : vector<2x4x256xf32> to vector<2x4x182xf32>
    %78 = vector.extract_strided_slice %1 {offsets = [0, 12], sizes = [4, 1], strides = [1, 1]} : vector<4x75xf32> to vector<4x1xf32>
    %79 = vector.shape_cast %78 : vector<4x1xf32> to vector<1x4x1xf32>
    %80 = vector.broadcast %79 : vector<1x4x1xf32> to vector<2x4x182xf32>
    %81 = arith.mulf %77, %80 : vector<2x4x182xf32>
    %82 = arith.addf %76, %81 : vector<2x4x182xf32>
    %83 = vector.extract_strided_slice %0 {offsets = [0, 0, 13], sizes = [2, 4, 182], strides = [1, 1, 1]} : vector<2x4x256xf32> to vector<2x4x182xf32>
    %84 = vector.extract_strided_slice %1 {offsets = [0, 13], sizes = [4, 1], strides = [1, 1]} : vector<4x75xf32> to vector<4x1xf32>
    %85 = vector.shape_cast %84 : vector<4x1xf32> to vector<1x4x1xf32>
    %86 = vector.broadcast %85 : vector<1x4x1xf32> to vector<2x4x182xf32>
    %87 = arith.mulf %83, %86 : vector<2x4x182xf32>
    %88 = arith.addf %82, %87 : vector<2x4x182xf32>
    %89 = vector.extract_strided_slice %0 {offsets = [0, 0, 14], sizes = [2, 4, 182], strides = [1, 1, 1]} : vector<2x4x256xf32> to vector<2x4x182xf32>
    %90 = vector.extract_strided_slice %1 {offsets = [0, 14], sizes = [4, 1], strides = [1, 1]} : vector<4x75xf32> to vector<4x1xf32>
    %91 = vector.shape_cast %90 : vector<4x1xf32> to vector<1x4x1xf32>
    %92 = vector.broadcast %91 : vector<1x4x1xf32> to vector<2x4x182xf32>
    %93 = arith.mulf %89, %92 : vector<2x4x182xf32>
    %94 = arith.addf %88, %93 : vector<2x4x182xf32>
    %95 = vector.extract_strided_slice %0 {offsets = [0, 0, 15], sizes = [2, 4, 182], strides = [1, 1, 1]} : vector<2x4x256xf32> to vector<2x4x182xf32>
    %96 = vector.extract_strided_slice %1 {offsets = [0, 15], sizes = [4, 1], strides = [1, 1]} : vector<4x75xf32> to vector<4x1xf32>
    %97 = vector.shape_cast %96 : vector<4x1xf32> to vector<1x4x1xf32>
    %98 = vector.broadcast %97 : vector<1x4x1xf32> to vector<2x4x182xf32>
    %99 = arith.mulf %95, %98 : vector<2x4x182xf32>
    %100 = arith.addf %94, %99 : vector<2x4x182xf32>
    %101 = vector.extract_strided_slice %0 {offsets = [0, 0, 16], sizes = [2, 4, 182], strides = [1, 1, 1]} : vector<2x4x256xf32> to vector<2x4x182xf32>
    %102 = vector.extract_strided_slice %1 {offsets = [0, 16], sizes = [4, 1], strides = [1, 1]} : vector<4x75xf32> to vector<4x1xf32>
    %103 = vector.shape_cast %102 : vector<4x1xf32> to vector<1x4x1xf32>
    %104 = vector.broadcast %103 : vector<1x4x1xf32> to vector<2x4x182xf32>
    %105 = arith.mulf %101, %104 : vector<2x4x182xf32>
    %106 = arith.addf %100, %105 : vector<2x4x182xf32>
    %107 = vector.extract_strided_slice %0 {offsets = [0, 0, 17], sizes = [2, 4, 182], strides = [1, 1, 1]} : vector<2x4x256xf32> to vector<2x4x182xf32>
    %108 = vector.extract_strided_slice %1 {offsets = [0, 17], sizes = [4, 1], strides = [1, 1]} : vector<4x75xf32> to vector<4x1xf32>
    %109 = vector.shape_cast %108 : vector<4x1xf32> to vector<1x4x1xf32>
    %110 = vector.broadcast %109 : vector<1x4x1xf32> to vector<2x4x182xf32>
    %111 = arith.mulf %107, %110 : vector<2x4x182xf32>
    %112 = arith.addf %106, %111 : vector<2x4x182xf32>
    %113 = vector.extract_strided_slice %0 {offsets = [0, 0, 18], sizes = [2, 4, 182], strides = [1, 1, 1]} : vector<2x4x256xf32> to vector<2x4x182xf32>
    %114 = vector.extract_strided_slice %1 {offsets = [0, 18], sizes = [4, 1], strides = [1, 1]} : vector<4x75xf32> to vector<4x1xf32>
    %115 = vector.shape_cast %114 : vector<4x1xf32> to vector<1x4x1xf32>
    %116 = vector.broadcast %115 : vector<1x4x1xf32> to vector<2x4x182xf32>
    %117 = arith.mulf %113, %116 : vector<2x4x182xf32>
    %118 = arith.addf %112, %117 : vector<2x4x182xf32>
    %119 = vector.extract_strided_slice %0 {offsets = [0, 0, 19], sizes = [2, 4, 182], strides = [1, 1, 1]} : vector<2x4x256xf32> to vector<2x4x182xf32>
    %120 = vector.extract_strided_slice %1 {offsets = [0, 19], sizes = [4, 1], strides = [1, 1]} : vector<4x75xf32> to vector<4x1xf32>
    %121 = vector.shape_cast %120 : vector<4x1xf32> to vector<1x4x1xf32>
    %122 = vector.broadcast %121 : vector<1x4x1xf32> to vector<2x4x182xf32>
    %123 = arith.mulf %119, %122 : vector<2x4x182xf32>
    %124 = arith.addf %118, %123 : vector<2x4x182xf32>
    %125 = vector.extract_strided_slice %0 {offsets = [0, 0, 20], sizes = [2, 4, 182], strides = [1, 1, 1]} : vector<2x4x256xf32> to vector<2x4x182xf32>
    %126 = vector.extract_strided_slice %1 {offsets = [0, 20], sizes = [4, 1], strides = [1, 1]} : vector<4x75xf32> to vector<4x1xf32>
    %127 = vector.shape_cast %126 : vector<4x1xf32> to vector<1x4x1xf32>
    %128 = vector.broadcast %127 : vector<1x4x1xf32> to vector<2x4x182xf32>
    %129 = arith.mulf %125, %128 : vector<2x4x182xf32>
    %130 = arith.addf %124, %129 : vector<2x4x182xf32>
    %131 = vector.extract_strided_slice %0 {offsets = [0, 0, 21], sizes = [2, 4, 182], strides = [1, 1, 1]} : vector<2x4x256xf32> to vector<2x4x182xf32>
    %132 = vector.extract_strided_slice %1 {offsets = [0, 21], sizes = [4, 1], strides = [1, 1]} : vector<4x75xf32> to vector<4x1xf32>
    %133 = vector.shape_cast %132 : vector<4x1xf32> to vector<1x4x1xf32>
    %134 = vector.broadcast %133 : vector<1x4x1xf32> to vector<2x4x182xf32>
    %135 = arith.mulf %131, %134 : vector<2x4x182xf32>
    %136 = arith.addf %130, %135 : vector<2x4x182xf32>
    %137 = vector.extract_strided_slice %0 {offsets = [0, 0, 22], sizes = [2, 4, 182], strides = [1, 1, 1]} : vector<2x4x256xf32> to vector<2x4x182xf32>
    %138 = vector.extract_strided_slice %1 {offsets = [0, 22], sizes = [4, 1], strides = [1, 1]} : vector<4x75xf32> to vector<4x1xf32>
    %139 = vector.shape_cast %138 : vector<4x1xf32> to vector<1x4x1xf32>
    %140 = vector.broadcast %139 : vector<1x4x1xf32> to vector<2x4x182xf32>
    %141 = arith.mulf %137, %140 : vector<2x4x182xf32>
    %142 = arith.addf %136, %141 : vector<2x4x182xf32>
    %143 = vector.extract_strided_slice %0 {offsets = [0, 0, 23], sizes = [2, 4, 182], strides = [1, 1, 1]} : vector<2x4x256xf32> to vector<2x4x182xf32>
    %144 = vector.extract_strided_slice %1 {offsets = [0, 23], sizes = [4, 1], strides = [1, 1]} : vector<4x75xf32> to vector<4x1xf32>
    %145 = vector.shape_cast %144 : vector<4x1xf32> to vector<1x4x1xf32>
    %146 = vector.broadcast %145 : vector<1x4x1xf32> to vector<2x4x182xf32>
    %147 = arith.mulf %143, %146 : vector<2x4x182xf32>
    %148 = arith.addf %142, %147 : vector<2x4x182xf32>
    %149 = vector.extract_strided_slice %0 {offsets = [0, 0, 24], sizes = [2, 4, 182], strides = [1, 1, 1]} : vector<2x4x256xf32> to vector<2x4x182xf32>
    %150 = vector.extract_strided_slice %1 {offsets = [0, 24], sizes = [4, 1], strides = [1, 1]} : vector<4x75xf32> to vector<4x1xf32>
    %151 = vector.shape_cast %150 : vector<4x1xf32> to vector<1x4x1xf32>
    %152 = vector.broadcast %151 : vector<1x4x1xf32> to vector<2x4x182xf32>
    %153 = arith.mulf %149, %152 : vector<2x4x182xf32>
    %154 = arith.addf %148, %153 : vector<2x4x182xf32>
    %155 = vector.extract_strided_slice %0 {offsets = [0, 0, 25], sizes = [2, 4, 182], strides = [1, 1, 1]} : vector<2x4x256xf32> to vector<2x4x182xf32>
    %156 = vector.extract_strided_slice %1 {offsets = [0, 25], sizes = [4, 1], strides = [1, 1]} : vector<4x75xf32> to vector<4x1xf32>
    %157 = vector.shape_cast %156 : vector<4x1xf32> to vector<1x4x1xf32>
    %158 = vector.broadcast %157 : vector<1x4x1xf32> to vector<2x4x182xf32>
    %159 = arith.mulf %155, %158 : vector<2x4x182xf32>
    %160 = arith.addf %154, %159 : vector<2x4x182xf32>
    %161 = vector.extract_strided_slice %0 {offsets = [0, 0, 26], sizes = [2, 4, 182], strides = [1, 1, 1]} : vector<2x4x256xf32> to vector<2x4x182xf32>
    %162 = vector.extract_strided_slice %1 {offsets = [0, 26], sizes = [4, 1], strides = [1, 1]} : vector<4x75xf32> to vector<4x1xf32>
    %163 = vector.shape_cast %162 : vector<4x1xf32> to vector<1x4x1xf32>
    %164 = vector.broadcast %163 : vector<1x4x1xf32> to vector<2x4x182xf32>
    %165 = arith.mulf %161, %164 : vector<2x4x182xf32>
    %166 = arith.addf %160, %165 : vector<2x4x182xf32>
    %167 = vector.extract_strided_slice %0 {offsets = [0, 0, 27], sizes = [2, 4, 182], strides = [1, 1, 1]} : vector<2x4x256xf32> to vector<2x4x182xf32>
    %168 = vector.extract_strided_slice %1 {offsets = [0, 27], sizes = [4, 1], strides = [1, 1]} : vector<4x75xf32> to vector<4x1xf32>
    %169 = vector.shape_cast %168 : vector<4x1xf32> to vector<1x4x1xf32>
    %170 = vector.broadcast %169 : vector<1x4x1xf32> to vector<2x4x182xf32>
    %171 = arith.mulf %167, %170 : vector<2x4x182xf32>
    %172 = arith.addf %166, %171 : vector<2x4x182xf32>
    %173 = vector.extract_strided_slice %0 {offsets = [0, 0, 28], sizes = [2, 4, 182], strides = [1, 1, 1]} : vector<2x4x256xf32> to vector<2x4x182xf32>
    %174 = vector.extract_strided_slice %1 {offsets = [0, 28], sizes = [4, 1], strides = [1, 1]} : vector<4x75xf32> to vector<4x1xf32>
    %175 = vector.shape_cast %174 : vector<4x1xf32> to vector<1x4x1xf32>
    %176 = vector.broadcast %175 : vector<1x4x1xf32> to vector<2x4x182xf32>
    %177 = arith.mulf %173, %176 : vector<2x4x182xf32>
    %178 = arith.addf %172, %177 : vector<2x4x182xf32>
    %179 = vector.extract_strided_slice %0 {offsets = [0, 0, 29], sizes = [2, 4, 182], strides = [1, 1, 1]} : vector<2x4x256xf32> to vector<2x4x182xf32>
    %180 = vector.extract_strided_slice %1 {offsets = [0, 29], sizes = [4, 1], strides = [1, 1]} : vector<4x75xf32> to vector<4x1xf32>
    %181 = vector.shape_cast %180 : vector<4x1xf32> to vector<1x4x1xf32>
    %182 = vector.broadcast %181 : vector<1x4x1xf32> to vector<2x4x182xf32>
    %183 = arith.mulf %179, %182 : vector<2x4x182xf32>
    %184 = arith.addf %178, %183 : vector<2x4x182xf32>
    %185 = vector.extract_strided_slice %0 {offsets = [0, 0, 30], sizes = [2, 4, 182], strides = [1, 1, 1]} : vector<2x4x256xf32> to vector<2x4x182xf32>
    %186 = vector.extract_strided_slice %1 {offsets = [0, 30], sizes = [4, 1], strides = [1, 1]} : vector<4x75xf32> to vector<4x1xf32>
    %187 = vector.shape_cast %186 : vector<4x1xf32> to vector<1x4x1xf32>
    %188 = vector.broadcast %187 : vector<1x4x1xf32> to vector<2x4x182xf32>
    %189 = arith.mulf %185, %188 : vector<2x4x182xf32>
    %190 = arith.addf %184, %189 : vector<2x4x182xf32>
    %191 = vector.extract_strided_slice %0 {offsets = [0, 0, 31], sizes = [2, 4, 182], strides = [1, 1, 1]} : vector<2x4x256xf32> to vector<2x4x182xf32>
    %192 = vector.extract_strided_slice %1 {offsets = [0, 31], sizes = [4, 1], strides = [1, 1]} : vector<4x75xf32> to vector<4x1xf32>
    %193 = vector.shape_cast %192 : vector<4x1xf32> to vector<1x4x1xf32>
    %194 = vector.broadcast %193 : vector<1x4x1xf32> to vector<2x4x182xf32>
    %195 = arith.mulf %191, %194 : vector<2x4x182xf32>
    %196 = arith.addf %190, %195 : vector<2x4x182xf32>
    %197 = vector.extract_strided_slice %0 {offsets = [0, 0, 32], sizes = [2, 4, 182], strides = [1, 1, 1]} : vector<2x4x256xf32> to vector<2x4x182xf32>
    %198 = vector.extract_strided_slice %1 {offsets = [0, 32], sizes = [4, 1], strides = [1, 1]} : vector<4x75xf32> to vector<4x1xf32>
    %199 = vector.shape_cast %198 : vector<4x1xf32> to vector<1x4x1xf32>
    %200 = vector.broadcast %199 : vector<1x4x1xf32> to vector<2x4x182xf32>
    %201 = arith.mulf %197, %200 : vector<2x4x182xf32>
    %202 = arith.addf %196, %201 : vector<2x4x182xf32>
    %203 = vector.extract_strided_slice %0 {offsets = [0, 0, 33], sizes = [2, 4, 182], strides = [1, 1, 1]} : vector<2x4x256xf32> to vector<2x4x182xf32>
    %204 = vector.extract_strided_slice %1 {offsets = [0, 33], sizes = [4, 1], strides = [1, 1]} : vector<4x75xf32> to vector<4x1xf32>
    %205 = vector.shape_cast %204 : vector<4x1xf32> to vector<1x4x1xf32>
    %206 = vector.broadcast %205 : vector<1x4x1xf32> to vector<2x4x182xf32>
    %207 = arith.mulf %203, %206 : vector<2x4x182xf32>
    %208 = arith.addf %202, %207 : vector<2x4x182xf32>
    %209 = vector.extract_strided_slice %0 {offsets = [0, 0, 34], sizes = [2, 4, 182], strides = [1, 1, 1]} : vector<2x4x256xf32> to vector<2x4x182xf32>
    %210 = vector.extract_strided_slice %1 {offsets = [0, 34], sizes = [4, 1], strides = [1, 1]} : vector<4x75xf32> to vector<4x1xf32>
    %211 = vector.shape_cast %210 : vector<4x1xf32> to vector<1x4x1xf32>
    %212 = vector.broadcast %211 : vector<1x4x1xf32> to vector<2x4x182xf32>
    %213 = arith.mulf %209, %212 : vector<2x4x182xf32>
    %214 = arith.addf %208, %213 : vector<2x4x182xf32>
    %215 = vector.extract_strided_slice %0 {offsets = [0, 0, 35], sizes = [2, 4, 182], strides = [1, 1, 1]} : vector<2x4x256xf32> to vector<2x4x182xf32>
    %216 = vector.extract_strided_slice %1 {offsets = [0, 35], sizes = [4, 1], strides = [1, 1]} : vector<4x75xf32> to vector<4x1xf32>
    %217 = vector.shape_cast %216 : vector<4x1xf32> to vector<1x4x1xf32>
    %218 = vector.broadcast %217 : vector<1x4x1xf32> to vector<2x4x182xf32>
    %219 = arith.mulf %215, %218 : vector<2x4x182xf32>
    %220 = arith.addf %214, %219 : vector<2x4x182xf32>
    %221 = vector.extract_strided_slice %0 {offsets = [0, 0, 36], sizes = [2, 4, 182], strides = [1, 1, 1]} : vector<2x4x256xf32> to vector<2x4x182xf32>
    %222 = vector.extract_strided_slice %1 {offsets = [0, 36], sizes = [4, 1], strides = [1, 1]} : vector<4x75xf32> to vector<4x1xf32>
    %223 = vector.shape_cast %222 : vector<4x1xf32> to vector<1x4x1xf32>
    %224 = vector.broadcast %223 : vector<1x4x1xf32> to vector<2x4x182xf32>
    %225 = arith.mulf %221, %224 : vector<2x4x182xf32>
    %226 = arith.addf %220, %225 : vector<2x4x182xf32>
    %227 = vector.extract_strided_slice %0 {offsets = [0, 0, 37], sizes = [2, 4, 182], strides = [1, 1, 1]} : vector<2x4x256xf32> to vector<2x4x182xf32>
    %228 = vector.extract_strided_slice %1 {offsets = [0, 37], sizes = [4, 1], strides = [1, 1]} : vector<4x75xf32> to vector<4x1xf32>
    %229 = vector.shape_cast %228 : vector<4x1xf32> to vector<1x4x1xf32>
    %230 = vector.broadcast %229 : vector<1x4x1xf32> to vector<2x4x182xf32>
    %231 = arith.mulf %227, %230 : vector<2x4x182xf32>
    %232 = arith.addf %226, %231 : vector<2x4x182xf32>
    %233 = vector.extract_strided_slice %0 {offsets = [0, 0, 38], sizes = [2, 4, 182], strides = [1, 1, 1]} : vector<2x4x256xf32> to vector<2x4x182xf32>
    %234 = vector.extract_strided_slice %1 {offsets = [0, 38], sizes = [4, 1], strides = [1, 1]} : vector<4x75xf32> to vector<4x1xf32>
    %235 = vector.shape_cast %234 : vector<4x1xf32> to vector<1x4x1xf32>
    %236 = vector.broadcast %235 : vector<1x4x1xf32> to vector<2x4x182xf32>
    %237 = arith.mulf %233, %236 : vector<2x4x182xf32>
    %238 = arith.addf %232, %237 : vector<2x4x182xf32>
    %239 = vector.extract_strided_slice %0 {offsets = [0, 0, 39], sizes = [2, 4, 182], strides = [1, 1, 1]} : vector<2x4x256xf32> to vector<2x4x182xf32>
    %240 = vector.extract_strided_slice %1 {offsets = [0, 39], sizes = [4, 1], strides = [1, 1]} : vector<4x75xf32> to vector<4x1xf32>
    %241 = vector.shape_cast %240 : vector<4x1xf32> to vector<1x4x1xf32>
    %242 = vector.broadcast %241 : vector<1x4x1xf32> to vector<2x4x182xf32>
    %243 = arith.mulf %239, %242 : vector<2x4x182xf32>
    %244 = arith.addf %238, %243 : vector<2x4x182xf32>
    %245 = vector.extract_strided_slice %0 {offsets = [0, 0, 40], sizes = [2, 4, 182], strides = [1, 1, 1]} : vector<2x4x256xf32> to vector<2x4x182xf32>
    %246 = vector.extract_strided_slice %1 {offsets = [0, 40], sizes = [4, 1], strides = [1, 1]} : vector<4x75xf32> to vector<4x1xf32>
    %247 = vector.shape_cast %246 : vector<4x1xf32> to vector<1x4x1xf32>
    %248 = vector.broadcast %247 : vector<1x4x1xf32> to vector<2x4x182xf32>
    %249 = arith.mulf %245, %248 : vector<2x4x182xf32>
    %250 = arith.addf %244, %249 : vector<2x4x182xf32>
    %251 = vector.extract_strided_slice %0 {offsets = [0, 0, 41], sizes = [2, 4, 182], strides = [1, 1, 1]} : vector<2x4x256xf32> to vector<2x4x182xf32>
    %252 = vector.extract_strided_slice %1 {offsets = [0, 41], sizes = [4, 1], strides = [1, 1]} : vector<4x75xf32> to vector<4x1xf32>
    %253 = vector.shape_cast %252 : vector<4x1xf32> to vector<1x4x1xf32>
    %254 = vector.broadcast %253 : vector<1x4x1xf32> to vector<2x4x182xf32>
    %255 = arith.mulf %251, %254 : vector<2x4x182xf32>
    %256 = arith.addf %250, %255 : vector<2x4x182xf32>
    %257 = vector.extract_strided_slice %0 {offsets = [0, 0, 42], sizes = [2, 4, 182], strides = [1, 1, 1]} : vector<2x4x256xf32> to vector<2x4x182xf32>
    %258 = vector.extract_strided_slice %1 {offsets = [0, 42], sizes = [4, 1], strides = [1, 1]} : vector<4x75xf32> to vector<4x1xf32>
    %259 = vector.shape_cast %258 : vector<4x1xf32> to vector<1x4x1xf32>
    %260 = vector.broadcast %259 : vector<1x4x1xf32> to vector<2x4x182xf32>
    %261 = arith.mulf %257, %260 : vector<2x4x182xf32>
    %262 = arith.addf %256, %261 : vector<2x4x182xf32>
    %263 = vector.extract_strided_slice %0 {offsets = [0, 0, 43], sizes = [2, 4, 182], strides = [1, 1, 1]} : vector<2x4x256xf32> to vector<2x4x182xf32>
    %264 = vector.extract_strided_slice %1 {offsets = [0, 43], sizes = [4, 1], strides = [1, 1]} : vector<4x75xf32> to vector<4x1xf32>
    %265 = vector.shape_cast %264 : vector<4x1xf32> to vector<1x4x1xf32>
    %266 = vector.broadcast %265 : vector<1x4x1xf32> to vector<2x4x182xf32>
    %267 = arith.mulf %263, %266 : vector<2x4x182xf32>
    %268 = arith.addf %262, %267 : vector<2x4x182xf32>
    %269 = vector.extract_strided_slice %0 {offsets = [0, 0, 44], sizes = [2, 4, 182], strides = [1, 1, 1]} : vector<2x4x256xf32> to vector<2x4x182xf32>
    %270 = vector.extract_strided_slice %1 {offsets = [0, 44], sizes = [4, 1], strides = [1, 1]} : vector<4x75xf32> to vector<4x1xf32>
    %271 = vector.shape_cast %270 : vector<4x1xf32> to vector<1x4x1xf32>
    %272 = vector.broadcast %271 : vector<1x4x1xf32> to vector<2x4x182xf32>
    %273 = arith.mulf %269, %272 : vector<2x4x182xf32>
    %274 = arith.addf %268, %273 : vector<2x4x182xf32>
    %275 = vector.extract_strided_slice %0 {offsets = [0, 0, 45], sizes = [2, 4, 182], strides = [1, 1, 1]} : vector<2x4x256xf32> to vector<2x4x182xf32>
    %276 = vector.extract_strided_slice %1 {offsets = [0, 45], sizes = [4, 1], strides = [1, 1]} : vector<4x75xf32> to vector<4x1xf32>
    %277 = vector.shape_cast %276 : vector<4x1xf32> to vector<1x4x1xf32>
    %278 = vector.broadcast %277 : vector<1x4x1xf32> to vector<2x4x182xf32>
    %279 = arith.mulf %275, %278 : vector<2x4x182xf32>
    %280 = arith.addf %274, %279 : vector<2x4x182xf32>
    %281 = vector.extract_strided_slice %0 {offsets = [0, 0, 46], sizes = [2, 4, 182], strides = [1, 1, 1]} : vector<2x4x256xf32> to vector<2x4x182xf32>
    %282 = vector.extract_strided_slice %1 {offsets = [0, 46], sizes = [4, 1], strides = [1, 1]} : vector<4x75xf32> to vector<4x1xf32>
    %283 = vector.shape_cast %282 : vector<4x1xf32> to vector<1x4x1xf32>
    %284 = vector.broadcast %283 : vector<1x4x1xf32> to vector<2x4x182xf32>
    %285 = arith.mulf %281, %284 : vector<2x4x182xf32>
    %286 = arith.addf %280, %285 : vector<2x4x182xf32>
    %287 = vector.extract_strided_slice %0 {offsets = [0, 0, 47], sizes = [2, 4, 182], strides = [1, 1, 1]} : vector<2x4x256xf32> to vector<2x4x182xf32>
    %288 = vector.extract_strided_slice %1 {offsets = [0, 47], sizes = [4, 1], strides = [1, 1]} : vector<4x75xf32> to vector<4x1xf32>
    %289 = vector.shape_cast %288 : vector<4x1xf32> to vector<1x4x1xf32>
    %290 = vector.broadcast %289 : vector<1x4x1xf32> to vector<2x4x182xf32>
    %291 = arith.mulf %287, %290 : vector<2x4x182xf32>
    %292 = arith.addf %286, %291 : vector<2x4x182xf32>
    %293 = vector.extract_strided_slice %0 {offsets = [0, 0, 48], sizes = [2, 4, 182], strides = [1, 1, 1]} : vector<2x4x256xf32> to vector<2x4x182xf32>
    %294 = vector.extract_strided_slice %1 {offsets = [0, 48], sizes = [4, 1], strides = [1, 1]} : vector<4x75xf32> to vector<4x1xf32>
    %295 = vector.shape_cast %294 : vector<4x1xf32> to vector<1x4x1xf32>
    %296 = vector.broadcast %295 : vector<1x4x1xf32> to vector<2x4x182xf32>
    %297 = arith.mulf %293, %296 : vector<2x4x182xf32>
    %298 = arith.addf %292, %297 : vector<2x4x182xf32>
    %299 = vector.extract_strided_slice %0 {offsets = [0, 0, 49], sizes = [2, 4, 182], strides = [1, 1, 1]} : vector<2x4x256xf32> to vector<2x4x182xf32>
    %300 = vector.extract_strided_slice %1 {offsets = [0, 49], sizes = [4, 1], strides = [1, 1]} : vector<4x75xf32> to vector<4x1xf32>
    %301 = vector.shape_cast %300 : vector<4x1xf32> to vector<1x4x1xf32>
    %302 = vector.broadcast %301 : vector<1x4x1xf32> to vector<2x4x182xf32>
    %303 = arith.mulf %299, %302 : vector<2x4x182xf32>
    %304 = arith.addf %298, %303 : vector<2x4x182xf32>
    %305 = vector.extract_strided_slice %0 {offsets = [0, 0, 50], sizes = [2, 4, 182], strides = [1, 1, 1]} : vector<2x4x256xf32> to vector<2x4x182xf32>
    %306 = vector.extract_strided_slice %1 {offsets = [0, 50], sizes = [4, 1], strides = [1, 1]} : vector<4x75xf32> to vector<4x1xf32>
    %307 = vector.shape_cast %306 : vector<4x1xf32> to vector<1x4x1xf32>
    %308 = vector.broadcast %307 : vector<1x4x1xf32> to vector<2x4x182xf32>
    %309 = arith.mulf %305, %308 : vector<2x4x182xf32>
    %310 = arith.addf %304, %309 : vector<2x4x182xf32>
    %311 = vector.extract_strided_slice %0 {offsets = [0, 0, 51], sizes = [2, 4, 182], strides = [1, 1, 1]} : vector<2x4x256xf32> to vector<2x4x182xf32>
    %312 = vector.extract_strided_slice %1 {offsets = [0, 51], sizes = [4, 1], strides = [1, 1]} : vector<4x75xf32> to vector<4x1xf32>
    %313 = vector.shape_cast %312 : vector<4x1xf32> to vector<1x4x1xf32>
    %314 = vector.broadcast %313 : vector<1x4x1xf32> to vector<2x4x182xf32>
    %315 = arith.mulf %311, %314 : vector<2x4x182xf32>
    %316 = arith.addf %310, %315 : vector<2x4x182xf32>
    %317 = vector.extract_strided_slice %0 {offsets = [0, 0, 52], sizes = [2, 4, 182], strides = [1, 1, 1]} : vector<2x4x256xf32> to vector<2x4x182xf32>
    %318 = vector.extract_strided_slice %1 {offsets = [0, 52], sizes = [4, 1], strides = [1, 1]} : vector<4x75xf32> to vector<4x1xf32>
    %319 = vector.shape_cast %318 : vector<4x1xf32> to vector<1x4x1xf32>
    %320 = vector.broadcast %319 : vector<1x4x1xf32> to vector<2x4x182xf32>
    %321 = arith.mulf %317, %320 : vector<2x4x182xf32>
    %322 = arith.addf %316, %321 : vector<2x4x182xf32>
    %323 = vector.extract_strided_slice %0 {offsets = [0, 0, 53], sizes = [2, 4, 182], strides = [1, 1, 1]} : vector<2x4x256xf32> to vector<2x4x182xf32>
    %324 = vector.extract_strided_slice %1 {offsets = [0, 53], sizes = [4, 1], strides = [1, 1]} : vector<4x75xf32> to vector<4x1xf32>
    %325 = vector.shape_cast %324 : vector<4x1xf32> to vector<1x4x1xf32>
    %326 = vector.broadcast %325 : vector<1x4x1xf32> to vector<2x4x182xf32>
    %327 = arith.mulf %323, %326 : vector<2x4x182xf32>
    %328 = arith.addf %322, %327 : vector<2x4x182xf32>
    %329 = vector.extract_strided_slice %0 {offsets = [0, 0, 54], sizes = [2, 4, 182], strides = [1, 1, 1]} : vector<2x4x256xf32> to vector<2x4x182xf32>
    %330 = vector.extract_strided_slice %1 {offsets = [0, 54], sizes = [4, 1], strides = [1, 1]} : vector<4x75xf32> to vector<4x1xf32>
    %331 = vector.shape_cast %330 : vector<4x1xf32> to vector<1x4x1xf32>
    %332 = vector.broadcast %331 : vector<1x4x1xf32> to vector<2x4x182xf32>
    %333 = arith.mulf %329, %332 : vector<2x4x182xf32>
    %334 = arith.addf %328, %333 : vector<2x4x182xf32>
    %335 = vector.extract_strided_slice %0 {offsets = [0, 0, 55], sizes = [2, 4, 182], strides = [1, 1, 1]} : vector<2x4x256xf32> to vector<2x4x182xf32>
    %336 = vector.extract_strided_slice %1 {offsets = [0, 55], sizes = [4, 1], strides = [1, 1]} : vector<4x75xf32> to vector<4x1xf32>
    %337 = vector.shape_cast %336 : vector<4x1xf32> to vector<1x4x1xf32>
    %338 = vector.broadcast %337 : vector<1x4x1xf32> to vector<2x4x182xf32>
    %339 = arith.mulf %335, %338 : vector<2x4x182xf32>
    %340 = arith.addf %334, %339 : vector<2x4x182xf32>
    %341 = vector.extract_strided_slice %0 {offsets = [0, 0, 56], sizes = [2, 4, 182], strides = [1, 1, 1]} : vector<2x4x256xf32> to vector<2x4x182xf32>
    %342 = vector.extract_strided_slice %1 {offsets = [0, 56], sizes = [4, 1], strides = [1, 1]} : vector<4x75xf32> to vector<4x1xf32>
    %343 = vector.shape_cast %342 : vector<4x1xf32> to vector<1x4x1xf32>
    %344 = vector.broadcast %343 : vector<1x4x1xf32> to vector<2x4x182xf32>
    %345 = arith.mulf %341, %344 : vector<2x4x182xf32>
    %346 = arith.addf %340, %345 : vector<2x4x182xf32>
    %347 = vector.extract_strided_slice %0 {offsets = [0, 0, 57], sizes = [2, 4, 182], strides = [1, 1, 1]} : vector<2x4x256xf32> to vector<2x4x182xf32>
    %348 = vector.extract_strided_slice %1 {offsets = [0, 57], sizes = [4, 1], strides = [1, 1]} : vector<4x75xf32> to vector<4x1xf32>
    %349 = vector.shape_cast %348 : vector<4x1xf32> to vector<1x4x1xf32>
    %350 = vector.broadcast %349 : vector<1x4x1xf32> to vector<2x4x182xf32>
    %351 = arith.mulf %347, %350 : vector<2x4x182xf32>
    %352 = arith.addf %346, %351 : vector<2x4x182xf32>
    %353 = vector.extract_strided_slice %0 {offsets = [0, 0, 58], sizes = [2, 4, 182], strides = [1, 1, 1]} : vector<2x4x256xf32> to vector<2x4x182xf32>
    %354 = vector.extract_strided_slice %1 {offsets = [0, 58], sizes = [4, 1], strides = [1, 1]} : vector<4x75xf32> to vector<4x1xf32>
    %355 = vector.shape_cast %354 : vector<4x1xf32> to vector<1x4x1xf32>
    %356 = vector.broadcast %355 : vector<1x4x1xf32> to vector<2x4x182xf32>
    %357 = arith.mulf %353, %356 : vector<2x4x182xf32>
    %358 = arith.addf %352, %357 : vector<2x4x182xf32>
    %359 = vector.extract_strided_slice %0 {offsets = [0, 0, 59], sizes = [2, 4, 182], strides = [1, 1, 1]} : vector<2x4x256xf32> to vector<2x4x182xf32>
    %360 = vector.extract_strided_slice %1 {offsets = [0, 59], sizes = [4, 1], strides = [1, 1]} : vector<4x75xf32> to vector<4x1xf32>
    %361 = vector.shape_cast %360 : vector<4x1xf32> to vector<1x4x1xf32>
    %362 = vector.broadcast %361 : vector<1x4x1xf32> to vector<2x4x182xf32>
    %363 = arith.mulf %359, %362 : vector<2x4x182xf32>
    %364 = arith.addf %358, %363 : vector<2x4x182xf32>
    %365 = vector.extract_strided_slice %0 {offsets = [0, 0, 60], sizes = [2, 4, 182], strides = [1, 1, 1]} : vector<2x4x256xf32> to vector<2x4x182xf32>
    %366 = vector.extract_strided_slice %1 {offsets = [0, 60], sizes = [4, 1], strides = [1, 1]} : vector<4x75xf32> to vector<4x1xf32>
    %367 = vector.shape_cast %366 : vector<4x1xf32> to vector<1x4x1xf32>
    %368 = vector.broadcast %367 : vector<1x4x1xf32> to vector<2x4x182xf32>
    %369 = arith.mulf %365, %368 : vector<2x4x182xf32>
    %370 = arith.addf %364, %369 : vector<2x4x182xf32>
    %371 = vector.extract_strided_slice %0 {offsets = [0, 0, 61], sizes = [2, 4, 182], strides = [1, 1, 1]} : vector<2x4x256xf32> to vector<2x4x182xf32>
    %372 = vector.extract_strided_slice %1 {offsets = [0, 61], sizes = [4, 1], strides = [1, 1]} : vector<4x75xf32> to vector<4x1xf32>
    %373 = vector.shape_cast %372 : vector<4x1xf32> to vector<1x4x1xf32>
    %374 = vector.broadcast %373 : vector<1x4x1xf32> to vector<2x4x182xf32>
    %375 = arith.mulf %371, %374 : vector<2x4x182xf32>
    %376 = arith.addf %370, %375 : vector<2x4x182xf32>
    %377 = vector.extract_strided_slice %0 {offsets = [0, 0, 62], sizes = [2, 4, 182], strides = [1, 1, 1]} : vector<2x4x256xf32> to vector<2x4x182xf32>
    %378 = vector.extract_strided_slice %1 {offsets = [0, 62], sizes = [4, 1], strides = [1, 1]} : vector<4x75xf32> to vector<4x1xf32>
    %379 = vector.shape_cast %378 : vector<4x1xf32> to vector<1x4x1xf32>
    %380 = vector.broadcast %379 : vector<1x4x1xf32> to vector<2x4x182xf32>
    %381 = arith.mulf %377, %380 : vector<2x4x182xf32>
    %382 = arith.addf %376, %381 : vector<2x4x182xf32>
    %383 = vector.extract_strided_slice %0 {offsets = [0, 0, 63], sizes = [2, 4, 182], strides = [1, 1, 1]} : vector<2x4x256xf32> to vector<2x4x182xf32>
    %384 = vector.extract_strided_slice %1 {offsets = [0, 63], sizes = [4, 1], strides = [1, 1]} : vector<4x75xf32> to vector<4x1xf32>
    %385 = vector.shape_cast %384 : vector<4x1xf32> to vector<1x4x1xf32>
    %386 = vector.broadcast %385 : vector<1x4x1xf32> to vector<2x4x182xf32>
    %387 = arith.mulf %383, %386 : vector<2x4x182xf32>
    %388 = arith.addf %382, %387 : vector<2x4x182xf32>
    %389 = vector.extract_strided_slice %0 {offsets = [0, 0, 64], sizes = [2, 4, 182], strides = [1, 1, 1]} : vector<2x4x256xf32> to vector<2x4x182xf32>
    %390 = vector.extract_strided_slice %1 {offsets = [0, 64], sizes = [4, 1], strides = [1, 1]} : vector<4x75xf32> to vector<4x1xf32>
    %391 = vector.shape_cast %390 : vector<4x1xf32> to vector<1x4x1xf32>
    %392 = vector.broadcast %391 : vector<1x4x1xf32> to vector<2x4x182xf32>
    %393 = arith.mulf %389, %392 : vector<2x4x182xf32>
    %394 = arith.addf %388, %393 : vector<2x4x182xf32>
    %395 = vector.extract_strided_slice %0 {offsets = [0, 0, 65], sizes = [2, 4, 182], strides = [1, 1, 1]} : vector<2x4x256xf32> to vector<2x4x182xf32>
    %396 = vector.extract_strided_slice %1 {offsets = [0, 65], sizes = [4, 1], strides = [1, 1]} : vector<4x75xf32> to vector<4x1xf32>
    %397 = vector.shape_cast %396 : vector<4x1xf32> to vector<1x4x1xf32>
    %398 = vector.broadcast %397 : vector<1x4x1xf32> to vector<2x4x182xf32>
    %399 = arith.mulf %395, %398 : vector<2x4x182xf32>
    %400 = arith.addf %394, %399 : vector<2x4x182xf32>
    %401 = vector.extract_strided_slice %0 {offsets = [0, 0, 66], sizes = [2, 4, 182], strides = [1, 1, 1]} : vector<2x4x256xf32> to vector<2x4x182xf32>
    %402 = vector.extract_strided_slice %1 {offsets = [0, 66], sizes = [4, 1], strides = [1, 1]} : vector<4x75xf32> to vector<4x1xf32>
    %403 = vector.shape_cast %402 : vector<4x1xf32> to vector<1x4x1xf32>
    %404 = vector.broadcast %403 : vector<1x4x1xf32> to vector<2x4x182xf32>
    %405 = arith.mulf %401, %404 : vector<2x4x182xf32>
    %406 = arith.addf %400, %405 : vector<2x4x182xf32>
    %407 = vector.extract_strided_slice %0 {offsets = [0, 0, 67], sizes = [2, 4, 182], strides = [1, 1, 1]} : vector<2x4x256xf32> to vector<2x4x182xf32>
    %408 = vector.extract_strided_slice %1 {offsets = [0, 67], sizes = [4, 1], strides = [1, 1]} : vector<4x75xf32> to vector<4x1xf32>
    %409 = vector.shape_cast %408 : vector<4x1xf32> to vector<1x4x1xf32>
    %410 = vector.broadcast %409 : vector<1x4x1xf32> to vector<2x4x182xf32>
    %411 = arith.mulf %407, %410 : vector<2x4x182xf32>
    %412 = arith.addf %406, %411 : vector<2x4x182xf32>
    %413 = vector.extract_strided_slice %0 {offsets = [0, 0, 68], sizes = [2, 4, 182], strides = [1, 1, 1]} : vector<2x4x256xf32> to vector<2x4x182xf32>
    %414 = vector.extract_strided_slice %1 {offsets = [0, 68], sizes = [4, 1], strides = [1, 1]} : vector<4x75xf32> to vector<4x1xf32>
    %415 = vector.shape_cast %414 : vector<4x1xf32> to vector<1x4x1xf32>
    %416 = vector.broadcast %415 : vector<1x4x1xf32> to vector<2x4x182xf32>
    %417 = arith.mulf %413, %416 : vector<2x4x182xf32>
    %418 = arith.addf %412, %417 : vector<2x4x182xf32>
    %419 = vector.extract_strided_slice %0 {offsets = [0, 0, 69], sizes = [2, 4, 182], strides = [1, 1, 1]} : vector<2x4x256xf32> to vector<2x4x182xf32>
    %420 = vector.extract_strided_slice %1 {offsets = [0, 69], sizes = [4, 1], strides = [1, 1]} : vector<4x75xf32> to vector<4x1xf32>
    %421 = vector.shape_cast %420 : vector<4x1xf32> to vector<1x4x1xf32>
    %422 = vector.broadcast %421 : vector<1x4x1xf32> to vector<2x4x182xf32>
    %423 = arith.mulf %419, %422 : vector<2x4x182xf32>
    %424 = arith.addf %418, %423 : vector<2x4x182xf32>
    %425 = vector.extract_strided_slice %0 {offsets = [0, 0, 70], sizes = [2, 4, 182], strides = [1, 1, 1]} : vector<2x4x256xf32> to vector<2x4x182xf32>
    %426 = vector.extract_strided_slice %1 {offsets = [0, 70], sizes = [4, 1], strides = [1, 1]} : vector<4x75xf32> to vector<4x1xf32>
    %427 = vector.shape_cast %426 : vector<4x1xf32> to vector<1x4x1xf32>
    %428 = vector.broadcast %427 : vector<1x4x1xf32> to vector<2x4x182xf32>
    %429 = arith.mulf %425, %428 : vector<2x4x182xf32>
    %430 = arith.addf %424, %429 : vector<2x4x182xf32>
    %431 = vector.extract_strided_slice %0 {offsets = [0, 0, 71], sizes = [2, 4, 182], strides = [1, 1, 1]} : vector<2x4x256xf32> to vector<2x4x182xf32>
    %432 = vector.extract_strided_slice %1 {offsets = [0, 71], sizes = [4, 1], strides = [1, 1]} : vector<4x75xf32> to vector<4x1xf32>
    %433 = vector.shape_cast %432 : vector<4x1xf32> to vector<1x4x1xf32>
    %434 = vector.broadcast %433 : vector<1x4x1xf32> to vector<2x4x182xf32>
    %435 = arith.mulf %431, %434 : vector<2x4x182xf32>
    %436 = arith.addf %430, %435 : vector<2x4x182xf32>
    %437 = vector.extract_strided_slice %0 {offsets = [0, 0, 72], sizes = [2, 4, 182], strides = [1, 1, 1]} : vector<2x4x256xf32> to vector<2x4x182xf32>
    %438 = vector.extract_strided_slice %1 {offsets = [0, 72], sizes = [4, 1], strides = [1, 1]} : vector<4x75xf32> to vector<4x1xf32>
    %439 = vector.shape_cast %438 : vector<4x1xf32> to vector<1x4x1xf32>
    %440 = vector.broadcast %439 : vector<1x4x1xf32> to vector<2x4x182xf32>
    %441 = arith.mulf %437, %440 : vector<2x4x182xf32>
    %442 = arith.addf %436, %441 : vector<2x4x182xf32>
    %443 = vector.extract_strided_slice %0 {offsets = [0, 0, 73], sizes = [2, 4, 182], strides = [1, 1, 1]} : vector<2x4x256xf32> to vector<2x4x182xf32>
    %444 = vector.extract_strided_slice %1 {offsets = [0, 73], sizes = [4, 1], strides = [1, 1]} : vector<4x75xf32> to vector<4x1xf32>
    %445 = vector.shape_cast %444 : vector<4x1xf32> to vector<1x4x1xf32>
    %446 = vector.broadcast %445 : vector<1x4x1xf32> to vector<2x4x182xf32>
    %447 = arith.mulf %443, %446 : vector<2x4x182xf32>
    %448 = arith.addf %442, %447 : vector<2x4x182xf32>
    %449 = vector.extract_strided_slice %0 {offsets = [0, 0, 74], sizes = [2, 4, 182], strides = [1, 1, 1]} : vector<2x4x256xf32> to vector<2x4x182xf32>
    %450 = vector.extract_strided_slice %1 {offsets = [0, 74], sizes = [4, 1], strides = [1, 1]} : vector<4x75xf32> to vector<4x1xf32>
    %451 = vector.shape_cast %450 : vector<4x1xf32> to vector<1x4x1xf32>
    %452 = vector.broadcast %451 : vector<1x4x1xf32> to vector<2x4x182xf32>
    %453 = arith.mulf %449, %452 : vector<2x4x182xf32>
    %454 = arith.addf %448, %453 : vector<2x4x182xf32>
    %cst_8 = arith.constant dense<0.000000e+00> : vector<4xf32>
    %455 = vector.multi_reduction <add>, %454, %cst_8 [0, 2] : vector<2x4x182xf32> to vector<4xf32>
    %456 = vector.shape_cast %455 : vector<4xf32> to vector<1x4x1xf32>
    %cst_9 = arith.constant 3.640000e+02 : f32
    %457 = vector.broadcast %cst_9 : f32 to vector<1x4x1xf32>
    %458 = arith.divf %456, %457 : vector<1x4x1xf32>
    %459 = vector.broadcast %458 : vector<1x4x1xf32> to vector<2x4x182xf32>
    %460 = arith.subf %454, %459 : vector<2x4x182xf32>
    %461 = arith.mulf %460, %460 : vector<2x4x182xf32>
    %cst_10 = arith.constant dense<0.000000e+00> : vector<4xf32>
    %462 = vector.multi_reduction <add>, %461, %cst_10 [0, 2] : vector<2x4x182xf32> to vector<4xf32>
    %463 = vector.shape_cast %462 : vector<4xf32> to vector<1x4x1xf32>
    %cst_11 = arith.constant 3.640000e+02 : f32
    %464 = vector.broadcast %cst_11 : f32 to vector<1x4x1xf32>
    %465 = arith.divf %463, %464 : vector<1x4x1xf32>
    %466 = vector.broadcast %458 : vector<1x4x1xf32> to vector<2x4x182xf32>
    %467 = arith.subf %454, %466 : vector<2x4x182xf32>
    %cst_12 = arith.constant 9.99999974E-6 : f32
    %468 = vector.broadcast %cst_12 : f32 to vector<1x4x1xf32>
    %469 = arith.addf %465, %468 : vector<1x4x1xf32>
    %470 = math.rsqrt %469 : vector<1x4x1xf32>
    %471 = vector.broadcast %470 : vector<1x4x1xf32> to vector<2x4x182xf32>
    %472 = arith.mulf %467, %471 : vector<2x4x182xf32>
    %473 = math.absf %472 : vector<2x4x182xf32>
    %cst_13 = arith.constant 0.000000e+00 : f32
    %474 = vector.broadcast %cst_13 : f32 to vector<2x4x108xf32>
    %475 = vector.extract_strided_slice %473 {offsets = [0, 0, 0], sizes = [2, 4, 108], strides = [1, 1, 1]} : vector<2x4x182xf32> to vector<2x4x108xf32>
    %476 = vector.extract_strided_slice %2 {offsets = [0, 0], sizes = [4, 1], strides = [1, 1]} : vector<4x75xf32> to vector<4x1xf32>
    %477 = vector.shape_cast %476 : vector<4x1xf32> to vector<1x4x1xf32>
    %478 = vector.broadcast %477 : vector<1x4x1xf32> to vector<2x4x108xf32>
    %479 = arith.mulf %475, %478 : vector<2x4x108xf32>
    %480 = arith.addf %474, %479 : vector<2x4x108xf32>
    %481 = vector.extract_strided_slice %473 {offsets = [0, 0, 1], sizes = [2, 4, 108], strides = [1, 1, 1]} : vector<2x4x182xf32> to vector<2x4x108xf32>
    %482 = vector.extract_strided_slice %2 {offsets = [0, 1], sizes = [4, 1], strides = [1, 1]} : vector<4x75xf32> to vector<4x1xf32>
    %483 = vector.shape_cast %482 : vector<4x1xf32> to vector<1x4x1xf32>
    %484 = vector.broadcast %483 : vector<1x4x1xf32> to vector<2x4x108xf32>
    %485 = arith.mulf %481, %484 : vector<2x4x108xf32>
    %486 = arith.addf %480, %485 : vector<2x4x108xf32>
    %487 = vector.extract_strided_slice %473 {offsets = [0, 0, 2], sizes = [2, 4, 108], strides = [1, 1, 1]} : vector<2x4x182xf32> to vector<2x4x108xf32>
    %488 = vector.extract_strided_slice %2 {offsets = [0, 2], sizes = [4, 1], strides = [1, 1]} : vector<4x75xf32> to vector<4x1xf32>
    %489 = vector.shape_cast %488 : vector<4x1xf32> to vector<1x4x1xf32>
    %490 = vector.broadcast %489 : vector<1x4x1xf32> to vector<2x4x108xf32>
    %491 = arith.mulf %487, %490 : vector<2x4x108xf32>
    %492 = arith.addf %486, %491 : vector<2x4x108xf32>
    %493 = vector.extract_strided_slice %473 {offsets = [0, 0, 3], sizes = [2, 4, 108], strides = [1, 1, 1]} : vector<2x4x182xf32> to vector<2x4x108xf32>
    %494 = vector.extract_strided_slice %2 {offsets = [0, 3], sizes = [4, 1], strides = [1, 1]} : vector<4x75xf32> to vector<4x1xf32>
    %495 = vector.shape_cast %494 : vector<4x1xf32> to vector<1x4x1xf32>
    %496 = vector.broadcast %495 : vector<1x4x1xf32> to vector<2x4x108xf32>
    %497 = arith.mulf %493, %496 : vector<2x4x108xf32>
    %498 = arith.addf %492, %497 : vector<2x4x108xf32>
    %499 = vector.extract_strided_slice %473 {offsets = [0, 0, 4], sizes = [2, 4, 108], strides = [1, 1, 1]} : vector<2x4x182xf32> to vector<2x4x108xf32>
    %500 = vector.extract_strided_slice %2 {offsets = [0, 4], sizes = [4, 1], strides = [1, 1]} : vector<4x75xf32> to vector<4x1xf32>
    %501 = vector.shape_cast %500 : vector<4x1xf32> to vector<1x4x1xf32>
    %502 = vector.broadcast %501 : vector<1x4x1xf32> to vector<2x4x108xf32>
    %503 = arith.mulf %499, %502 : vector<2x4x108xf32>
    %504 = arith.addf %498, %503 : vector<2x4x108xf32>
    %505 = vector.extract_strided_slice %473 {offsets = [0, 0, 5], sizes = [2, 4, 108], strides = [1, 1, 1]} : vector<2x4x182xf32> to vector<2x4x108xf32>
    %506 = vector.extract_strided_slice %2 {offsets = [0, 5], sizes = [4, 1], strides = [1, 1]} : vector<4x75xf32> to vector<4x1xf32>
    %507 = vector.shape_cast %506 : vector<4x1xf32> to vector<1x4x1xf32>
    %508 = vector.broadcast %507 : vector<1x4x1xf32> to vector<2x4x108xf32>
    %509 = arith.mulf %505, %508 : vector<2x4x108xf32>
    %510 = arith.addf %504, %509 : vector<2x4x108xf32>
    %511 = vector.extract_strided_slice %473 {offsets = [0, 0, 6], sizes = [2, 4, 108], strides = [1, 1, 1]} : vector<2x4x182xf32> to vector<2x4x108xf32>
    %512 = vector.extract_strided_slice %2 {offsets = [0, 6], sizes = [4, 1], strides = [1, 1]} : vector<4x75xf32> to vector<4x1xf32>
    %513 = vector.shape_cast %512 : vector<4x1xf32> to vector<1x4x1xf32>
    %514 = vector.broadcast %513 : vector<1x4x1xf32> to vector<2x4x108xf32>
    %515 = arith.mulf %511, %514 : vector<2x4x108xf32>
    %516 = arith.addf %510, %515 : vector<2x4x108xf32>
    %517 = vector.extract_strided_slice %473 {offsets = [0, 0, 7], sizes = [2, 4, 108], strides = [1, 1, 1]} : vector<2x4x182xf32> to vector<2x4x108xf32>
    %518 = vector.extract_strided_slice %2 {offsets = [0, 7], sizes = [4, 1], strides = [1, 1]} : vector<4x75xf32> to vector<4x1xf32>
    %519 = vector.shape_cast %518 : vector<4x1xf32> to vector<1x4x1xf32>
    %520 = vector.broadcast %519 : vector<1x4x1xf32> to vector<2x4x108xf32>
    %521 = arith.mulf %517, %520 : vector<2x4x108xf32>
    %522 = arith.addf %516, %521 : vector<2x4x108xf32>
    %523 = vector.extract_strided_slice %473 {offsets = [0, 0, 8], sizes = [2, 4, 108], strides = [1, 1, 1]} : vector<2x4x182xf32> to vector<2x4x108xf32>
    %524 = vector.extract_strided_slice %2 {offsets = [0, 8], sizes = [4, 1], strides = [1, 1]} : vector<4x75xf32> to vector<4x1xf32>
    %525 = vector.shape_cast %524 : vector<4x1xf32> to vector<1x4x1xf32>
    %526 = vector.broadcast %525 : vector<1x4x1xf32> to vector<2x4x108xf32>
    %527 = arith.mulf %523, %526 : vector<2x4x108xf32>
    %528 = arith.addf %522, %527 : vector<2x4x108xf32>
    %529 = vector.extract_strided_slice %473 {offsets = [0, 0, 9], sizes = [2, 4, 108], strides = [1, 1, 1]} : vector<2x4x182xf32> to vector<2x4x108xf32>
    %530 = vector.extract_strided_slice %2 {offsets = [0, 9], sizes = [4, 1], strides = [1, 1]} : vector<4x75xf32> to vector<4x1xf32>
    %531 = vector.shape_cast %530 : vector<4x1xf32> to vector<1x4x1xf32>
    %532 = vector.broadcast %531 : vector<1x4x1xf32> to vector<2x4x108xf32>
    %533 = arith.mulf %529, %532 : vector<2x4x108xf32>
    %534 = arith.addf %528, %533 : vector<2x4x108xf32>
    %535 = vector.extract_strided_slice %473 {offsets = [0, 0, 10], sizes = [2, 4, 108], strides = [1, 1, 1]} : vector<2x4x182xf32> to vector<2x4x108xf32>
    %536 = vector.extract_strided_slice %2 {offsets = [0, 10], sizes = [4, 1], strides = [1, 1]} : vector<4x75xf32> to vector<4x1xf32>
    %537 = vector.shape_cast %536 : vector<4x1xf32> to vector<1x4x1xf32>
    %538 = vector.broadcast %537 : vector<1x4x1xf32> to vector<2x4x108xf32>
    %539 = arith.mulf %535, %538 : vector<2x4x108xf32>
    %540 = arith.addf %534, %539 : vector<2x4x108xf32>
    %541 = vector.extract_strided_slice %473 {offsets = [0, 0, 11], sizes = [2, 4, 108], strides = [1, 1, 1]} : vector<2x4x182xf32> to vector<2x4x108xf32>
    %542 = vector.extract_strided_slice %2 {offsets = [0, 11], sizes = [4, 1], strides = [1, 1]} : vector<4x75xf32> to vector<4x1xf32>
    %543 = vector.shape_cast %542 : vector<4x1xf32> to vector<1x4x1xf32>
    %544 = vector.broadcast %543 : vector<1x4x1xf32> to vector<2x4x108xf32>
    %545 = arith.mulf %541, %544 : vector<2x4x108xf32>
    %546 = arith.addf %540, %545 : vector<2x4x108xf32>
    %547 = vector.extract_strided_slice %473 {offsets = [0, 0, 12], sizes = [2, 4, 108], strides = [1, 1, 1]} : vector<2x4x182xf32> to vector<2x4x108xf32>
    %548 = vector.extract_strided_slice %2 {offsets = [0, 12], sizes = [4, 1], strides = [1, 1]} : vector<4x75xf32> to vector<4x1xf32>
    %549 = vector.shape_cast %548 : vector<4x1xf32> to vector<1x4x1xf32>
    %550 = vector.broadcast %549 : vector<1x4x1xf32> to vector<2x4x108xf32>
    %551 = arith.mulf %547, %550 : vector<2x4x108xf32>
    %552 = arith.addf %546, %551 : vector<2x4x108xf32>
    %553 = vector.extract_strided_slice %473 {offsets = [0, 0, 13], sizes = [2, 4, 108], strides = [1, 1, 1]} : vector<2x4x182xf32> to vector<2x4x108xf32>
    %554 = vector.extract_strided_slice %2 {offsets = [0, 13], sizes = [4, 1], strides = [1, 1]} : vector<4x75xf32> to vector<4x1xf32>
    %555 = vector.shape_cast %554 : vector<4x1xf32> to vector<1x4x1xf32>
    %556 = vector.broadcast %555 : vector<1x4x1xf32> to vector<2x4x108xf32>
    %557 = arith.mulf %553, %556 : vector<2x4x108xf32>
    %558 = arith.addf %552, %557 : vector<2x4x108xf32>
    %559 = vector.extract_strided_slice %473 {offsets = [0, 0, 14], sizes = [2, 4, 108], strides = [1, 1, 1]} : vector<2x4x182xf32> to vector<2x4x108xf32>
    %560 = vector.extract_strided_slice %2 {offsets = [0, 14], sizes = [4, 1], strides = [1, 1]} : vector<4x75xf32> to vector<4x1xf32>
    %561 = vector.shape_cast %560 : vector<4x1xf32> to vector<1x4x1xf32>
    %562 = vector.broadcast %561 : vector<1x4x1xf32> to vector<2x4x108xf32>
    %563 = arith.mulf %559, %562 : vector<2x4x108xf32>
    %564 = arith.addf %558, %563 : vector<2x4x108xf32>
    %565 = vector.extract_strided_slice %473 {offsets = [0, 0, 15], sizes = [2, 4, 108], strides = [1, 1, 1]} : vector<2x4x182xf32> to vector<2x4x108xf32>
    %566 = vector.extract_strided_slice %2 {offsets = [0, 15], sizes = [4, 1], strides = [1, 1]} : vector<4x75xf32> to vector<4x1xf32>
    %567 = vector.shape_cast %566 : vector<4x1xf32> to vector<1x4x1xf32>
    %568 = vector.broadcast %567 : vector<1x4x1xf32> to vector<2x4x108xf32>
    %569 = arith.mulf %565, %568 : vector<2x4x108xf32>
    %570 = arith.addf %564, %569 : vector<2x4x108xf32>
    %571 = vector.extract_strided_slice %473 {offsets = [0, 0, 16], sizes = [2, 4, 108], strides = [1, 1, 1]} : vector<2x4x182xf32> to vector<2x4x108xf32>
    %572 = vector.extract_strided_slice %2 {offsets = [0, 16], sizes = [4, 1], strides = [1, 1]} : vector<4x75xf32> to vector<4x1xf32>
    %573 = vector.shape_cast %572 : vector<4x1xf32> to vector<1x4x1xf32>
    %574 = vector.broadcast %573 : vector<1x4x1xf32> to vector<2x4x108xf32>
    %575 = arith.mulf %571, %574 : vector<2x4x108xf32>
    %576 = arith.addf %570, %575 : vector<2x4x108xf32>
    %577 = vector.extract_strided_slice %473 {offsets = [0, 0, 17], sizes = [2, 4, 108], strides = [1, 1, 1]} : vector<2x4x182xf32> to vector<2x4x108xf32>
    %578 = vector.extract_strided_slice %2 {offsets = [0, 17], sizes = [4, 1], strides = [1, 1]} : vector<4x75xf32> to vector<4x1xf32>
    %579 = vector.shape_cast %578 : vector<4x1xf32> to vector<1x4x1xf32>
    %580 = vector.broadcast %579 : vector<1x4x1xf32> to vector<2x4x108xf32>
    %581 = arith.mulf %577, %580 : vector<2x4x108xf32>
    %582 = arith.addf %576, %581 : vector<2x4x108xf32>
    %583 = vector.extract_strided_slice %473 {offsets = [0, 0, 18], sizes = [2, 4, 108], strides = [1, 1, 1]} : vector<2x4x182xf32> to vector<2x4x108xf32>
    %584 = vector.extract_strided_slice %2 {offsets = [0, 18], sizes = [4, 1], strides = [1, 1]} : vector<4x75xf32> to vector<4x1xf32>
    %585 = vector.shape_cast %584 : vector<4x1xf32> to vector<1x4x1xf32>
    %586 = vector.broadcast %585 : vector<1x4x1xf32> to vector<2x4x108xf32>
    %587 = arith.mulf %583, %586 : vector<2x4x108xf32>
    %588 = arith.addf %582, %587 : vector<2x4x108xf32>
    %589 = vector.extract_strided_slice %473 {offsets = [0, 0, 19], sizes = [2, 4, 108], strides = [1, 1, 1]} : vector<2x4x182xf32> to vector<2x4x108xf32>
    %590 = vector.extract_strided_slice %2 {offsets = [0, 19], sizes = [4, 1], strides = [1, 1]} : vector<4x75xf32> to vector<4x1xf32>
    %591 = vector.shape_cast %590 : vector<4x1xf32> to vector<1x4x1xf32>
    %592 = vector.broadcast %591 : vector<1x4x1xf32> to vector<2x4x108xf32>
    %593 = arith.mulf %589, %592 : vector<2x4x108xf32>
    %594 = arith.addf %588, %593 : vector<2x4x108xf32>
    %595 = vector.extract_strided_slice %473 {offsets = [0, 0, 20], sizes = [2, 4, 108], strides = [1, 1, 1]} : vector<2x4x182xf32> to vector<2x4x108xf32>
    %596 = vector.extract_strided_slice %2 {offsets = [0, 20], sizes = [4, 1], strides = [1, 1]} : vector<4x75xf32> to vector<4x1xf32>
    %597 = vector.shape_cast %596 : vector<4x1xf32> to vector<1x4x1xf32>
    %598 = vector.broadcast %597 : vector<1x4x1xf32> to vector<2x4x108xf32>
    %599 = arith.mulf %595, %598 : vector<2x4x108xf32>
    %600 = arith.addf %594, %599 : vector<2x4x108xf32>
    %601 = vector.extract_strided_slice %473 {offsets = [0, 0, 21], sizes = [2, 4, 108], strides = [1, 1, 1]} : vector<2x4x182xf32> to vector<2x4x108xf32>
    %602 = vector.extract_strided_slice %2 {offsets = [0, 21], sizes = [4, 1], strides = [1, 1]} : vector<4x75xf32> to vector<4x1xf32>
    %603 = vector.shape_cast %602 : vector<4x1xf32> to vector<1x4x1xf32>
    %604 = vector.broadcast %603 : vector<1x4x1xf32> to vector<2x4x108xf32>
    %605 = arith.mulf %601, %604 : vector<2x4x108xf32>
    %606 = arith.addf %600, %605 : vector<2x4x108xf32>
    %607 = vector.extract_strided_slice %473 {offsets = [0, 0, 22], sizes = [2, 4, 108], strides = [1, 1, 1]} : vector<2x4x182xf32> to vector<2x4x108xf32>
    %608 = vector.extract_strided_slice %2 {offsets = [0, 22], sizes = [4, 1], strides = [1, 1]} : vector<4x75xf32> to vector<4x1xf32>
    %609 = vector.shape_cast %608 : vector<4x1xf32> to vector<1x4x1xf32>
    %610 = vector.broadcast %609 : vector<1x4x1xf32> to vector<2x4x108xf32>
    %611 = arith.mulf %607, %610 : vector<2x4x108xf32>
    %612 = arith.addf %606, %611 : vector<2x4x108xf32>
    %613 = vector.extract_strided_slice %473 {offsets = [0, 0, 23], sizes = [2, 4, 108], strides = [1, 1, 1]} : vector<2x4x182xf32> to vector<2x4x108xf32>
    %614 = vector.extract_strided_slice %2 {offsets = [0, 23], sizes = [4, 1], strides = [1, 1]} : vector<4x75xf32> to vector<4x1xf32>
    %615 = vector.shape_cast %614 : vector<4x1xf32> to vector<1x4x1xf32>
    %616 = vector.broadcast %615 : vector<1x4x1xf32> to vector<2x4x108xf32>
    %617 = arith.mulf %613, %616 : vector<2x4x108xf32>
    %618 = arith.addf %612, %617 : vector<2x4x108xf32>
    %619 = vector.extract_strided_slice %473 {offsets = [0, 0, 24], sizes = [2, 4, 108], strides = [1, 1, 1]} : vector<2x4x182xf32> to vector<2x4x108xf32>
    %620 = vector.extract_strided_slice %2 {offsets = [0, 24], sizes = [4, 1], strides = [1, 1]} : vector<4x75xf32> to vector<4x1xf32>
    %621 = vector.shape_cast %620 : vector<4x1xf32> to vector<1x4x1xf32>
    %622 = vector.broadcast %621 : vector<1x4x1xf32> to vector<2x4x108xf32>
    %623 = arith.mulf %619, %622 : vector<2x4x108xf32>
    %624 = arith.addf %618, %623 : vector<2x4x108xf32>
    %625 = vector.extract_strided_slice %473 {offsets = [0, 0, 25], sizes = [2, 4, 108], strides = [1, 1, 1]} : vector<2x4x182xf32> to vector<2x4x108xf32>
    %626 = vector.extract_strided_slice %2 {offsets = [0, 25], sizes = [4, 1], strides = [1, 1]} : vector<4x75xf32> to vector<4x1xf32>
    %627 = vector.shape_cast %626 : vector<4x1xf32> to vector<1x4x1xf32>
    %628 = vector.broadcast %627 : vector<1x4x1xf32> to vector<2x4x108xf32>
    %629 = arith.mulf %625, %628 : vector<2x4x108xf32>
    %630 = arith.addf %624, %629 : vector<2x4x108xf32>
    %631 = vector.extract_strided_slice %473 {offsets = [0, 0, 26], sizes = [2, 4, 108], strides = [1, 1, 1]} : vector<2x4x182xf32> to vector<2x4x108xf32>
    %632 = vector.extract_strided_slice %2 {offsets = [0, 26], sizes = [4, 1], strides = [1, 1]} : vector<4x75xf32> to vector<4x1xf32>
    %633 = vector.shape_cast %632 : vector<4x1xf32> to vector<1x4x1xf32>
    %634 = vector.broadcast %633 : vector<1x4x1xf32> to vector<2x4x108xf32>
    %635 = arith.mulf %631, %634 : vector<2x4x108xf32>
    %636 = arith.addf %630, %635 : vector<2x4x108xf32>
    %637 = vector.extract_strided_slice %473 {offsets = [0, 0, 27], sizes = [2, 4, 108], strides = [1, 1, 1]} : vector<2x4x182xf32> to vector<2x4x108xf32>
    %638 = vector.extract_strided_slice %2 {offsets = [0, 27], sizes = [4, 1], strides = [1, 1]} : vector<4x75xf32> to vector<4x1xf32>
    %639 = vector.shape_cast %638 : vector<4x1xf32> to vector<1x4x1xf32>
    %640 = vector.broadcast %639 : vector<1x4x1xf32> to vector<2x4x108xf32>
    %641 = arith.mulf %637, %640 : vector<2x4x108xf32>
    %642 = arith.addf %636, %641 : vector<2x4x108xf32>
    %643 = vector.extract_strided_slice %473 {offsets = [0, 0, 28], sizes = [2, 4, 108], strides = [1, 1, 1]} : vector<2x4x182xf32> to vector<2x4x108xf32>
    %644 = vector.extract_strided_slice %2 {offsets = [0, 28], sizes = [4, 1], strides = [1, 1]} : vector<4x75xf32> to vector<4x1xf32>
    %645 = vector.shape_cast %644 : vector<4x1xf32> to vector<1x4x1xf32>
    %646 = vector.broadcast %645 : vector<1x4x1xf32> to vector<2x4x108xf32>
    %647 = arith.mulf %643, %646 : vector<2x4x108xf32>
    %648 = arith.addf %642, %647 : vector<2x4x108xf32>
    %649 = vector.extract_strided_slice %473 {offsets = [0, 0, 29], sizes = [2, 4, 108], strides = [1, 1, 1]} : vector<2x4x182xf32> to vector<2x4x108xf32>
    %650 = vector.extract_strided_slice %2 {offsets = [0, 29], sizes = [4, 1], strides = [1, 1]} : vector<4x75xf32> to vector<4x1xf32>
    %651 = vector.shape_cast %650 : vector<4x1xf32> to vector<1x4x1xf32>
    %652 = vector.broadcast %651 : vector<1x4x1xf32> to vector<2x4x108xf32>
    %653 = arith.mulf %649, %652 : vector<2x4x108xf32>
    %654 = arith.addf %648, %653 : vector<2x4x108xf32>
    %655 = vector.extract_strided_slice %473 {offsets = [0, 0, 30], sizes = [2, 4, 108], strides = [1, 1, 1]} : vector<2x4x182xf32> to vector<2x4x108xf32>
    %656 = vector.extract_strided_slice %2 {offsets = [0, 30], sizes = [4, 1], strides = [1, 1]} : vector<4x75xf32> to vector<4x1xf32>
    %657 = vector.shape_cast %656 : vector<4x1xf32> to vector<1x4x1xf32>
    %658 = vector.broadcast %657 : vector<1x4x1xf32> to vector<2x4x108xf32>
    %659 = arith.mulf %655, %658 : vector<2x4x108xf32>
    %660 = arith.addf %654, %659 : vector<2x4x108xf32>
    %661 = vector.extract_strided_slice %473 {offsets = [0, 0, 31], sizes = [2, 4, 108], strides = [1, 1, 1]} : vector<2x4x182xf32> to vector<2x4x108xf32>
    %662 = vector.extract_strided_slice %2 {offsets = [0, 31], sizes = [4, 1], strides = [1, 1]} : vector<4x75xf32> to vector<4x1xf32>
    %663 = vector.shape_cast %662 : vector<4x1xf32> to vector<1x4x1xf32>
    %664 = vector.broadcast %663 : vector<1x4x1xf32> to vector<2x4x108xf32>
    %665 = arith.mulf %661, %664 : vector<2x4x108xf32>
    %666 = arith.addf %660, %665 : vector<2x4x108xf32>
    %667 = vector.extract_strided_slice %473 {offsets = [0, 0, 32], sizes = [2, 4, 108], strides = [1, 1, 1]} : vector<2x4x182xf32> to vector<2x4x108xf32>
    %668 = vector.extract_strided_slice %2 {offsets = [0, 32], sizes = [4, 1], strides = [1, 1]} : vector<4x75xf32> to vector<4x1xf32>
    %669 = vector.shape_cast %668 : vector<4x1xf32> to vector<1x4x1xf32>
    %670 = vector.broadcast %669 : vector<1x4x1xf32> to vector<2x4x108xf32>
    %671 = arith.mulf %667, %670 : vector<2x4x108xf32>
    %672 = arith.addf %666, %671 : vector<2x4x108xf32>
    %673 = vector.extract_strided_slice %473 {offsets = [0, 0, 33], sizes = [2, 4, 108], strides = [1, 1, 1]} : vector<2x4x182xf32> to vector<2x4x108xf32>
    %674 = vector.extract_strided_slice %2 {offsets = [0, 33], sizes = [4, 1], strides = [1, 1]} : vector<4x75xf32> to vector<4x1xf32>
    %675 = vector.shape_cast %674 : vector<4x1xf32> to vector<1x4x1xf32>
    %676 = vector.broadcast %675 : vector<1x4x1xf32> to vector<2x4x108xf32>
    %677 = arith.mulf %673, %676 : vector<2x4x108xf32>
    %678 = arith.addf %672, %677 : vector<2x4x108xf32>
    %679 = vector.extract_strided_slice %473 {offsets = [0, 0, 34], sizes = [2, 4, 108], strides = [1, 1, 1]} : vector<2x4x182xf32> to vector<2x4x108xf32>
    %680 = vector.extract_strided_slice %2 {offsets = [0, 34], sizes = [4, 1], strides = [1, 1]} : vector<4x75xf32> to vector<4x1xf32>
    %681 = vector.shape_cast %680 : vector<4x1xf32> to vector<1x4x1xf32>
    %682 = vector.broadcast %681 : vector<1x4x1xf32> to vector<2x4x108xf32>
    %683 = arith.mulf %679, %682 : vector<2x4x108xf32>
    %684 = arith.addf %678, %683 : vector<2x4x108xf32>
    %685 = vector.extract_strided_slice %473 {offsets = [0, 0, 35], sizes = [2, 4, 108], strides = [1, 1, 1]} : vector<2x4x182xf32> to vector<2x4x108xf32>
    %686 = vector.extract_strided_slice %2 {offsets = [0, 35], sizes = [4, 1], strides = [1, 1]} : vector<4x75xf32> to vector<4x1xf32>
    %687 = vector.shape_cast %686 : vector<4x1xf32> to vector<1x4x1xf32>
    %688 = vector.broadcast %687 : vector<1x4x1xf32> to vector<2x4x108xf32>
    %689 = arith.mulf %685, %688 : vector<2x4x108xf32>
    %690 = arith.addf %684, %689 : vector<2x4x108xf32>
    %691 = vector.extract_strided_slice %473 {offsets = [0, 0, 36], sizes = [2, 4, 108], strides = [1, 1, 1]} : vector<2x4x182xf32> to vector<2x4x108xf32>
    %692 = vector.extract_strided_slice %2 {offsets = [0, 36], sizes = [4, 1], strides = [1, 1]} : vector<4x75xf32> to vector<4x1xf32>
    %693 = vector.shape_cast %692 : vector<4x1xf32> to vector<1x4x1xf32>
    %694 = vector.broadcast %693 : vector<1x4x1xf32> to vector<2x4x108xf32>
    %695 = arith.mulf %691, %694 : vector<2x4x108xf32>
    %696 = arith.addf %690, %695 : vector<2x4x108xf32>
    %697 = vector.extract_strided_slice %473 {offsets = [0, 0, 37], sizes = [2, 4, 108], strides = [1, 1, 1]} : vector<2x4x182xf32> to vector<2x4x108xf32>
    %698 = vector.extract_strided_slice %2 {offsets = [0, 37], sizes = [4, 1], strides = [1, 1]} : vector<4x75xf32> to vector<4x1xf32>
    %699 = vector.shape_cast %698 : vector<4x1xf32> to vector<1x4x1xf32>
    %700 = vector.broadcast %699 : vector<1x4x1xf32> to vector<2x4x108xf32>
    %701 = arith.mulf %697, %700 : vector<2x4x108xf32>
    %702 = arith.addf %696, %701 : vector<2x4x108xf32>
    %703 = vector.extract_strided_slice %473 {offsets = [0, 0, 38], sizes = [2, 4, 108], strides = [1, 1, 1]} : vector<2x4x182xf32> to vector<2x4x108xf32>
    %704 = vector.extract_strided_slice %2 {offsets = [0, 38], sizes = [4, 1], strides = [1, 1]} : vector<4x75xf32> to vector<4x1xf32>
    %705 = vector.shape_cast %704 : vector<4x1xf32> to vector<1x4x1xf32>
    %706 = vector.broadcast %705 : vector<1x4x1xf32> to vector<2x4x108xf32>
    %707 = arith.mulf %703, %706 : vector<2x4x108xf32>
    %708 = arith.addf %702, %707 : vector<2x4x108xf32>
    %709 = vector.extract_strided_slice %473 {offsets = [0, 0, 39], sizes = [2, 4, 108], strides = [1, 1, 1]} : vector<2x4x182xf32> to vector<2x4x108xf32>
    %710 = vector.extract_strided_slice %2 {offsets = [0, 39], sizes = [4, 1], strides = [1, 1]} : vector<4x75xf32> to vector<4x1xf32>
    %711 = vector.shape_cast %710 : vector<4x1xf32> to vector<1x4x1xf32>
    %712 = vector.broadcast %711 : vector<1x4x1xf32> to vector<2x4x108xf32>
    %713 = arith.mulf %709, %712 : vector<2x4x108xf32>
    %714 = arith.addf %708, %713 : vector<2x4x108xf32>
    %715 = vector.extract_strided_slice %473 {offsets = [0, 0, 40], sizes = [2, 4, 108], strides = [1, 1, 1]} : vector<2x4x182xf32> to vector<2x4x108xf32>
    %716 = vector.extract_strided_slice %2 {offsets = [0, 40], sizes = [4, 1], strides = [1, 1]} : vector<4x75xf32> to vector<4x1xf32>
    %717 = vector.shape_cast %716 : vector<4x1xf32> to vector<1x4x1xf32>
    %718 = vector.broadcast %717 : vector<1x4x1xf32> to vector<2x4x108xf32>
    %719 = arith.mulf %715, %718 : vector<2x4x108xf32>
    %720 = arith.addf %714, %719 : vector<2x4x108xf32>
    %721 = vector.extract_strided_slice %473 {offsets = [0, 0, 41], sizes = [2, 4, 108], strides = [1, 1, 1]} : vector<2x4x182xf32> to vector<2x4x108xf32>
    %722 = vector.extract_strided_slice %2 {offsets = [0, 41], sizes = [4, 1], strides = [1, 1]} : vector<4x75xf32> to vector<4x1xf32>
    %723 = vector.shape_cast %722 : vector<4x1xf32> to vector<1x4x1xf32>
    %724 = vector.broadcast %723 : vector<1x4x1xf32> to vector<2x4x108xf32>
    %725 = arith.mulf %721, %724 : vector<2x4x108xf32>
    %726 = arith.addf %720, %725 : vector<2x4x108xf32>
    %727 = vector.extract_strided_slice %473 {offsets = [0, 0, 42], sizes = [2, 4, 108], strides = [1, 1, 1]} : vector<2x4x182xf32> to vector<2x4x108xf32>
    %728 = vector.extract_strided_slice %2 {offsets = [0, 42], sizes = [4, 1], strides = [1, 1]} : vector<4x75xf32> to vector<4x1xf32>
    %729 = vector.shape_cast %728 : vector<4x1xf32> to vector<1x4x1xf32>
    %730 = vector.broadcast %729 : vector<1x4x1xf32> to vector<2x4x108xf32>
    %731 = arith.mulf %727, %730 : vector<2x4x108xf32>
    %732 = arith.addf %726, %731 : vector<2x4x108xf32>
    %733 = vector.extract_strided_slice %473 {offsets = [0, 0, 43], sizes = [2, 4, 108], strides = [1, 1, 1]} : vector<2x4x182xf32> to vector<2x4x108xf32>
    %734 = vector.extract_strided_slice %2 {offsets = [0, 43], sizes = [4, 1], strides = [1, 1]} : vector<4x75xf32> to vector<4x1xf32>
    %735 = vector.shape_cast %734 : vector<4x1xf32> to vector<1x4x1xf32>
    %736 = vector.broadcast %735 : vector<1x4x1xf32> to vector<2x4x108xf32>
    %737 = arith.mulf %733, %736 : vector<2x4x108xf32>
    %738 = arith.addf %732, %737 : vector<2x4x108xf32>
    %739 = vector.extract_strided_slice %473 {offsets = [0, 0, 44], sizes = [2, 4, 108], strides = [1, 1, 1]} : vector<2x4x182xf32> to vector<2x4x108xf32>
    %740 = vector.extract_strided_slice %2 {offsets = [0, 44], sizes = [4, 1], strides = [1, 1]} : vector<4x75xf32> to vector<4x1xf32>
    %741 = vector.shape_cast %740 : vector<4x1xf32> to vector<1x4x1xf32>
    %742 = vector.broadcast %741 : vector<1x4x1xf32> to vector<2x4x108xf32>
    %743 = arith.mulf %739, %742 : vector<2x4x108xf32>
    %744 = arith.addf %738, %743 : vector<2x4x108xf32>
    %745 = vector.extract_strided_slice %473 {offsets = [0, 0, 45], sizes = [2, 4, 108], strides = [1, 1, 1]} : vector<2x4x182xf32> to vector<2x4x108xf32>
    %746 = vector.extract_strided_slice %2 {offsets = [0, 45], sizes = [4, 1], strides = [1, 1]} : vector<4x75xf32> to vector<4x1xf32>
    %747 = vector.shape_cast %746 : vector<4x1xf32> to vector<1x4x1xf32>
    %748 = vector.broadcast %747 : vector<1x4x1xf32> to vector<2x4x108xf32>
    %749 = arith.mulf %745, %748 : vector<2x4x108xf32>
    %750 = arith.addf %744, %749 : vector<2x4x108xf32>
    %751 = vector.extract_strided_slice %473 {offsets = [0, 0, 46], sizes = [2, 4, 108], strides = [1, 1, 1]} : vector<2x4x182xf32> to vector<2x4x108xf32>
    %752 = vector.extract_strided_slice %2 {offsets = [0, 46], sizes = [4, 1], strides = [1, 1]} : vector<4x75xf32> to vector<4x1xf32>
    %753 = vector.shape_cast %752 : vector<4x1xf32> to vector<1x4x1xf32>
    %754 = vector.broadcast %753 : vector<1x4x1xf32> to vector<2x4x108xf32>
    %755 = arith.mulf %751, %754 : vector<2x4x108xf32>
    %756 = arith.addf %750, %755 : vector<2x4x108xf32>
    %757 = vector.extract_strided_slice %473 {offsets = [0, 0, 47], sizes = [2, 4, 108], strides = [1, 1, 1]} : vector<2x4x182xf32> to vector<2x4x108xf32>
    %758 = vector.extract_strided_slice %2 {offsets = [0, 47], sizes = [4, 1], strides = [1, 1]} : vector<4x75xf32> to vector<4x1xf32>
    %759 = vector.shape_cast %758 : vector<4x1xf32> to vector<1x4x1xf32>
    %760 = vector.broadcast %759 : vector<1x4x1xf32> to vector<2x4x108xf32>
    %761 = arith.mulf %757, %760 : vector<2x4x108xf32>
    %762 = arith.addf %756, %761 : vector<2x4x108xf32>
    %763 = vector.extract_strided_slice %473 {offsets = [0, 0, 48], sizes = [2, 4, 108], strides = [1, 1, 1]} : vector<2x4x182xf32> to vector<2x4x108xf32>
    %764 = vector.extract_strided_slice %2 {offsets = [0, 48], sizes = [4, 1], strides = [1, 1]} : vector<4x75xf32> to vector<4x1xf32>
    %765 = vector.shape_cast %764 : vector<4x1xf32> to vector<1x4x1xf32>
    %766 = vector.broadcast %765 : vector<1x4x1xf32> to vector<2x4x108xf32>
    %767 = arith.mulf %763, %766 : vector<2x4x108xf32>
    %768 = arith.addf %762, %767 : vector<2x4x108xf32>
    %769 = vector.extract_strided_slice %473 {offsets = [0, 0, 49], sizes = [2, 4, 108], strides = [1, 1, 1]} : vector<2x4x182xf32> to vector<2x4x108xf32>
    %770 = vector.extract_strided_slice %2 {offsets = [0, 49], sizes = [4, 1], strides = [1, 1]} : vector<4x75xf32> to vector<4x1xf32>
    %771 = vector.shape_cast %770 : vector<4x1xf32> to vector<1x4x1xf32>
    %772 = vector.broadcast %771 : vector<1x4x1xf32> to vector<2x4x108xf32>
    %773 = arith.mulf %769, %772 : vector<2x4x108xf32>
    %774 = arith.addf %768, %773 : vector<2x4x108xf32>
    %775 = vector.extract_strided_slice %473 {offsets = [0, 0, 50], sizes = [2, 4, 108], strides = [1, 1, 1]} : vector<2x4x182xf32> to vector<2x4x108xf32>
    %776 = vector.extract_strided_slice %2 {offsets = [0, 50], sizes = [4, 1], strides = [1, 1]} : vector<4x75xf32> to vector<4x1xf32>
    %777 = vector.shape_cast %776 : vector<4x1xf32> to vector<1x4x1xf32>
    %778 = vector.broadcast %777 : vector<1x4x1xf32> to vector<2x4x108xf32>
    %779 = arith.mulf %775, %778 : vector<2x4x108xf32>
    %780 = arith.addf %774, %779 : vector<2x4x108xf32>
    %781 = vector.extract_strided_slice %473 {offsets = [0, 0, 51], sizes = [2, 4, 108], strides = [1, 1, 1]} : vector<2x4x182xf32> to vector<2x4x108xf32>
    %782 = vector.extract_strided_slice %2 {offsets = [0, 51], sizes = [4, 1], strides = [1, 1]} : vector<4x75xf32> to vector<4x1xf32>
    %783 = vector.shape_cast %782 : vector<4x1xf32> to vector<1x4x1xf32>
    %784 = vector.broadcast %783 : vector<1x4x1xf32> to vector<2x4x108xf32>
    %785 = arith.mulf %781, %784 : vector<2x4x108xf32>
    %786 = arith.addf %780, %785 : vector<2x4x108xf32>
    %787 = vector.extract_strided_slice %473 {offsets = [0, 0, 52], sizes = [2, 4, 108], strides = [1, 1, 1]} : vector<2x4x182xf32> to vector<2x4x108xf32>
    %788 = vector.extract_strided_slice %2 {offsets = [0, 52], sizes = [4, 1], strides = [1, 1]} : vector<4x75xf32> to vector<4x1xf32>
    %789 = vector.shape_cast %788 : vector<4x1xf32> to vector<1x4x1xf32>
    %790 = vector.broadcast %789 : vector<1x4x1xf32> to vector<2x4x108xf32>
    %791 = arith.mulf %787, %790 : vector<2x4x108xf32>
    %792 = arith.addf %786, %791 : vector<2x4x108xf32>
    %793 = vector.extract_strided_slice %473 {offsets = [0, 0, 53], sizes = [2, 4, 108], strides = [1, 1, 1]} : vector<2x4x182xf32> to vector<2x4x108xf32>
    %794 = vector.extract_strided_slice %2 {offsets = [0, 53], sizes = [4, 1], strides = [1, 1]} : vector<4x75xf32> to vector<4x1xf32>
    %795 = vector.shape_cast %794 : vector<4x1xf32> to vector<1x4x1xf32>
    %796 = vector.broadcast %795 : vector<1x4x1xf32> to vector<2x4x108xf32>
    %797 = arith.mulf %793, %796 : vector<2x4x108xf32>
    %798 = arith.addf %792, %797 : vector<2x4x108xf32>
    %799 = vector.extract_strided_slice %473 {offsets = [0, 0, 54], sizes = [2, 4, 108], strides = [1, 1, 1]} : vector<2x4x182xf32> to vector<2x4x108xf32>
    %800 = vector.extract_strided_slice %2 {offsets = [0, 54], sizes = [4, 1], strides = [1, 1]} : vector<4x75xf32> to vector<4x1xf32>
    %801 = vector.shape_cast %800 : vector<4x1xf32> to vector<1x4x1xf32>
    %802 = vector.broadcast %801 : vector<1x4x1xf32> to vector<2x4x108xf32>
    %803 = arith.mulf %799, %802 : vector<2x4x108xf32>
    %804 = arith.addf %798, %803 : vector<2x4x108xf32>
    %805 = vector.extract_strided_slice %473 {offsets = [0, 0, 55], sizes = [2, 4, 108], strides = [1, 1, 1]} : vector<2x4x182xf32> to vector<2x4x108xf32>
    %806 = vector.extract_strided_slice %2 {offsets = [0, 55], sizes = [4, 1], strides = [1, 1]} : vector<4x75xf32> to vector<4x1xf32>
    %807 = vector.shape_cast %806 : vector<4x1xf32> to vector<1x4x1xf32>
    %808 = vector.broadcast %807 : vector<1x4x1xf32> to vector<2x4x108xf32>
    %809 = arith.mulf %805, %808 : vector<2x4x108xf32>
    %810 = arith.addf %804, %809 : vector<2x4x108xf32>
    %811 = vector.extract_strided_slice %473 {offsets = [0, 0, 56], sizes = [2, 4, 108], strides = [1, 1, 1]} : vector<2x4x182xf32> to vector<2x4x108xf32>
    %812 = vector.extract_strided_slice %2 {offsets = [0, 56], sizes = [4, 1], strides = [1, 1]} : vector<4x75xf32> to vector<4x1xf32>
    %813 = vector.shape_cast %812 : vector<4x1xf32> to vector<1x4x1xf32>
    %814 = vector.broadcast %813 : vector<1x4x1xf32> to vector<2x4x108xf32>
    %815 = arith.mulf %811, %814 : vector<2x4x108xf32>
    %816 = arith.addf %810, %815 : vector<2x4x108xf32>
    %817 = vector.extract_strided_slice %473 {offsets = [0, 0, 57], sizes = [2, 4, 108], strides = [1, 1, 1]} : vector<2x4x182xf32> to vector<2x4x108xf32>
    %818 = vector.extract_strided_slice %2 {offsets = [0, 57], sizes = [4, 1], strides = [1, 1]} : vector<4x75xf32> to vector<4x1xf32>
    %819 = vector.shape_cast %818 : vector<4x1xf32> to vector<1x4x1xf32>
    %820 = vector.broadcast %819 : vector<1x4x1xf32> to vector<2x4x108xf32>
    %821 = arith.mulf %817, %820 : vector<2x4x108xf32>
    %822 = arith.addf %816, %821 : vector<2x4x108xf32>
    %823 = vector.extract_strided_slice %473 {offsets = [0, 0, 58], sizes = [2, 4, 108], strides = [1, 1, 1]} : vector<2x4x182xf32> to vector<2x4x108xf32>
    %824 = vector.extract_strided_slice %2 {offsets = [0, 58], sizes = [4, 1], strides = [1, 1]} : vector<4x75xf32> to vector<4x1xf32>
    %825 = vector.shape_cast %824 : vector<4x1xf32> to vector<1x4x1xf32>
    %826 = vector.broadcast %825 : vector<1x4x1xf32> to vector<2x4x108xf32>
    %827 = arith.mulf %823, %826 : vector<2x4x108xf32>
    %828 = arith.addf %822, %827 : vector<2x4x108xf32>
    %829 = vector.extract_strided_slice %473 {offsets = [0, 0, 59], sizes = [2, 4, 108], strides = [1, 1, 1]} : vector<2x4x182xf32> to vector<2x4x108xf32>
    %830 = vector.extract_strided_slice %2 {offsets = [0, 59], sizes = [4, 1], strides = [1, 1]} : vector<4x75xf32> to vector<4x1xf32>
    %831 = vector.shape_cast %830 : vector<4x1xf32> to vector<1x4x1xf32>
    %832 = vector.broadcast %831 : vector<1x4x1xf32> to vector<2x4x108xf32>
    %833 = arith.mulf %829, %832 : vector<2x4x108xf32>
    %834 = arith.addf %828, %833 : vector<2x4x108xf32>
    %835 = vector.extract_strided_slice %473 {offsets = [0, 0, 60], sizes = [2, 4, 108], strides = [1, 1, 1]} : vector<2x4x182xf32> to vector<2x4x108xf32>
    %836 = vector.extract_strided_slice %2 {offsets = [0, 60], sizes = [4, 1], strides = [1, 1]} : vector<4x75xf32> to vector<4x1xf32>
    %837 = vector.shape_cast %836 : vector<4x1xf32> to vector<1x4x1xf32>
    %838 = vector.broadcast %837 : vector<1x4x1xf32> to vector<2x4x108xf32>
    %839 = arith.mulf %835, %838 : vector<2x4x108xf32>
    %840 = arith.addf %834, %839 : vector<2x4x108xf32>
    %841 = vector.extract_strided_slice %473 {offsets = [0, 0, 61], sizes = [2, 4, 108], strides = [1, 1, 1]} : vector<2x4x182xf32> to vector<2x4x108xf32>
    %842 = vector.extract_strided_slice %2 {offsets = [0, 61], sizes = [4, 1], strides = [1, 1]} : vector<4x75xf32> to vector<4x1xf32>
    %843 = vector.shape_cast %842 : vector<4x1xf32> to vector<1x4x1xf32>
    %844 = vector.broadcast %843 : vector<1x4x1xf32> to vector<2x4x108xf32>
    %845 = arith.mulf %841, %844 : vector<2x4x108xf32>
    %846 = arith.addf %840, %845 : vector<2x4x108xf32>
    %847 = vector.extract_strided_slice %473 {offsets = [0, 0, 62], sizes = [2, 4, 108], strides = [1, 1, 1]} : vector<2x4x182xf32> to vector<2x4x108xf32>
    %848 = vector.extract_strided_slice %2 {offsets = [0, 62], sizes = [4, 1], strides = [1, 1]} : vector<4x75xf32> to vector<4x1xf32>
    %849 = vector.shape_cast %848 : vector<4x1xf32> to vector<1x4x1xf32>
    %850 = vector.broadcast %849 : vector<1x4x1xf32> to vector<2x4x108xf32>
    %851 = arith.mulf %847, %850 : vector<2x4x108xf32>
    %852 = arith.addf %846, %851 : vector<2x4x108xf32>
    %853 = vector.extract_strided_slice %473 {offsets = [0, 0, 63], sizes = [2, 4, 108], strides = [1, 1, 1]} : vector<2x4x182xf32> to vector<2x4x108xf32>
    %854 = vector.extract_strided_slice %2 {offsets = [0, 63], sizes = [4, 1], strides = [1, 1]} : vector<4x75xf32> to vector<4x1xf32>
    %855 = vector.shape_cast %854 : vector<4x1xf32> to vector<1x4x1xf32>
    %856 = vector.broadcast %855 : vector<1x4x1xf32> to vector<2x4x108xf32>
    %857 = arith.mulf %853, %856 : vector<2x4x108xf32>
    %858 = arith.addf %852, %857 : vector<2x4x108xf32>
    %859 = vector.extract_strided_slice %473 {offsets = [0, 0, 64], sizes = [2, 4, 108], strides = [1, 1, 1]} : vector<2x4x182xf32> to vector<2x4x108xf32>
    %860 = vector.extract_strided_slice %2 {offsets = [0, 64], sizes = [4, 1], strides = [1, 1]} : vector<4x75xf32> to vector<4x1xf32>
    %861 = vector.shape_cast %860 : vector<4x1xf32> to vector<1x4x1xf32>
    %862 = vector.broadcast %861 : vector<1x4x1xf32> to vector<2x4x108xf32>
    %863 = arith.mulf %859, %862 : vector<2x4x108xf32>
    %864 = arith.addf %858, %863 : vector<2x4x108xf32>
    %865 = vector.extract_strided_slice %473 {offsets = [0, 0, 65], sizes = [2, 4, 108], strides = [1, 1, 1]} : vector<2x4x182xf32> to vector<2x4x108xf32>
    %866 = vector.extract_strided_slice %2 {offsets = [0, 65], sizes = [4, 1], strides = [1, 1]} : vector<4x75xf32> to vector<4x1xf32>
    %867 = vector.shape_cast %866 : vector<4x1xf32> to vector<1x4x1xf32>
    %868 = vector.broadcast %867 : vector<1x4x1xf32> to vector<2x4x108xf32>
    %869 = arith.mulf %865, %868 : vector<2x4x108xf32>
    %870 = arith.addf %864, %869 : vector<2x4x108xf32>
    %871 = vector.extract_strided_slice %473 {offsets = [0, 0, 66], sizes = [2, 4, 108], strides = [1, 1, 1]} : vector<2x4x182xf32> to vector<2x4x108xf32>
    %872 = vector.extract_strided_slice %2 {offsets = [0, 66], sizes = [4, 1], strides = [1, 1]} : vector<4x75xf32> to vector<4x1xf32>
    %873 = vector.shape_cast %872 : vector<4x1xf32> to vector<1x4x1xf32>
    %874 = vector.broadcast %873 : vector<1x4x1xf32> to vector<2x4x108xf32>
    %875 = arith.mulf %871, %874 : vector<2x4x108xf32>
    %876 = arith.addf %870, %875 : vector<2x4x108xf32>
    %877 = vector.extract_strided_slice %473 {offsets = [0, 0, 67], sizes = [2, 4, 108], strides = [1, 1, 1]} : vector<2x4x182xf32> to vector<2x4x108xf32>
    %878 = vector.extract_strided_slice %2 {offsets = [0, 67], sizes = [4, 1], strides = [1, 1]} : vector<4x75xf32> to vector<4x1xf32>
    %879 = vector.shape_cast %878 : vector<4x1xf32> to vector<1x4x1xf32>
    %880 = vector.broadcast %879 : vector<1x4x1xf32> to vector<2x4x108xf32>
    %881 = arith.mulf %877, %880 : vector<2x4x108xf32>
    %882 = arith.addf %876, %881 : vector<2x4x108xf32>
    %883 = vector.extract_strided_slice %473 {offsets = [0, 0, 68], sizes = [2, 4, 108], strides = [1, 1, 1]} : vector<2x4x182xf32> to vector<2x4x108xf32>
    %884 = vector.extract_strided_slice %2 {offsets = [0, 68], sizes = [4, 1], strides = [1, 1]} : vector<4x75xf32> to vector<4x1xf32>
    %885 = vector.shape_cast %884 : vector<4x1xf32> to vector<1x4x1xf32>
    %886 = vector.broadcast %885 : vector<1x4x1xf32> to vector<2x4x108xf32>
    %887 = arith.mulf %883, %886 : vector<2x4x108xf32>
    %888 = arith.addf %882, %887 : vector<2x4x108xf32>
    %889 = vector.extract_strided_slice %473 {offsets = [0, 0, 69], sizes = [2, 4, 108], strides = [1, 1, 1]} : vector<2x4x182xf32> to vector<2x4x108xf32>
    %890 = vector.extract_strided_slice %2 {offsets = [0, 69], sizes = [4, 1], strides = [1, 1]} : vector<4x75xf32> to vector<4x1xf32>
    %891 = vector.shape_cast %890 : vector<4x1xf32> to vector<1x4x1xf32>
    %892 = vector.broadcast %891 : vector<1x4x1xf32> to vector<2x4x108xf32>
    %893 = arith.mulf %889, %892 : vector<2x4x108xf32>
    %894 = arith.addf %888, %893 : vector<2x4x108xf32>
    %895 = vector.extract_strided_slice %473 {offsets = [0, 0, 70], sizes = [2, 4, 108], strides = [1, 1, 1]} : vector<2x4x182xf32> to vector<2x4x108xf32>
    %896 = vector.extract_strided_slice %2 {offsets = [0, 70], sizes = [4, 1], strides = [1, 1]} : vector<4x75xf32> to vector<4x1xf32>
    %897 = vector.shape_cast %896 : vector<4x1xf32> to vector<1x4x1xf32>
    %898 = vector.broadcast %897 : vector<1x4x1xf32> to vector<2x4x108xf32>
    %899 = arith.mulf %895, %898 : vector<2x4x108xf32>
    %900 = arith.addf %894, %899 : vector<2x4x108xf32>
    %901 = vector.extract_strided_slice %473 {offsets = [0, 0, 71], sizes = [2, 4, 108], strides = [1, 1, 1]} : vector<2x4x182xf32> to vector<2x4x108xf32>
    %902 = vector.extract_strided_slice %2 {offsets = [0, 71], sizes = [4, 1], strides = [1, 1]} : vector<4x75xf32> to vector<4x1xf32>
    %903 = vector.shape_cast %902 : vector<4x1xf32> to vector<1x4x1xf32>
    %904 = vector.broadcast %903 : vector<1x4x1xf32> to vector<2x4x108xf32>
    %905 = arith.mulf %901, %904 : vector<2x4x108xf32>
    %906 = arith.addf %900, %905 : vector<2x4x108xf32>
    %907 = vector.extract_strided_slice %473 {offsets = [0, 0, 72], sizes = [2, 4, 108], strides = [1, 1, 1]} : vector<2x4x182xf32> to vector<2x4x108xf32>
    %908 = vector.extract_strided_slice %2 {offsets = [0, 72], sizes = [4, 1], strides = [1, 1]} : vector<4x75xf32> to vector<4x1xf32>
    %909 = vector.shape_cast %908 : vector<4x1xf32> to vector<1x4x1xf32>
    %910 = vector.broadcast %909 : vector<1x4x1xf32> to vector<2x4x108xf32>
    %911 = arith.mulf %907, %910 : vector<2x4x108xf32>
    %912 = arith.addf %906, %911 : vector<2x4x108xf32>
    %913 = vector.extract_strided_slice %473 {offsets = [0, 0, 73], sizes = [2, 4, 108], strides = [1, 1, 1]} : vector<2x4x182xf32> to vector<2x4x108xf32>
    %914 = vector.extract_strided_slice %2 {offsets = [0, 73], sizes = [4, 1], strides = [1, 1]} : vector<4x75xf32> to vector<4x1xf32>
    %915 = vector.shape_cast %914 : vector<4x1xf32> to vector<1x4x1xf32>
    %916 = vector.broadcast %915 : vector<1x4x1xf32> to vector<2x4x108xf32>
    %917 = arith.mulf %913, %916 : vector<2x4x108xf32>
    %918 = arith.addf %912, %917 : vector<2x4x108xf32>
    %919 = vector.extract_strided_slice %473 {offsets = [0, 0, 74], sizes = [2, 4, 108], strides = [1, 1, 1]} : vector<2x4x182xf32> to vector<2x4x108xf32>
    %920 = vector.extract_strided_slice %2 {offsets = [0, 74], sizes = [4, 1], strides = [1, 1]} : vector<4x75xf32> to vector<4x1xf32>
    %921 = vector.shape_cast %920 : vector<4x1xf32> to vector<1x4x1xf32>
    %922 = vector.broadcast %921 : vector<1x4x1xf32> to vector<2x4x108xf32>
    %923 = arith.mulf %919, %922 : vector<2x4x108xf32>
    %924 = arith.addf %918, %923 : vector<2x4x108xf32>
    %925 = vector.shape_cast %3 : vector<4x1xf32> to vector<1x4x1xf32>
    %926 = vector.broadcast %925 : vector<1x4x1xf32> to vector<2x4x108xf32>
    %927 = arith.addf %924, %926 : vector<2x4x108xf32>
    %cst_14 = arith.constant 0.000000e+00 : f32
    %928 = vector.broadcast %cst_14 : f32 to vector<2x4x20xf32>
    %929 = tpu.concatenate %927, %928 in 2 : vector<2x4x108xf32>, vector<2x4x20xf32> -> vector<2x4x128xf32>
    %c0_15 = arith.constant 0 : index
    %c0_16 = arith.constant 0 : index
    %c0_17 = arith.constant 0 : index
    %930 = vector.load %arg5[%c0_15, %c0_16, %c0_17] : memref<2x4x128xf32, #tpu.memory_space<vmem>>, vector<2x4x128xf32>
    tpu.vector_store %arg5[%c0_15, %c0_16, %c0_17], %929 {strides = array<i32>} : memref<2x4x128xf32, #tpu.memory_space<vmem>>, vector<2x4x128xf32>,
    return
  }
  func.func @transform_0(%arg0: i32) -> (i32, i32, i32) {
    %c0_i32 = arith.constant 0 : i32
    %c0_i32_0 = arith.constant 0 : i32
    %c0_i32_1 = arith.constant 0 : i32
    return %c0_i32, %arg0, %c0_i32_0 : i32, i32, i32
  }
  func.func @transform_1(%arg0: i32) -> (i32, i32) {
    %c0_i32 = arith.constant 0 : i32
    %c0_i32_0 = arith.constant 0 : i32
    return %arg0, %c0_i32 : i32, i32
  }
  func.func @transform_2(%arg0: i32) -> (i32, i32) {
    %c0_i32 = arith.constant 0 : i32
    %c0_i32_0 = arith.constant 0 : i32
    return %arg0, %c0_i32 : i32, i32
  }
  func.func @transform_3(%arg0: i32) -> (i32, i32) {
    %c0_i32 = arith.constant 0 : i32
    %c0_i32_0 = arith.constant 0 : i32
    return %arg0, %c0_i32 : i32, i32
  }
  func.func @transform_4(%arg0: i32) -> (i32, i32, i32) {
    %c0_i32 = arith.constant 0 : i32
    %c0_i32_0 = arith.constant 0 : i32
    %c0_i32_1 = arith.constant 0 : i32
    return %c0_i32, %arg0, %c0_i32_0 : i32, i32, i32
  }
}

</mosaic_0001>

<bundles_post_ra>
// kernel: tpu_custom_call.1
= control target key start
LH: loop header
LB: loop body
LE: loop exit
PB: predicated region body
PF: predicated region fallthrough
CT: control target
= control target key end

     0   :  { %9 = vsyncpa [#allocation3], 0  ;;  %s6568_s0 = inlined_call_operand.hbm [shape: f32[2,4,256], index: 0, kind: input, shape index: {}]   ;;  %s6569_s1 = inlined_call_operand.vmem [shape: f32[4,75], index: 1, kind: input, shape index: {}]   ;;  %s6570_s2 = inlined_call_operand.vmem [shape: f32[4,75], index: 2, kind: input, shape index: {}]   ;;  %s6571_s3 = inlined_call_operand.vmem [shape: f32[4,1], index: 3, kind: input, shape index: {}]   ;;  %s6572_s4 = inlined_call_operand.hbm [shape: f32[2,4,128], index: 4, kind: output, shape index: {}]  }
   0x1   :  { %10 = vsyncpa [#allocation4], 0  ;;  %s3986_s15 = smov [#allocation2]   ;;  %s3938_s19 = scalar_lea.hbm %s6568_s0, 256 }
   0x2   :  { %s16_s16 = sshll.u32 %s3986_s15, 4  ;;  %p3939_p0 = scmp.ne.s32.totalorder %s6568_s0, %s3938_s19  ;;  %s17_s16 = int_to_ptr.vmem [resolvable:$true] %s16_s16 }
   0x3   :  { %p3942_p1 = scmp.lt.u32.totalorder %s3938_s19, %s6568_s0 }
   0x5   :  { %p3944_p2 = pnand %p3942_p1, %p3939_p0 }
   0x7   :  { %3947 = shalt.err (!%p3944_p2)
}
   0x8   :  { %s3948_s24 = scalar_lea.vmem %s17_s16, 256  ;;  %p3953_p4 = scmp.lt.s32.totalorder %s17_s16, %s17_s16 }
   0x9   :  { %p3949_p3 = scmp.ne.s32.totalorder %s17_s16, %s3948_s24  ;;  %p3954_p5 = scmp.lt.s32.totalorder %s3948_s24, %s3948_s24 }
   0xb   :  { %p3955_p6 = por %p3954_p5, %p3953_p4 }
   0xd   :  { %p3956_p7 = pnand %p3955_p6, %p3949_p3 }
   0xf   :  { %3959 = shalt.err (!%p3956_p7)
}
  0x10   :  { %s3987_s25 = smov 128   ;;  %s3988_s26 = smov 8  }
  0x11   :  { %22 = dma.hbm_to_vmem [thread:$0]  %s6568_s0, 256, %s17_s16, [#allocation3], %s3987_s25, %s3987_s25, %s3988_s26  }
  0x12   :  { %3982 = dma.done.wait [#allocation3], 256  }
  0x13   :  { %3983 = vsyncadd [#allocation3], 4294967040  ;;  %v6637_v0 = vmov 2   ;;  %v3990_v1 = vmov 1   ;;  %v4182_v2 = vld [vmem:[%s6569_s1] sm:$0xf]  ;;  %v44_v22 = vlaneseq }
  0x14   :  { %3781 = vset.pattern.permute.xlu1 %v6637_v0  ;;  %3780 = vset.pattern.permute.xlu0 %v3990_v1  ;;  %v6633_v3 = vmov 3   ;;  %v6663_v4 = vmov 4   ;;  %v6662_v5 = vmov 5   ;;  %v6653_v6 = vmov 6   ;;  %v4221_v26 = vld [vmem:[#allocation2] sm:$0xff]  ;;  %v4227_v33 = vld [vmem:[#allocation2 + $0x8] sm:$0xff] }
  0x15   :  { %82 = vperm.xlu1 %3781, %v4182_v2   ;;  %54 = vperm.xlu0 %3780, %v4182_v2   ;;  %v6652_v7 = vmov 7   ;;  %v6650_v8 = vmov 8   ;;  %v6646_v9 = vmov 9   ;;  %v6645_v10 = vmov 10   ;;  %s4009_s0 = smov 126   ;;  %s4010_s5 = smov 127  }
  0x16   :  { %v6643_v11 = vmov 11   ;;  %v6639_v12 = vmov 12   ;;  %v6638_v13 = vmov 13   ;;  %v6627_v14 = vmov 14   ;;  %s4012_s6 = smov 125   ;;  %s4015_s7 = smov 124  }
  0x17   :  { %v6626_v15 = vmov 15   ;;  %v6625_v16 = vmov 16   ;;  %v6621_v17 = vmov 17   ;;  %v6619_v18 = vmov 18   ;;  %s4018_s8 = smov 123   ;;  %s4020_s9 = smov 122  }
  0x18   :  { %v6615_v19 = vmov 19   ;;  %v4008_v20 = vmov 839922192   ;;  %v45_v24 = vshrl.u32 %v44_v22, 7  ;;  %v6614_v39 = vmov 20   ;;  %s4023_s10 = smov 121  }
  0x19   :  { %3782 = vset.pattern.permute.xlu0 %v6633_v3  ;;  %3855 = vset.pattern.permute.xlu1 %v3990_v1  ;;  %v42_v21 = vunpack.c.l.s4 %v4008_v20  ;;  %v6612_v42 = vmov 21   ;;  %v6608_v46 = vmov 22   ;;  %v6607_v49 = vmov 23   ;;  %s4025_s11 = smov 120   ;;  %s4028_s12 = smov 119  }
  0x1a   :  { %110 = vperm.xlu0 %3782, %v4182_v2   ;;  %v6606_v52 = vmov 24   ;;  %v6604_v56 = vmov 25   ;;  %v6602_v60 = vmov 26   ;;  %v6600_v63 = vmov 27   ;;  %s4031_s13 = smov 118   ;;  %s4033_s14 = smov 117  }
  0x1b   :  { %v43_v23 = vunpack.c.0.s8 %v42_v21  ;;  %v6599_v22 = vmov 28   ;;  %s4036_s15 = smov 116   ;;  %s4038_s16 = smov 115   ;;  %vm74_vm0 = vcmask 1039360   ;;  %vm102_vm1 = vcmask 1031168  }
  0x1c   :  { %s4041_s17 = smov 114   ;;  %s4044_s18 = smov 113   ;;  %vm130_vm2 = vcmask 1022976   ;;  %vm158_vm3 = vcmask 1014784   ;;  %vm186_vm4 = vcmask 1006592   ;;  %vm214_vm5 = vcmask 998400  }
  0x1d   :  { %v4219_v25 = vsub.s32 %v43_v23, %v45_v24  ;;  %s4046_s19 = smov 112   ;;  %s4049_s20 = smov 111   ;;  %vm242_vm6 = vcmask 990208   ;;  %vm270_vm7 = vcmask 982016   ;;  %vm298_vm8 = vcmask 973824  }
  0x1e   :  { %3783 = vset.pattern.permute.xlu0 %v6663_v4  ;;  %s4051_s21 = smov 110   ;;  %s4054_s22 = smov 109   ;;  %v6667_v4 = vmov 74   ;;  %vm326_vm9 = vcmask 965632   ;;  %vm354_vm10 = vcmask 957440   ;;  %vm382_vm11 = vcmask 949248  }
  0x1f   :  { %138 = vperm.xlu0 %3783, %v4182_v2   ;;  %s4057_s23 = smov 108   ;;  %s4059_s24 = smov 107   ;;  %vm410_vm12 = vcmask 941056   ;;  %vm438_vm13 = vcmask 932864   ;;  %vm466_vm14 = vcmask 924672   ;;  %vm494_vm15 = vcmask 916480  }
  0x20   :  { %s4062_s25 = smov 106   ;;  %s4064_s26 = smov 105  }
  0x21   :  { %s6658_s27 = smov 104   ;;  %s6656_s28 = smov 103  }
  0x22   :  { %s6610_s29 = smov 102   ;;  %s6616_s30 = smov 101  }
  0x23   :  { %3784 = vset.pattern.permute.xlu0 %v6662_v5 }
  0x24   :  { %166 = vperm.xlu0 %3784, %v4182_v2  }
  0x28   :  { %3785 = vset.pattern.permute.xlu0 %v6653_v6  ;;  %v6661_v6 = vmov 72  }
  0x29   :  { %194 = vperm.xlu0 %3785, %v4182_v2  }
  0x2d   :  { %3786 = vset.pattern.permute.xlu0 %v6652_v7 }
  0x2e   :  { %222 = vperm.xlu0 %3786, %v4182_v2  }
  0x32   :  { %3787 = vset.pattern.permute.xlu0 %v6650_v8  ;;  %v6660_v8 = vmov 71  }
  0x33   :  { %250 = vperm.xlu0 %3787, %v4182_v2  }
  0x37   :  { %3788 = vset.pattern.permute.xlu0 %v6646_v9  ;;  %v6651_v9 = vmov 70  }
  0x38   :  { %278 = vperm.xlu0 %3788, %v4182_v2  }
  0x3c   :  { %3789 = vset.pattern.permute.xlu0 %v6645_v10 }
  0x3d   :  { %306 = vperm.xlu0 %3789, %v4182_v2  }
  0x41   :  { %3790 = vset.pattern.permute.xlu0 %v6643_v11 }
  0x42   :  { %334 = vperm.xlu0 %3790, %v4182_v2  }
  0x46   :  { %3791 = vset.pattern.permute.xlu0 %v6639_v12  ;;  %v6644_v12 = vmov 68  }
  0x47   :  { %362 = vperm.xlu0 %3791, %v4182_v2  }
  0x4b   :  { %3792 = vset.pattern.permute.xlu0 %v6638_v13 }
  0x4c   :  { %390 = vperm.xlu0 %3792, %v4182_v2  }
  0x50   :  { %3793 = vset.pattern.permute.xlu0 %v6627_v14  ;;  %v6632_v14 = vmov 65  }
  0x51   :  { %418 = vperm.xlu0 %3793, %v4182_v2  }
  0x55   :  { %3794 = vset.pattern.permute.xlu0 %v6626_v15 }
  0x56   :  { %446 = vperm.xlu0 %3794, %v4182_v2  }
  0x5a   :  { %3795 = vset.pattern.permute.xlu0 %v6625_v16 }
  0x5b   :  { %474 = vperm.xlu0 %3795, %v4182_v2  }
  0x5f   :  { %3796 = vset.pattern.permute.xlu0 %v6621_v17 }
  0x60   :  { %502 = vperm.xlu0 %3796, %v4182_v2  }
  0x64   :  { %3797 = vset.pattern.permute.xlu0 %v6619_v18 }
  0x65   :  { %530 = vperm.xlu0 %3797, %v4182_v2  }
  0x69   :  { %3798 = vset.pattern.permute.xlu0 %v6615_v19  ;;  %v6620_v19 = vmov 62  }
  0x94   :  { %v83_v27 = vpop.permute.xlu1 %82  ;;  %v55_v28 = vpop.permute.xlu0 %54 }
  0x95   :  { %v90_v29 = vrot.slane %v83_v27, %v4219_v25  ;;  %v62_v30 = vrot.slane %v55_v28, %v4219_v25  ;;  %v6598_v27 = vmov 29  }
  0x97   :  { %v92_v31 = vmul.f32 %v90_v29, %v4221_v26  ;;  %v64_v32 = vmul.f32 %v62_v30, %v4221_v26  ;;  %v65_v35 = vmul.f32 %v62_v30, %v4227_v33  ;;  %v93_v37 = vmul.f32 %v90_v29, %v4227_v33 }
  0x99   :  { %96 = vrot.lane.b32.xlu0 %v92_v31, %s4009_s0  ;;  %68 = vrot.lane.b32.xlu1 %v64_v32, %s4010_s5  ;;  %v111_v34 = vpop.permute.xlu0 %110  ;;  %v6596_v31 = vmov 30  }
  0x9a   :  { %v118_v36 = vrot.slane %v111_v34, %v4219_v25 }
  0x9c   :  { %v120_v38 = vmul.f32 %v118_v36, %v4221_v26  ;;  %v121_v43 = vmul.f32 %v118_v36, %v4227_v33 }
  0x9d   :  { %558 = vperm.xlu0 %3798, %v4182_v2   ;;  %70 = vrot.lane.b32.xlu1 %v65_v35, %s4010_s5  ;;  %v6595_v35 = vmov 31  }
  0x9e   :  { %v139_v40 = vpop.permute.xlu0 %138 }
  0x9f   :  { %v146_v41 = vrot.slane %v139_v40, %v4219_v25 }
  0xa1   :  { %3799 = vset.pattern.permute.xlu0 %v6614_v39  ;;  %98 = vrot.lane.b32.xlu1 %v93_v37, %s4009_s0  ;;  %v148_v44 = vmul.f32 %v146_v41, %v4221_v26  ;;  %v149_v48 = vmul.f32 %v146_v41, %v4227_v33 }
  0xa2   :  { %586 = vperm.xlu0 %3799, %v4182_v2  }
  0xa3   :  { %v167_v45 = vpop.permute.xlu0 %166 }
  0xa4   :  { %v174_v47 = vrot.slane %v167_v45, %v4219_v25 }
  0xa5   :  { %124 = vrot.lane.b32.xlu1 %v120_v38, %s4012_s6  ;;  %v6594_v38 = vmov 32  }
  0xa6   :  { %3800 = vset.pattern.permute.xlu0 %v6612_v42  ;;  %v176_v50 = vmul.f32 %v174_v47, %v4221_v26  ;;  %v177_v54 = vmul.f32 %v174_v47, %v4227_v33 }
  0xa7   :  { %614 = vperm.xlu0 %3800, %v4182_v2  }
  0xa8   :  { %v195_v51 = vpop.permute.xlu0 %194 }
  0xa9   :  { %126 = vrot.lane.b32.xlu1 %v121_v43, %s4012_s6  ;;  %v202_v53 = vrot.slane %v195_v51, %v4219_v25 }
  0xab   :  { %3801 = vset.pattern.permute.xlu0 %v6608_v46  ;;  %v204_v55 = vmul.f32 %v202_v53, %v4221_v26  ;;  %v205_v59 = vmul.f32 %v202_v53, %v4227_v33  ;;  %v6613_v46 = vmov 60  }
  0xac   :  { %642 = vperm.xlu0 %3801, %v4182_v2  }
  0xad   :  { %152 = vrot.lane.b32.xlu1 %v148_v44, %s4015_s7  ;;  %v223_v57 = vpop.permute.xlu0 %222  ;;  %v6593_v44 = vmov 33  }
  0xae   :  { %v230_v58 = vrot.slane %v223_v57, %v4219_v25 }
  0xb0   :  { %3802 = vset.pattern.permute.xlu0 %v6607_v49  ;;  %v232_v61 = vmul.f32 %v230_v58, %v4221_v26  ;;  %v233_v20 = vmul.f32 %v230_v58, %v4227_v33 }
  0xb1   :  { %670 = vperm.xlu0 %3802, %v4182_v2   ;;  %154 = vrot.lane.b32.xlu1 %v149_v48, %s4015_s7 }
  0xb2   :  { %v251_v62 = vpop.permute.xlu0 %250 }
  0xb3   :  { %v258_v1 = vrot.slane %v251_v62, %v4219_v25 }
  0xb5   :  { %3803 = vset.pattern.permute.xlu0 %v6606_v52  ;;  %180 = vrot.lane.b32.xlu1 %v176_v50, %s4018_s8  ;;  %v260_v21 = vmul.f32 %v258_v1, %v4221_v26  ;;  %v261_v28 = vmul.f32 %v258_v1, %v4227_v33  ;;  %v6591_v50 = vmov 34   ;;  %v6587_v1 = vmov 37  }
  0xb6   :  { %698 = vperm.xlu0 %3803, %v4182_v2  }
  0xb7   :  { %v279_v23 = vpop.permute.xlu0 %278 }
  0xb8   :  { %v286_v24 = vrot.slane %v279_v23, %v4219_v25  ;;  %v6585_v23 = vmov 38  }
  0xb9   :  { %182 = vrot.lane.b32.xlu1 %v177_v54, %s4018_s8  ;;  %v6590_v54 = vmov 35  }
  0xba   :  { %3804 = vset.pattern.permute.xlu0 %v6604_v56  ;;  %v288_v29 = vmul.f32 %v286_v24, %v4221_v26  ;;  %v289_v34 = vmul.f32 %v286_v24, %v4227_v33 }
  0xbb   :  { %726 = vperm.xlu0 %3804, %v4182_v2  }
  0xbc   :  { %v307_v30 = vpop.permute.xlu0 %306 }
  0xbd   :  { %208 = vrot.lane.b32.xlu1 %v204_v55, %s4020_s9  ;;  %v314_v32 = vrot.slane %v307_v30, %v4219_v25  ;;  %v6583_v30 = vmov 39  }
  0xbf   :  { %3805 = vset.pattern.permute.xlu0 %v6602_v60  ;;  %v316_v36 = vmul.f32 %v314_v32, %v4221_v26  ;;  %v317_v41 = vmul.f32 %v314_v32, %v4227_v33  ;;  %v6605_v60 = vmov 58  }
  0xc0   :  { %754 = vperm.xlu0 %3805, %v4182_v2  }
  0xc1   :  { %210 = vrot.lane.b32.xlu1 %v205_v59, %s4020_s9  ;;  %v335_v37 = vpop.permute.xlu0 %334  ;;  %v6588_v59 = vmov 36  }
  0xc2   :  { %v342_v40 = vrot.slane %v335_v37, %v4219_v25  ;;  %v6582_v37 = vmov 40  }
  0xc4   :  { %3806 = vset.pattern.permute.xlu0 %v6600_v63  ;;  %v344_v43 = vmul.f32 %v342_v40, %v4221_v26  ;;  %v345_v48 = vmul.f32 %v342_v40, %v4227_v33  ;;  %v6603_v63 = vmov 57  }
  0xc5   :  { %782 = vperm.xlu0 %3806, %v4182_v2   ;;  %236 = vrot.lane.b32.xlu1 %v232_v61, %s4023_s10 }
  0xc6   :  { %v363_v45 = vpop.permute.xlu0 %362 }
  0xc7   :  { %v370_v47 = vrot.slane %v363_v45, %v4219_v25 }
  0xc9   :  { %3807 = vset.pattern.permute.xlu0 %v6599_v22  ;;  %238 = vrot.lane.b32.xlu1 %v233_v20, %s4023_s10  ;;  %v372_v51 = vmul.f32 %v370_v47, %v4221_v26  ;;  %v373_v57 = vmul.f32 %v370_v47, %v4227_v33 }
  0xca   :  { %810 = vperm.xlu0 %3807, %v4182_v2  }
  0xcb   :  { %v391_v53 = vpop.permute.xlu0 %390 }
  0xcc   :  { %v398_v55 = vrot.slane %v391_v53, %v4219_v25  ;;  %v6578_v53 = vmov 42  }
  0xcd   :  { %264 = vrot.lane.b32.xlu1 %v260_v21, %s4025_s11 }
  0xce   :  { %3808 = vset.pattern.permute.xlu0 %v6598_v27  ;;  %v400_v58 = vmul.f32 %v398_v55, %v4221_v26  ;;  %v401_v20 = vmul.f32 %v398_v55, %v4227_v33 }
  0xcf   :  { %838 = vperm.xlu0 %3808, %v4182_v2  }
  0xd0   :  { %v419_v61 = vpop.permute.xlu0 %418 }
  0xd1   :  { %266 = vrot.lane.b32.xlu1 %v261_v28, %s4025_s11  ;;  %v426_v62 = vrot.slane %v419_v61, %v4219_v25 }
  0xd3   :  { %3809 = vset.pattern.permute.xlu0 %v6596_v31  ;;  %v428_v21 = vmul.f32 %v426_v62, %v4221_v26 }
  0xd4   :  { %866 = vperm.xlu0 %3809, %v4182_v2  }
  0xd5   :  { %292 = vrot.lane.b32.xlu1 %v288_v29, %s4028_s12  ;;  %v447_v24 = vpop.permute.xlu0 %446  ;;  %v429_v29 = vmul.f32 %v426_v62, %v4227_v33  ;;  %v6576_v62 = vmov 43  }
  0xd6   :  { %v454_v28 = vrot.slane %v447_v24, %v4219_v25 }
  0xd8   :  { %3810 = vset.pattern.permute.xlu0 %v6595_v35  ;;  %v456_v32 = vmul.f32 %v454_v28, %v4221_v26  ;;  %v457_v40 = vmul.f32 %v454_v28, %v4227_v33 }
  0xd9   :  { %894 = vperm.xlu0 %3810, %v4182_v2   ;;  %294 = vrot.lane.b32.xlu1 %v289_v34, %s4028_s12 }
  0xda   :  { %v475_v34 = vpop.permute.xlu0 %474 }
  0xdd   :  { %3811 = vset.pattern.permute.xlu0 %v6594_v38  ;;  %320 = vrot.lane.b32.xlu1 %v316_v36, %s4031_s13  ;;  %v482_v36 = vrot.slane %v475_v34, %v4219_v25  ;;  %v6597_v38 = vmov 55  }
  0xde   :  { %922 = vperm.xlu0 %3811, %v4182_v2  }
  0xdf   :  { %v503_v47 = vpop.permute.xlu0 %502 }
  0xe1   :  { %322 = vrot.lane.b32.xlu1 %v317_v41, %s4031_s13  ;;  %v484_v41 = vmul.f32 %v482_v36, %v4221_v26 }
  0xe2   :  { %3812 = vset.pattern.permute.xlu0 %v6593_v44 }
  0xe3   :  { %950 = vperm.xlu0 %3812, %v4182_v2  }
  0xe5   :  { %348 = vrot.lane.b32.xlu1 %v344_v43, %s4033_s14  ;;  %v6580_v43 = vmov 41  }
  0xe7   :  { %3813 = vset.pattern.permute.xlu0 %v6591_v50  ;;  %v6631_v50 = vmov 54  }
  0xe8   :  { %978 = vperm.xlu0 %3813, %v4182_v2  }
  0xe9   :  { %350 = vrot.lane.b32.xlu1 %v345_v48, %s4033_s14  ;;  %v510_v48 = vrot.slane %v503_v47, %v4219_v25 }
  0xec   :  { %3814 = vset.pattern.permute.xlu0 %v6590_v54 }
  0xed   :  { %1006 = vperm.xlu0 %3814, %v4182_v2   ;;  %376 = vrot.lane.b32.xlu1 %v372_v51, %s4036_s15  ;;  %v485_v51 = vmul.f32 %v482_v36, %v4227_v33 }
  0xf1   :  { %3815 = vset.pattern.permute.xlu0 %v6588_v59  ;;  %378 = vrot.lane.b32.xlu1 %v373_v57, %s4036_s15  ;;  %v512_v57 = vmul.f32 %v510_v48, %v4221_v26 }
  0xf2   :  { %1034 = vperm.xlu0 %3815, %v4182_v2  }
  0xf5   :  { %404 = vrot.lane.b32.xlu1 %v400_v58, %s4038_s16  ;;  %v531_v58 = vpop.permute.xlu0 %530 }
  0xf6   :  { %3816 = vset.pattern.permute.xlu0 %v6587_v1 }
  0xf7   :  { %1062 = vperm.xlu0 %3816, %v4182_v2  }
  0xf9   :  { %406 = vrot.lane.b32.xlu1 %v401_v20, %s4038_s16  ;;  %v538_v20 = vrot.slane %v531_v58, %v4219_v25  ;;  %v6574_v58 = vmov 46  }
  0xfb   :  { %3817 = vset.pattern.permute.xlu0 %v6585_v23  ;;  %v541_v47 = vmul.f32 %v538_v20, %v4227_v33  ;;  %v6589_v23 = vmov 52  }
  0xfc   :  { %1090 = vperm.xlu0 %3817, %v4182_v2  }
  0xfd   :  { %432 = vrot.lane.b32.xlu1 %v428_v21, %s4041_s17  ;;  %v513_v21 = vmul.f32 %v510_v48, %v4227_v33 }
 0x100   :  { %3818 = vset.pattern.permute.xlu0 %v6583_v30  ;;  %v6586_v30 = vmov 51  }
 0x101   :  { %1118 = vperm.xlu0 %3818, %v4182_v2   ;;  %434 = vrot.lane.b32.xlu1 %v429_v29, %s4041_s17  ;;  %v540_v29 = vmul.f32 %v538_v20, %v4221_v26 }
 0x105   :  { %3819 = vset.pattern.permute.xlu0 %v6582_v37  ;;  %460 = vrot.lane.b32.xlu1 %v456_v32, %s4044_s18  ;;  %v6575_v32 = vmov 44  }
 0x106   :  { %1146 = vperm.xlu0 %3819, %v4182_v2  }
 0x109   :  { %462 = vrot.lane.b32.xlu1 %v457_v40, %s4044_s18 }
 0x10a   :  { %3820 = vset.pattern.permute.xlu0 %v6580_v43 }
 0x10b   :  { %1174 = vperm.xlu0 %3820, %v4182_v2   ;;  %v4347_v45 = vpop.permute.xlu1 %68  ;;  %v4367_v28 = vpop.permute.xlu0 %96 }
 0x10d   :  { %488 = vrot.lane.b32.xlu1 %v484_v41, %s4046_s19  ;;  %v6573_v41 = vmov 45  }
 0x10f   :  { %3821 = vset.pattern.permute.xlu0 %v6578_v53  ;;  %v4353_v55 = vpop.permute.xlu1 %70 }
 0x110   :  { %1202 = vperm.xlu0 %3821, %v4182_v2  }
 0x111   :  { %490 = vrot.lane.b32.xlu1 %v485_v51, %s4046_s19 }
 0x113   :  { %v4358_v61 = vpop.permute.xlu1 %98 }
 0x114   :  { %3822 = vset.pattern.permute.xlu0 %v6576_v62  ;;  %v6579_v62 = vmov 48  }
 0x115   :  { %1230 = vperm.xlu0 %3822, %v4182_v2   ;;  %516 = vrot.lane.b32.xlu1 %v512_v57, %s4049_s20 }
 0x117   :  { %v4365_v24 = vpop.permute.xlu1 %124 }
 0x119   :  { %3823 = vset.pattern.permute.xlu0 %v6575_v32  ;;  %518 = vrot.lane.b32.xlu1 %v513_v21, %s4049_s20 }
 0x11a   :  { %1258 = vperm.xlu0 %3823, %v4182_v2  }
 0x11b   :  { %v4373_v34 = vpop.permute.xlu1 %126 }
 0x11c   :  { %v559_v36 = vpop.permute.xlu0 %558 }
 0x11d   :  { %544 = vrot.lane.b32.xlu1 %v540_v29, %s4051_s21  ;;  %v566_v40 = vrot.slane %v559_v36, %v4219_v25 }
 0x11e   :  { %3824 = vset.pattern.permute.xlu0 %v6573_v41  ;;  %v6577_v41 = vmov 47  }
 0x11f   :  { %1286 = vperm.xlu0 %3824, %v4182_v2   ;;  %v4380_v48 = vpop.permute.xlu1 %152  ;;  %v568_v51 = vmul.f32 %v566_v40, %v4221_v26  ;;  %v569_v29 = vmul.f32 %v566_v40, %v4227_v33 }
 0x121   :  { %546 = vrot.lane.b32.xlu1 %v541_v47, %s4051_s21  ;;  %v587_v57 = vpop.permute.xlu0 %586 }
 0x122   :  { %v594_v20 = vrot.slane %v587_v57, %v4219_v25 }
 0x123   :  { %3825 = vset.pattern.permute.xlu0 %v6574_v58  ;;  %v4385_v21 = vpop.permute.xlu1 %154 }
 0x124   :  { %1314 = vperm.xlu0 %3825, %v4182_v2   ;;  %v596_v47 = vmul.f32 %v594_v20, %v4221_v26 }
 0x125   :  { %572 = vrot.lane.b32.xlu1 %v568_v51, %s4054_s22  ;;  %v597_v51 = vmul.f32 %v594_v20, %v4227_v33 }
 0x126   :  { %v615_v58 = vpop.permute.xlu0 %614 }
 0x127   :  { %v4391_v36 = vpop.permute.xlu1 %180  ;;  %v622_v40 = vrot.slane %v615_v58, %v4219_v25 }
 0x128   :  { %3826 = vset.pattern.permute.xlu0 %v6577_v41 }
 0x129   :  { %1342 = vperm.xlu0 %3826, %v4182_v2   ;;  %574 = vrot.lane.b32.xlu1 %v569_v29, %s4054_s22  ;;  %v624_v41 = vmul.f32 %v622_v40, %v4221_v26  ;;  %v6581_v29 = vmov 49   ;;  %v625_v20 = vmul.f32 %v622_v40, %v4227_v33 }
 0x12b   :  { %v4397_v32 = vpop.permute.xlu1 %182  ;;  %v643_v53 = vpop.permute.xlu0 %642 }
 0x12c   :  { %v650_v58 = vrot.slane %v643_v53, %v4219_v25 }
 0x12d   :  { %3827 = vset.pattern.permute.xlu0 %v6579_v62  ;;  %600 = vrot.lane.b32.xlu1 %v596_v47, %s4057_s23  ;;  %v6584_v47 = vmov 50  }
 0x12e   :  { %1370 = vperm.xlu0 %3827, %v4182_v2   ;;  %v653_v40 = vmul.f32 %v650_v58, %v4227_v33 }
 0x12f   :  { %v4404_v57 = vpop.permute.xlu1 %208 }
 0x131   :  { %602 = vrot.lane.b32.xlu1 %v597_v51, %s4057_s23  ;;  %v652_v51 = vmul.f32 %v650_v58, %v4221_v26 }
 0x132   :  { %3828 = vset.pattern.permute.xlu0 %v6581_v29  ;;  %v671_v29 = vpop.permute.xlu0 %670 }
 0x133   :  { %1398 = vperm.xlu0 %3828, %v4182_v2   ;;  %v4410_v62 = vpop.permute.xlu1 %210  ;;  %v678_v53 = vrot.slane %v671_v29, %v4219_v25 }
 0x135   :  { %628 = vrot.lane.b32.xlu1 %v624_v41, %s4059_s24  ;;  %v681_v59 = vmul.f32 %v678_v53, %v4227_v33 }
 0x136   :  { %v699_v41 = vpop.permute.xlu0 %698 }
 0x137   :  { %3829 = vset.pattern.permute.xlu0 %v6584_v47  ;;  %v4416_v43 = vpop.permute.xlu1 %236  ;;  %v706_v29 = vrot.slane %v699_v41, %v4219_v25 }
 0x138   :  { %1426 = vperm.xlu0 %3829, %v4182_v2  }
 0x139   :  { %630 = vrot.lane.b32.xlu1 %v625_v20, %s4059_s24  ;;  %v680_v20 = vmul.f32 %v678_v53, %v4221_v26 }
 0x13b   :  { %v4421_v37 = vpop.permute.xlu1 %238 }
 0x13c   :  { %3830 = vset.pattern.permute.xlu0 %v6586_v30  ;;  %v727_v30 = vpop.permute.xlu0 %726 }
 0x13d   :  { %1454 = vperm.xlu0 %3830, %v4182_v2   ;;  %656 = vrot.lane.b32.xlu1 %v652_v51, %s4062_s25  ;;  %v6592_v51 = vmov 53   ;;  %v734_v53 = vrot.slane %v727_v30, %v4219_v25 }
 0x13f   :  { %v4428_v47 = vpop.permute.xlu1 %264 }
 0x140   :  { %v755_v58 = vpop.permute.xlu0 %754 }
 0x141   :  { %3831 = vset.pattern.permute.xlu0 %v6589_v23  ;;  %658 = vrot.lane.b32.xlu1 %v653_v40, %s4062_s25  ;;  %v708_v40 = vmul.f32 %v706_v29, %v4221_v26  ;;  %v762_v30 = vrot.slane %v755_v58, %v4219_v25 }
 0x142   :  { %1482 = vperm.xlu0 %3831, %v4182_v2  }
 0x143   :  { %v4434_v1 = vpop.permute.xlu1 %266 }
 0x144   :  { %v783_v54 = vpop.permute.xlu0 %782 }
 0x145   :  { %684 = vrot.lane.b32.xlu1 %v680_v20, %s4064_s26  ;;  %v790_v58 = vrot.slane %v783_v54, %v4219_v25  ;;  %v6609_v54 = vmov 59  }
 0x146   :  { %3832 = vset.pattern.permute.xlu0 %v6592_v51  ;;  %v709_v51 = vmul.f32 %v706_v29, %v4227_v33 }
 0x147   :  { %1510 = vperm.xlu0 %3832, %v4182_v2   ;;  %v4441_v23 = vpop.permute.xlu1 %292 }
 0x149   :  { %686 = vrot.lane.b32.xlu1 %v681_v59, %s4064_s26  ;;  %v811_v41 = vpop.permute.xlu0 %810  ;;  %v736_v59 = vmul.f32 %v734_v53, %v4221_v26 }
 0x14b   :  { %3833 = vset.pattern.permute.xlu0 %v6631_v50  ;;  %v4446_v20 = vpop.permute.xlu1 %294  ;;  %v6636_v50 = vmov 66  }
 0x14c   :  { %1538 = vperm.xlu0 %3833, %v4182_v2  }
 0x14d   :  { %712 = vrot.lane.b32.xlu1 %v708_v40, %s6658_s27  ;;  %v6601_v40 = vmov 56  }
 0x14e   :  { %v839_v35 = vpop.permute.xlu0 %838 }
 0x14f   :  { %v4452_v44 = vpop.permute.xlu1 %320 }
 0x150   :  { %3834 = vset.pattern.permute.xlu0 %v6597_v38  ;;  %v737_v38 = vmul.f32 %v734_v53, %v4227_v33 }
 0x151   :  { %1566 = vperm.xlu0 %3834, %v4182_v2   ;;  %714 = vrot.lane.b32.xlu1 %v709_v51, %s6658_s27  ;;  %v764_v51 = vmul.f32 %v762_v30, %v4221_v26  ;;  %s6673_s27 = smov 91  }
 0x153   :  { %v4458_v31 = vpop.permute.xlu1 %322  ;;  %v867_v29 = vpop.permute.xlu0 %866 }
 0x155   :  { %3835 = vset.pattern.permute.xlu0 %v6601_v40  ;;  %740 = vrot.lane.b32.xlu1 %v736_v59, %s6656_s28  ;;  %v765_v40 = vmul.f32 %v762_v30, %v4227_v33  ;;  %v818_v30 = vrot.slane %v811_v41, %v4219_v25  ;;  %v846_v41 = vrot.slane %v839_v35, %v4219_v25 }
 0x156   :  { %1594 = vperm.xlu0 %3835, %v4182_v2   ;;  %v874_v35 = vrot.slane %v867_v29, %v4219_v25  ;;  %v6630_v29 = vmov 64  }
 0x157   :  { %v4465_v27 = vpop.permute.xlu1 %348  ;;  %v821_v42 = vmul.f32 %v818_v30, %v4227_v33 }
 0x158   :  { %v4469_v22 = vpop.permute.xlu0 %894 }
 0x159   :  { %742 = vrot.lane.b32.xlu1 %v737_v38, %s6656_s28  ;;  %s6677_s28 = smov 90  }
 0x15a   :  { %3836 = vset.pattern.permute.xlu0 %v6603_v63  ;;  %v792_v63 = vmul.f32 %v790_v58, %v4221_v26 }
 0x15b   :  { %1622 = vperm.xlu0 %3836, %v4182_v2   ;;  %v4473_v59 = vpop.permute.xlu1 %350 }
 0x15d   :  { %768 = vrot.lane.b32.xlu1 %v764_v51, %s6610_s29  ;;  %v4477_v53 = vpop.permute.xlu0 %922 }
 0x15f   :  { %3837 = vset.pattern.permute.xlu0 %v6605_v60  ;;  %v4481_v38 = vpop.permute.xlu1 %376  ;;  %v793_v60 = vmul.f32 %v790_v58, %v4227_v33  ;;  %v6618_v58 = vmov 61  }
 0x160   :  { %1650 = vperm.xlu0 %3837, %v4182_v2  }
 0x161   :  { %770 = vrot.lane.b32.xlu1 %v765_v40, %s6610_s29  ;;  %v820_v40 = vmul.f32 %v818_v30, %v4221_v26  ;;  %s6622_s29 = smov 100  }
 0x162   :  { %v4486_v56 = vpop.permute.xlu0 %950 }
 0x163   :  { %v4488_v51 = vpop.permute.xlu1 %378 }
 0x164   :  { %3838 = vset.pattern.permute.xlu0 %v6609_v54 }
 0x165   :  { %1678 = vperm.xlu0 %3838, %v4182_v2   ;;  %796 = vrot.lane.b32.xlu1 %v792_v63, %s6616_s30 }
 0x167   :  { %v4495_v52 = vpop.permute.xlu1 %404  ;;  %v4497_v49 = vpop.permute.xlu0 %978 }
 0x169   :  { %3839 = vset.pattern.permute.xlu0 %v6613_v46  ;;  %798 = vrot.lane.b32.xlu1 %v793_v60, %s6616_s30  ;;  %v848_v60 = vmul.f32 %v846_v41, %v4221_v26  ;;  %s6628_s30 = smov 99  }
 0x16a   :  { %1706 = vperm.xlu0 %3839, %v4182_v2  }
 0x16b   :  { %v4503_v54 = vpop.permute.xlu1 %406 }
 0x16c   :  { %v4505_v63 = vpop.permute.xlu0 %1006 }
 0x16d   :  { %824 = vrot.lane.b32.xlu1 %v820_v40, %s6622_s29 }
 0x16e   :  { %3840 = vset.pattern.permute.xlu0 %v6618_v58  ;;  %v849_v58 = vmul.f32 %v846_v41, %v4227_v33  ;;  %v902_v41 = vrot.slane %v4469_v22, %v4219_v25  ;;  %v930_v22 = vrot.slane %v4477_v53, %v4219_v25  ;;  %v6640_v53 = vmov 67  }
 0x16f   :  { %1734 = vperm.xlu0 %3840, %v4182_v2   ;;  %v4512_v46 = vpop.permute.xlu1 %432 }
 0x170   :  { %v904_v15 = vmul.f32 %v902_v41, %v4221_v26 }
 0x171   :  { %826 = vrot.lane.b32.xlu1 %v821_v42, %s6622_s29  ;;  %v4516_v39 = vpop.permute.xlu0 %1034  ;;  %v6624_v42 = vmov 63   ;;  %s6634_s29 = smov 98  }
 0x173   :  { %3841 = vset.pattern.permute.xlu0 %v6620_v19  ;;  %v4519_v40 = vpop.permute.xlu1 %434  ;;  %v876_v19 = vmul.f32 %v874_v35, %v4221_v26 }
 0x174   :  { %1762 = vperm.xlu0 %3841, %v4182_v2  }
 0x175   :  { %852 = vrot.lane.b32.xlu1 %v848_v60, %s6628_s30 }
 0x176   :  { %v4524_v30 = vpop.permute.xlu0 %1062 }
 0x177   :  { %v4527_v18 = vpop.permute.xlu1 %460  ;;  %v1070_v5 = vrot.slane %v4524_v30, %v4219_v25  ;;  %v6670_v30 = vmov 0  }
 0x178   :  { %3842 = vset.pattern.permute.xlu0 %v6624_v42  ;;  %v877_v42 = vmul.f32 %v874_v35, %v4227_v33 }
 0x179   :  { %1790 = vperm.xlu0 %3842, %v4182_v2   ;;  %854 = vrot.lane.b32.xlu1 %v849_v58, %s6628_s30  ;;  %s6641_s30 = smov 97  }
 0x17b   :  { %v4533_v17 = vpop.permute.xlu1 %462  ;;  %v4535_v60 = vpop.permute.xlu0 %1090 }
 0x17d   :  { %3843 = vset.pattern.permute.xlu0 %v6630_v29  ;;  %880 = vrot.lane.b32.xlu1 %v876_v19, %s6634_s29  ;;  %v905_v29 = vmul.f32 %v902_v41, %v4227_v33  ;;  %v958_v41 = vrot.slane %v4486_v56, %v4219_v25 }
 0x17e   :  { %1818 = vperm.xlu0 %3843, %v4182_v2  }
 0x17f   :  { %v4543_v16 = vpop.permute.xlu1 %488  ;;  %v960_v13 = vmul.f32 %v958_v41, %v4221_v26  ;;  %v961_v11 = vmul.f32 %v958_v41, %v4227_v33 }
 0x180   :  { %v4545_v58 = vpop.permute.xlu0 %1118 }
 0x181   :  { %882 = vrot.lane.b32.xlu1 %v877_v42, %s6634_s29  ;;  %s6647_s29 = smov 96  }
 0x182   :  { %3844 = vset.pattern.permute.xlu0 %v6632_v14  ;;  %v932_v14 = vmul.f32 %v930_v22, %v4221_v26 }
 0x183   :  { %1846 = vperm.xlu0 %3844, %v4182_v2   ;;  %v4551_v19 = vpop.permute.xlu1 %490 }
 0x185   :  { %908 = vrot.lane.b32.xlu1 %v904_v15, %s6641_s30  ;;  %v4556_v35 = vpop.permute.xlu0 %1146 }
 0x187   :  { %3845 = vset.pattern.permute.xlu0 %v6636_v50  ;;  %v4560_v42 = vpop.permute.xlu1 %516  ;;  %v933_v50 = vmul.f32 %v930_v22, %v4227_v33  ;;  %v6649_v22 = vmov 69  }
 0x188   :  { %1874 = vperm.xlu0 %3845, %v4182_v2  }
 0x189   :  { %910 = vrot.lane.b32.xlu1 %v905_v29, %s6641_s30  ;;  %s6654_s30 = smov 95  }
 0x18a   :  { %v4565_v3 = vpop.permute.xlu0 %1174 }
 0x18b   :  { %v4567_v15 = vpop.permute.xlu1 %518 }
 0x18c   :  { %3846 = vset.pattern.permute.xlu0 %v6640_v53 }
 0x18d   :  { %1902 = vperm.xlu0 %3846, %v4182_v2   ;;  %936 = vrot.lane.b32.xlu1 %v932_v14, %s6647_s29  ;;  %v986_v14 = vrot.slane %v4497_v49, %v4219_v25 }
 0x18f   :  { %v4575_v0 = vpop.permute.xlu1 %544  ;;  %v4577_v29 = vpop.permute.xlu0 %1202 }
 0x191   :  { %3847 = vset.pattern.permute.xlu0 %v6644_v12  ;;  %938 = vrot.lane.b32.xlu1 %v933_v50, %s6647_s29  ;;  %v988_v12 = vmul.f32 %v986_v14, %v4221_v26  ;;  %s4093_s29 = smov 94  }
 0x192   :  { %1930 = vperm.xlu0 %3847, %v4182_v2  }
 0x193   :  { %v4583_v56 = vpop.permute.xlu1 %546 }
 0x194   :  { %6859 = vst [vmem:[#allocation8_spill] sm:$0xff] %v4583_v56  ;;  %v4585_v53 = vpop.permute.xlu0 %1230 }
 0x195   :  { %964 = vrot.lane.b32.xlu1 %v960_v13, %s6654_s30  ;;  %v1014_v13 = vrot.slane %v4505_v63, %v4219_v25 }
 0x196   :  { %3848 = vset.pattern.permute.xlu0 %v6649_v22  ;;  %v989_v22 = vmul.f32 %v986_v14, %v4227_v33  ;;  %v3932_v14 = vld [vmem:[%s6569_s1] sm:$0xf]  ;;  %s4098_s1 = smov 92  }
 0x197   :  { %1958 = vperm.xlu0 %3848, %v4182_v2   ;;  %v4593_v50 = vpop.permute.xlu1 %572 }
 0x199   :  { %966 = vrot.lane.b32.xlu1 %v961_v11, %s6654_s30  ;;  %v4597_v10 = vpop.permute.xlu0 %1258  ;;  %s4096_s30 = smov 93  }
 0x19b   :  { %3849 = vset.pattern.permute.xlu0 %v6651_v9  ;;  %v4600_v49 = vpop.permute.xlu1 %574  ;;  %v1016_v9 = vmul.f32 %v1014_v13, %v4221_v26 }
 0x19c   :  { %6860 = vst [vmem:[#allocation9_spill] sm:$0xff] %v4600_v49  ;;  %1986 = vperm.xlu0 %3849, %v4182_v2  }
 0x19d   :  { %992 = vrot.lane.b32.xlu1 %v988_v12, %s4093_s29  ;;  %v1042_v12 = vrot.slane %v4516_v39, %v4219_v25  ;;  %v6664_v39 = vmov 73  }
 0x19e   :  { %v4606_v41 = vpop.permute.xlu0 %1286 }
 0x19f   :  { %v4609_v11 = vpop.permute.xlu1 %600 }
 0x1a0   :  { %6861 = vst [vmem:[#allocation10_spill] sm:$0xff] %v4609_v11  ;;  %3850 = vset.pattern.permute.xlu0 %v6660_v8  ;;  %v1044_v8 = vmul.f32 %v1042_v12, %v4221_v26 }
 0x1a1   :  { %2014 = vperm.xlu0 %3850, %v4182_v2   ;;  %994 = vrot.lane.b32.xlu1 %v989_v22, %s4093_s29  ;;  %v1017_v2 = vmul.f32 %v1014_v13, %v4227_v33  ;;  %v1045_v13 = vmul.f32 %v1042_v12, %v4227_v33 }
 0x1a3   :  { %v4615_v7 = vpop.permute.xlu1 %602  ;;  %v4617_v63 = vpop.permute.xlu0 %1314 }
 0x1a4   :  { %6862 = vst [vmem:[#allocation11_spill] sm:$0xff] %v4615_v7  ;;  %v1072_v7 = vmul.f32 %v1070_v5, %v4221_v26 }
 0x1a5   :  { %3851 = vset.pattern.permute.xlu0 %v6661_v6  ;;  %1020 = vrot.lane.b32.xlu1 %v1016_v9, %s4096_s30 }
 0x1a6   :  { %2042 = vperm.xlu0 %3851, %v3932_v14  }
 0x1a7   :  { %v4627_v22 = vpop.permute.xlu1 %628 }
 0x1a8   :  { %6863 = vst [vmem:[#allocation12_spill] sm:$0xff] %v4627_v22  ;;  %v4632_v6 = vpop.permute.xlu0 %1342 }
 0x1a9   :  { %1022 = vrot.lane.b32.xlu1 %v1017_v2, %s4096_s30 }
 0x1aa   :  { %3852 = vset.pattern.permute.xlu0 %v6664_v39 }
 0x1ab   :  { %2070 = vperm.xlu0 %3852, %v3932_v14   ;;  %v4634_v9 = vpop.permute.xlu1 %630 }
 0x1ac   :  { %6864 = vst [vmem:[#allocation13_spill] sm:$0xff] %v4634_v9 }
 0x1ad   :  { %1048 = vrot.lane.b32.xlu1 %v1044_v8, %s4098_s1  ;;  %v4643_v39 = vpop.permute.xlu0 %1370  ;;  %v1098_v8 = vrot.slane %v4535_v60, %v4219_v25  ;;  %v1126_v60 = vrot.slane %v4545_v58, %v4219_v25 }
 0x1af   :  { %3853 = vset.pattern.permute.xlu0 %v6667_v4  ;;  %v4641_v2 = vpop.permute.xlu1 %656  ;;  %v1073_v4 = vmul.f32 %v1070_v5, %v4227_v33  ;;  %v1128_v5 = vmul.f32 %v1126_v60, %v4221_v26  ;;  %v1129_v58 = vmul.f32 %v1126_v60, %v4227_v33 }
 0x1b0   :  { %6865 = vst [vmem:[#allocation14_spill] sm:$0xff] %v4641_v2  ;;  %2098 = vperm.xlu0 %3853, %v3932_v14  }
 0x1b1   :  { %1050 = vrot.lane.b32.xlu1 %v1045_v13, %s4098_s1  ;;  %v1100_v13 = vmul.f32 %v1098_v8, %v4221_v26 }
 0x1b2   :  { %v4653_v12 = vpop.permute.xlu0 %1398 }
 0x1b3   :  { %v4647_v9 = vpop.permute.xlu1 %658 }
 0x1b4   :  { %6866 = vst [vmem:[#allocation15_spill] sm:$0xff] %v4647_v9  ;;  %3854 = vset.pattern.permute.xlu0 %v6670_v30 }
 0x1b5   :  { %39 = vperm.xlu0 %3854, %v3932_v14   ;;  %1076 = vrot.lane.b32.xlu1 %v1072_v7, %s6673_s27  ;;  %v1101_v7 = vmul.f32 %v1098_v8, %v4227_v33 }
 0x1b7   :  { %v4656_v2 = vpop.permute.xlu1 %684  ;;  %v4662_v30 = vpop.permute.xlu0 %1426 }
 0x1b8   :  { %6867 = vst [vmem:[#allocation16_spill] sm:$0xff] %v4656_v2 }
 0x1b9   :  { %1078 = vrot.lane.b32.xlu1 %v1073_v4, %s6673_s27  ;;  %s6681_s27 = smov 89  }
 0x1bb   :  { %v4660_v9 = vpop.permute.xlu1 %686 }
 0x1bc   :  { %6868 = vst [vmem:[#allocation17_spill] sm:$0xff] %v4660_v9  ;;  %v4672_v2 = vpop.permute.xlu0 %1454  ;;  %v1154_v9 = vrot.slane %v4556_v35, %v4219_v25 }
 0x1bd   :  { %1104 = vrot.lane.b32.xlu1 %v1100_v13, %s6677_s28 }
 0x1be   :  { %v1157_v60 = vmul.f32 %v1154_v9, %v4227_v33 }
 0x1bf   :  { %v4668_v14 = vpop.permute.xlu1 %712 }
 0x1c0   :  { %6869 = vst [vmem:[#allocation18_spill] sm:$0xff] %v4668_v14  ;;  %v1156_v14 = vmul.f32 %v1154_v9, %v4221_v26 }
 0x1c1   :  { %1106 = vrot.lane.b32.xlu1 %v1101_v7, %s6677_s28  ;;  %v4682_v8 = vpop.permute.xlu0 %1482  ;;  %s6685_s28 = smov 88  }
 0x1c3   :  { %v4674_v4 = vpop.permute.xlu1 %714 }
 0x1c4   :  { %6870 = vst [vmem:[#allocation19_spill] sm:$0xff] %v4674_v4  ;;  %v1182_v4 = vrot.slane %v4565_v3, %v4219_v25  ;;  %v1210_v3 = vrot.slane %v4577_v29, %v4219_v25  ;;  %v1238_v29 = vrot.slane %v4585_v53, %v4219_v25 }
 0x1c5   :  { %1132 = vrot.lane.b32.xlu1 %v1128_v5, %s6681_s27 }
 0x1c6   :  { %v4691_v35 = vpop.permute.xlu0 %1510 }
 0x1c7   :  { %v4680_v13 = vpop.permute.xlu1 %740 }
 0x1c8   :  { %6871 = vst [vmem:[#allocation20_spill] sm:$0xff] %v4680_v13  ;;  %v4696_v13 = vld [vmem:[#allocation2] sm:$0xff] }
 0x1c9   :  { %1134 = vrot.lane.b32.xlu1 %v1129_v58, %s6681_s27  ;;  %v1184_v26 = vmul.f32 %v4696_v13, %v1182_v4  ;;  %s6690_s27 = smov 87  }
 0x1cb   :  { %v4686_v7 = vpop.permute.xlu1 %742 }
 0x1cc   :  { %6872 = vst [vmem:[#allocation21_spill] sm:$0xff] %v4686_v7  ;;  %v4702_v7 = vpop.permute.xlu0 %1538 }
 0x1cd   :  { %1160 = vrot.lane.b32.xlu1 %v1156_v14, %s6685_s28  ;;  %v4707_v14 = vld [vmem:[#allocation2 + $0x8] sm:$0xff] }
 0x1ce   :  { %v1185_v33 = vmul.f32 %v4707_v14, %v1182_v4 }
 0x1cf   :  { %v4694_v5 = vpop.permute.xlu1 %768 }
 0x1d0   :  { %6873 = vst [vmem:[#allocation22_spill] sm:$0xff] %v4694_v5  ;;  %v1212_v5 = vmul.f32 %v4696_v13, %v1210_v3 }
 0x1d1   :  { %1162 = vrot.lane.b32.xlu1 %v1157_v60, %s6685_s28  ;;  %v4714_v60 = vpop.permute.xlu0 %1566  ;;  %s6694_s28 = smov 86  }
 0x1d3   :  { %v4700_v58 = vpop.permute.xlu1 %770 }
 0x1d4   :  { %6874 = vst [vmem:[#allocation23_spill] sm:$0xff] %v4700_v58 }
 0x1d5   :  { %1188 = vrot.lane.b32.xlu1 %v1184_v26, %s6690_s27  ;;  %v1213_v26 = vmul.f32 %v4707_v14, %v1210_v3  ;;  %v4724_v4 = vpop.permute.xlu0 %1594 }
 0x1d7   :  { %v4710_v9 = vpop.permute.xlu1 %796 }
 0x1d8   :  { %6875 = vst [vmem:[#allocation24_spill] sm:$0xff] %v4710_v9  ;;  %v1240_v9 = vmul.f32 %v4696_v13, %v1238_v29 }
 0x1d9   :  { %1190 = vrot.lane.b32.xlu1 %v1185_v33, %s6690_s27  ;;  %s6699_s27 = smov 85  }
 0x1da   :  { %v4733_v53 = vpop.permute.xlu0 %1622 }
 0x1db   :  { %v4716_v58 = vpop.permute.xlu1 %798 }
 0x1dc   :  { %6876 = vst [vmem:[#allocation25_spill] sm:$0xff] %v4716_v58  ;;  %v1266_v58 = vrot.slane %v4597_v10, %v4219_v25  ;;  %v1294_v10 = vrot.slane %v4606_v41, %v4219_v25 }
 0x1dd   :  { %1216 = vrot.lane.b32.xlu1 %v1212_v5, %s6694_s28  ;;  %v1241_v5 = vmul.f32 %v4707_v14, %v1238_v29 }
 0x1de   :  { %v1296_v29 = vmul.f32 %v4696_v13, %v1294_v10  ;;  %v1297_v41 = vmul.f32 %v4707_v14, %v1294_v10 }
 0x1df   :  { %v4722_v22 = vpop.permute.xlu1 %824 }
 0x1e0   :  { %6877 = vst [vmem:[#allocation26_spill] sm:$0xff] %v4722_v22  ;;  %v1268_v22 = vmul.f32 %v4696_v13, %v1266_v58 }
 0x1e1   :  { %1218 = vrot.lane.b32.xlu1 %v1213_v26, %s6694_s28  ;;  %v4742_v26 = vpop.permute.xlu0 %1650  ;;  %s6703_s28 = smov 84  }
 0x1e3   :  { %v4728_v33 = vpop.permute.xlu1 %826 }
 0x1e4   :  { %6878 = vst [vmem:[#allocation27_spill] sm:$0xff] %v4728_v33 }
 0x1e5   :  { %1244 = vrot.lane.b32.xlu1 %v1240_v9, %s6699_s27  ;;  %v1269_v9 = vmul.f32 %v4707_v14, %v1266_v58 }
 0x1e7   :  { %v4736_v3 = vpop.permute.xlu1 %852 }
 0x1e8   :  { %6879 = vst [vmem:[#allocation28_spill] sm:$0xff] %v4736_v3  ;;  %v4752_v3 = vpop.permute.xlu0 %1678 }
 0x1e9   :  { %1246 = vrot.lane.b32.xlu1 %v1241_v5, %s6699_s27  ;;  %s6707_s27 = smov 83  }
 0x1eb   :  { %v4740_v49 = vpop.permute.xlu1 %854 }
 0x1ec   :  { %6880 = vst [vmem:[#allocation29_spill] sm:$0xff] %v4740_v49  ;;  %v1322_v49 = vrot.slane %v4617_v63, %v4219_v25  ;;  %v4762_v58 = vpop.permute.xlu0 %1706 }
 0x1ed   :  { %1272 = vrot.lane.b32.xlu1 %v1268_v22, %s6703_s28 }
 0x1ee   :  { %v1325_v10 = vmul.f32 %v4707_v14, %v1322_v49 }
 0x1ef   :  { %v4748_v33 = vpop.permute.xlu1 %880 }
 0x1f0   :  { %6881 = vst [vmem:[#allocation30_spill] sm:$0xff] %v4748_v33  ;;  %v1324_v33 = vmul.f32 %v4696_v13, %v1322_v49  ;;  %v4771_v63 = vpop.permute.xlu0 %1734 }
 0x1f1   :  { %1274 = vrot.lane.b32.xlu1 %v1269_v9, %s6703_s28  ;;  %s6712_s28 = smov 82  }
 0x1f3   :  { %v4754_v5 = vpop.permute.xlu1 %882 }
 0x1f4   :  { %6882 = vst [vmem:[#allocation31_spill] sm:$0xff] %v4754_v5  ;;  %v1350_v5 = vrot.slane %v4632_v6, %v4219_v25  ;;  %v1378_v6 = vrot.slane %v4643_v39, %v4219_v25 }
 0x1f5   :  { %1300 = vrot.lane.b32.xlu1 %v1296_v29, %s6707_s27 }
 0x1f6   :  { %v1380_v49 = vmul.f32 %v4696_v13, %v1378_v6  ;;  %v1381_v39 = vmul.f32 %v4707_v14, %v1378_v6 }
 0x1f7   :  { %v4760_v22 = vpop.permute.xlu1 %908 }
 0x1f8   :  { %6883 = vst [vmem:[#allocation32_spill] sm:$0xff] %v4760_v22  ;;  %v1352_v22 = vmul.f32 %v4696_v13, %v1350_v5 }
 0x1f9   :  { %1302 = vrot.lane.b32.xlu1 %v1297_v41, %s6707_s27  ;;  %v4780_v41 = vpop.permute.xlu0 %1762  ;;  %s6716_s27 = smov 81  }
 0x1fb   :  { %v4766_v9 = vpop.permute.xlu1 %910 }
 0x1fc   :  { %6884 = vst [vmem:[#allocation33_spill] sm:$0xff] %v4766_v9 }
 0x1fd   :  { %1328 = vrot.lane.b32.xlu1 %v1324_v33, %s6712_s28  ;;  %v1353_v33 = vmul.f32 %v4707_v14, %v1350_v5 }
 0x1ff   :  { %v4774_v29 = vpop.permute.xlu1 %936 }
 0x200   :  { %6885 = vst [vmem:[#allocation34_spill] sm:$0xff] %v4774_v29  ;;  %v4790_v29 = vpop.permute.xlu0 %1790 }
 0x201   :  { %1330 = vrot.lane.b32.xlu1 %v1325_v10, %s6712_s28  ;;  %s6720_s28 = smov 80  }
 0x203   :  { %v4778_v11 = vpop.permute.xlu1 %938 }
 0x204   :  { %6886 = vst [vmem:[#allocation35_spill] sm:$0xff] %v4778_v11  ;;  %v1406_v11 = vrot.slane %v4653_v12, %v4219_v25  ;;  %v4800_v5 = vpop.permute.xlu0 %1818 }
 0x205   :  { %1356 = vrot.lane.b32.xlu1 %v1352_v22, %s6716_s27 }
 0x206   :  { %v1409_v6 = vmul.f32 %v4707_v14, %v1406_v11 }
 0x207   :  { %v4786_v9 = vpop.permute.xlu1 %964 }
 0x208   :  { %6887 = vst [vmem:[#allocation36_spill] sm:$0xff] %v4786_v9  ;;  %v1408_v9 = vmul.f32 %v4696_v13, %v1406_v11  ;;  %v4809_v12 = vpop.permute.xlu0 %1846 }
 0x209   :  { %1358 = vrot.lane.b32.xlu1 %v1353_v33, %s6716_s27  ;;  %s6725_s27 = smov 79  }
 0x20b   :  { %v4792_v10 = vpop.permute.xlu1 %966 }
 0x20c   :  { %6888 = vst [vmem:[#allocation37_spill] sm:$0xff] %v4792_v10  ;;  %v1434_v10 = vrot.slane %v4662_v30, %v4219_v25  ;;  %v1462_v30 = vrot.slane %v4672_v2, %v4219_v25 }
 0x20d   :  { %1384 = vrot.lane.b32.xlu1 %v1380_v49, %s6720_s28 }
 0x20e   :  { %v1464_v11 = vmul.f32 %v4696_v13, %v1462_v30  ;;  %v1465_v2 = vmul.f32 %v4707_v14, %v1462_v30 }
 0x20f   :  { %v4798_v22 = vpop.permute.xlu1 %992 }
 0x210   :  { %6889 = vst [vmem:[#allocation38_spill] sm:$0xff] %v4798_v22  ;;  %v1436_v22 = vmul.f32 %v4696_v13, %v1434_v10 }
 0x211   :  { %1386 = vrot.lane.b32.xlu1 %v1381_v39, %s6720_s28  ;;  %v4818_v39 = vpop.permute.xlu0 %1874  ;;  %s6729_s28 = smov 78  }
 0x213   :  { %v4804_v33 = vpop.permute.xlu1 %994 }
 0x214   :  { %6890 = vst [vmem:[#allocation39_spill] sm:$0xff] %v4804_v33 }
 0x215   :  { %1412 = vrot.lane.b32.xlu1 %v1408_v9, %s6725_s27  ;;  %v1437_v9 = vmul.f32 %v4707_v14, %v1434_v10 }
 0x217   :  { %v4812_v49 = vpop.permute.xlu1 %1020 }
 0x218   :  { %6891 = vst [vmem:[#allocation40_spill] sm:$0xff] %v4812_v49  ;;  %v4828_v49 = vpop.permute.xlu0 %1902 }
 0x219   :  { %1414 = vrot.lane.b32.xlu1 %v1409_v6, %s6725_s27  ;;  %s6732_s27 = smov 77  }
 0x21b   :  { %v4816_v56 = vpop.permute.xlu1 %1022 }
 0x21c   :  { %6892 = vst [vmem:[#allocation41_spill] sm:$0xff] %v4816_v56  ;;  %v1490_v56 = vrot.slane %v4682_v8, %v4219_v25  ;;  %v4838_v10 = vpop.permute.xlu0 %1930 }
 0x21d   :  { %1440 = vrot.lane.b32.xlu1 %v1436_v22, %s6729_s28  ;;  %6896 = vst [vmem:[#allocation45_spill] sm:$0xff] %v4838_v10 }
 0x21e   :  { %v1493_v30 = vmul.f32 %v4707_v14, %v1490_v56 }
 0x21f   :  { %v4824_v33 = vpop.permute.xlu1 %1048 }
 0x220   :  { %6893 = vst [vmem:[#allocation42_spill] sm:$0xff] %v4824_v33  ;;  %v1492_v33 = vmul.f32 %v4696_v13, %v1490_v56  ;;  %v4847_v8 = vpop.permute.xlu0 %1958 }
 0x221   :  { %1442 = vrot.lane.b32.xlu1 %v1437_v9, %s6729_s28  ;;  %s6737_s28 = smov 76  }
 0x223   :  { %v4830_v6 = vpop.permute.xlu1 %1050 }
 0x224   :  { %6894 = vst [vmem:[#allocation43_spill] sm:$0xff] %v4830_v6  ;;  %v1518_v6 = vrot.slane %v4691_v35, %v4219_v25  ;;  %v1546_v35 = vrot.slane %v4702_v7, %v4219_v25 }
 0x225   :  { %1468 = vrot.lane.b32.xlu1 %v1464_v11, %s6732_s27 }
 0x226   :  { %v1548_v56 = vmul.f32 %v4696_v13, %v1546_v35  ;;  %v1549_v7 = vmul.f32 %v4707_v14, %v1546_v35 }
 0x227   :  { %v4836_v22 = vpop.permute.xlu1 %1076 }
 0x228   :  { %6895 = vst [vmem:[#allocation44_spill] sm:$0xff] %v4836_v22  ;;  %v1520_v22 = vmul.f32 %v4696_v13, %v1518_v6 }
 0x229   :  { %1470 = vrot.lane.b32.xlu1 %v1465_v2, %s6732_s27  ;;  %v4856_v2 = vpop.permute.xlu0 %1986  ;;  %s6741_s27 = smov 75  }
 0x22b   :  { %v4842_v9 = vpop.permute.xlu1 %1078 }
 0x22c   :  { %6897 = vst [vmem:[#allocation46_spill] sm:$0xff] %v4842_v9 }
 0x22d   :  { %1496 = vrot.lane.b32.xlu1 %v1492_v33, %s6737_s28  ;;  %v1521_v33 = vmul.f32 %v4707_v14, %v1518_v6 }
 0x22f   :  { %v4850_v11 = vpop.permute.xlu1 %1104 }
 0x230   :  { %6898 = vst [vmem:[#allocation47_spill] sm:$0xff] %v4850_v11  ;;  %v4866_v11 = vpop.permute.xlu0 %2014 }
 0x231   :  { %1498 = vrot.lane.b32.xlu1 %v1493_v30, %s6737_s28  ;;  %s6744_s28 = smov 74  }
 0x233   :  { %v4854_v10 = vpop.permute.xlu1 %1106 }
 0x234   :  { %6899 = vst [vmem:[#allocation48_spill] sm:$0xff] %v4854_v10  ;;  %v1574_v10 = vrot.slane %v4714_v60, %v4219_v25  ;;  %v4876_v6 = vpop.permute.xlu0 %2042 }
 0x235   :  { %1524 = vrot.lane.b32.xlu1 %v1520_v22, %s6741_s27  ;;  %6903 = vst [vmem:[#allocation52_spill] sm:$0xff] %v4876_v6 }
 0x236   :  { %v1577_v35 = vmul.f32 %v4707_v14, %v1574_v10 }
 0x237   :  { %v4862_v9 = vpop.permute.xlu1 %1132 }
 0x238   :  { %6900 = vst [vmem:[#allocation49_spill] sm:$0xff] %v4862_v9  ;;  %v1576_v9 = vmul.f32 %v4696_v13, %v1574_v10  ;;  %v4885_v60 = vpop.permute.xlu0 %2070 }
 0x239   :  { %1526 = vrot.lane.b32.xlu1 %v1521_v33, %s6741_s27  ;;  %s6749_s27 = smov 73   ;;  %6905 = vst [vmem:[#allocation54_spill] sm:$0xff] %v4885_v60 }
 0x23b   :  { %v4868_v30 = vpop.permute.xlu1 %1134 }
 0x23c   :  { %6901 = vst [vmem:[#allocation50_spill] sm:$0xff] %v4868_v30  ;;  %v1602_v30 = vrot.slane %v4724_v4, %v4219_v25  ;;  %v1630_v4 = vrot.slane %v4733_v53, %v4219_v25 }
 0x23d   :  { %1552 = vrot.lane.b32.xlu1 %v1548_v56, %s6744_s28 }
 0x23e   :  { %v1632_v10 = vmul.f32 %v4696_v13, %v1630_v4  ;;  %v1633_v53 = vmul.f32 %v4707_v14, %v1630_v4  ;;  %v1686_v4 = vrot.slane %v4752_v3, %v4219_v25 }
 0x23f   :  { %v4874_v22 = vpop.permute.xlu1 %1160 }
 0x240   :  { %6902 = vst [vmem:[#allocation51_spill] sm:$0xff] %v4874_v22  ;;  %v1604_v22 = vmul.f32 %v4696_v13, %v1602_v30  ;;  %v1688_v3 = vmul.f32 %v4696_v13, %v1686_v4 }
 0x241   :  { %1554 = vrot.lane.b32.xlu1 %v1549_v7, %s6744_s28  ;;  %v4894_v7 = vpop.permute.xlu0 %2098  ;;  %s6753_s28 = smov 72  }
 0x242   :  { %6908 = vst [vmem:[#allocation57_spill] sm:$0xff] %v4894_v7 }
 0x243   :  { %v4880_v33 = vpop.permute.xlu1 %1162 }
 0x244   :  { %6904 = vst [vmem:[#allocation53_spill] sm:$0xff] %v4880_v33 }
 0x245   :  { %1580 = vrot.lane.b32.xlu1 %v1576_v9, %s6749_s27  ;;  %v1605_v9 = vmul.f32 %v4707_v14, %v1602_v30 }
 0x247   :  { %v4888_v56 = vpop.permute.xlu1 %1188 }
 0x248   :  { %6906 = vst [vmem:[#allocation55_spill] sm:$0xff] %v4888_v56  ;;  %v40_v56 = vpop.permute.xlu0 %39 }
 0x249   :  { %1582 = vrot.lane.b32.xlu1 %v1577_v35, %s6749_s27  ;;  %v47_v7 = vrot.slane %v40_v56, %v4219_v25  ;;  %s6758_s27 = smov 71   ;;  %v100_v56 = vrot.slane %v4367_v28, 4 }
 0x24b   :  { %v4892_v6 = vpop.permute.xlu1 %1190 }
 0x24c   :  { %6907 = vst [vmem:[#allocation56_spill] sm:$0xff] %v4892_v6  ;;  %v1658_v6 = vrot.slane %v4742_v26, %v4219_v25 }
 0x24d   :  { %1608 = vrot.lane.b32.xlu1 %v1604_v22, %s6753_s28  ;;  %v72_v22 = vrot.slane %v4347_v45, 4 }
 0x24e   :  { %v1661_v60 = vmul.f32 %v4707_v14, %v1658_v6 }
 0x24f   :  { %v4900_v33 = vpop.permute.xlu1 %1216  ;;  %v75_v26 = vsel %vm74_vm0, %v4347_v45, %v72_v22  ;;  %v103_v45 = vsel %vm102_vm1, %v4367_v28, %v100_v56  ;;  %v128_v22 = vrot.slane %v4365_v24, 4  ;;  %v156_v28 = vrot.slane %v4380_v48, 4 }
 0x250   :  { %6909 = vst [vmem:[#allocation58_spill] sm:$0xff] %v4900_v33  ;;  %v49_v33 = vmul.f32 %v4696_v13, %v47_v7  ;;  %v1714_v56 = vrot.slane %v4762_v58, %v4219_v25 }
 0x251   :  { %1610 = vrot.lane.b32.xlu1 %v1605_v9, %s6753_s28  ;;  %v1660_v9 = vmul.f32 %v4696_v13, %v1658_v6  ;;  %s6760_s28 = smov 70   ;;  %v101_v6 = vrot.slane %v4358_v61, 4 }
 0x252   :  { %v1716_v58 = vmul.f32 %v4696_v13, %v1714_v56 }
 0x253   :  { %v4904_v35 = vpop.permute.xlu1 %1218 }
 0x254   :  { %6910 = vst [vmem:[#allocation59_spill] sm:$0xff] %v4904_v35 }
 0x255   :  { %1636 = vrot.lane.b32.xlu1 %v1632_v10, %s6758_s27  ;;  %v79_v10 = vadd.f32 %v75_v26, %v49_v33 }
 0x257   :  { %v4911_v30 = vpop.permute.xlu1 %1244  ;;  %v107_v33 = vadd.f32 %v103_v45, %v79_v10 }
 0x258   :  { %6911 = vst [vmem:[#allocation60_spill] sm:$0xff] %v4911_v30  ;;  %v73_v30 = vrot.slane %v4353_v55, 4 }
 0x259   :  { %1638 = vrot.lane.b32.xlu1 %v1633_v53, %s6758_s27  ;;  %v50_v53 = vmul.f32 %v4707_v14, %v47_v7  ;;  %s6762_s27 = smov 69  }
 0x25b   :  { %v4917_v35 = vpop.permute.xlu1 %1246 }
 0x25c   :  { %6912 = vst [vmem:[#allocation61_spill] sm:$0xff] %v4917_v35 }
 0x25d   :  { %1664 = vrot.lane.b32.xlu1 %v1660_v9, %s6760_s28  ;;  %v76_v9 = vsel %vm74_vm0, %v4353_v55, %v73_v30  ;;  %v104_v55 = vsel %vm102_vm1, %v4358_v61, %v101_v6  ;;  %v1689_v30 = vmul.f32 %v4707_v14, %v1686_v4  ;;  %v1742_v6 = vrot.slane %v4771_v63, %v4219_v25 }
 0x25e   :  { %v80_v26 = vadd.f32 %v76_v9, %v50_v53  ;;  %vm522_vm0 = vcmask 908288   ;;  %vm550_vm1 = vcmask 900096  }
 0x25f   :  { %v4928_v35 = vpop.permute.xlu1 %1272  ;;  %v1744_v63 = vmul.f32 %v4696_v13, %v1742_v6 }
 0x260   :  { %6913 = vst [vmem:[#allocation62_spill] sm:$0xff] %v4928_v35  ;;  %v131_v35 = vsel %vm130_vm2, %v4365_v24, %v128_v22  ;;  %v108_v53 = vadd.f32 %v104_v55, %v80_v26  ;;  %v159_v24 = vsel %vm158_vm3, %v4380_v48, %v156_v28  ;;  %v184_v22 = vrot.slane %v4391_v36, 4 }
 0x261   :  { %1666 = vrot.lane.b32.xlu1 %v1661_v60, %s6760_s28  ;;  %v135_v10 = vadd.f32 %v131_v35, %v107_v33  ;;  %v129_v60 = vrot.slane %v4373_v34, 4  ;;  %v212_v48 = vrot.slane %v4404_v57, 4  ;;  %s6764_s28 = smov 68   ;;  %v185_v28 = vrot.slane %v4397_v32, 4 }
 0x262   :  { %v187_v9 = vsel %vm186_vm4, %v4391_v36, %v184_v22 }
 0x263   :  { %v4938_v7 = vpop.permute.xlu1 %1274  ;;  %v163_v35 = vadd.f32 %v159_v24, %v135_v10  ;;  %v132_v61 = vsel %vm130_vm2, %v4373_v34, %v129_v60  ;;  %v1717_v10 = vmul.f32 %v4707_v14, %v1714_v56  ;;  %v215_v36 = vsel %vm214_vm5, %v4404_v57, %v212_v48 }
 0x264   :  { %v136_v4 = vadd.f32 %v132_v61, %v108_v53  ;;  %v213_v24 = vrot.slane %v4410_v62, 4  ;;  %v268_v57 = vrot.slane %v4428_v47, 4  ;;  %vm578_vm2 = vcmask 891904  }
 0x265   :  { %1692 = vrot.lane.b32.xlu1 %v1688_v3, %s6762_s27  ;;  %v157_v3 = vrot.slane %v4385_v21, 4  ;;  %v191_v26 = vadd.f32 %v187_v9, %v163_v35  ;;  %v1770_v35 = vrot.slane %v4780_v41, %v4219_v25 }
 0x267   :  { %v4950_v45 = vpop.permute.xlu1 %1300  ;;  %v160_v34 = vsel %vm158_vm3, %v4385_v21, %v157_v3  ;;  %v219_v53 = vadd.f32 %v215_v36, %v191_v26  ;;  %v188_v21 = vsel %vm186_vm4, %v4397_v32, %v185_v28  ;;  %v216_v32 = vsel %vm214_vm5, %v4410_v62, %v213_v24 }
 0x268   :  { %v164_v55 = vadd.f32 %v160_v34, %v136_v4  ;;  %v241_v3 = vrot.slane %v4421_v37, 4  ;;  %v1745_v4 = vmul.f32 %v4707_v14, %v1742_v6  ;;  %v296_v26 = vrot.slane %v4441_v23, 4 }
 0x269   :  { %1694 = vrot.lane.b32.xlu1 %v1689_v30, %s6762_s27  ;;  %v240_v30 = vrot.slane %v4416_v43, 4  ;;  %s6766_s27 = smov 67   ;;  %v1772_v41 = vmul.f32 %v4696_v13, %v1770_v35  ;;  %v269_v28 = vrot.slane %v4434_v1, 4  ;;  %v1798_v36 = vrot.slane %v4790_v29, %v4219_v25 }
 0x26a   :  { %v192_v56 = vadd.f32 %v188_v21, %v164_v55  ;;  %v244_v62 = vsel %vm242_vm6, %v4421_v37, %v241_v3  ;;  %v299_v55 = vsel %vm298_vm8, %v4441_v23, %v296_v26  ;;  %vm6790_vm3 = vcmask 883712  }
 0x26b   :  { %v4960_v33 = vpop.permute.xlu1 %1302  ;;  %v272_v37 = vsel %vm270_vm7, %v4434_v1, %v269_v28  ;;  %v1800_v29 = vmul.f32 %v4696_v13, %v1798_v36  ;;  %v381_v28 = vrot.slane %v4488_v51, 4  ;;  %vm634_vm4 = vcmask 875520  }
 0x26c   :  { %v220_v9 = vadd.f32 %v216_v32, %v192_v56  ;;  %v352_v56 = vrot.slane %v4465_v27, 4  ;;  %vm662_vm5 = vcmask 867328  }
 0x26d   :  { %1720 = vrot.lane.b32.xlu1 %v1716_v58, %s6764_s28  ;;  %v243_v58 = vsel %vm242_vm6, %v4416_v43, %v240_v30  ;;  %v271_v43 = vsel %vm270_vm7, %v4428_v47, %v268_v57  ;;  %v324_v47 = vrot.slane %v4452_v44, 4  ;;  %v325_v57 = vrot.slane %v4458_v31, 4 }
 0x26e   :  { %v247_v61 = vadd.f32 %v243_v58, %v219_v53  ;;  %v248_v6 = vadd.f32 %v244_v62, %v220_v9  ;;  %v1773_v53 = vmul.f32 %v4707_v14, %v1770_v35  ;;  %v355_v32 = vsel %vm354_vm10, %v4465_v27, %v352_v56 }
 0x26f   :  { %v4972_v60 = vpop.permute.xlu1 %1328  ;;  %v327_v23 = vsel %vm326_vm9, %v4452_v44, %v324_v47  ;;  %v380_v44 = vrot.slane %v4481_v38, 4  ;;  %v1801_v9 = vmul.f32 %v4707_v14, %v1798_v36  ;;  %vm690_vm6 = vcmask 859136  }
 0x270   :  { %v275_v34 = vadd.f32 %v271_v43, %v247_v61  ;;  %v276_v21 = vadd.f32 %v272_v37, %v248_v6  ;;  %v1826_v43 = vrot.slane %v4800_v5, %v4219_v25  ;;  %vm718_vm7 = vcmask 850944  }
 0x271   :  { %1722 = vrot.lane.b32.xlu1 %v1717_v10, %s6764_s28  ;;  %s6768_s28 = smov 66   ;;  %v383_v27 = vsel %vm382_vm11, %v4481_v38, %v380_v44  ;;  %v436_v38 = vrot.slane %v4512_v46, 4 }
 0x272   :  { %v303_v30 = vadd.f32 %v299_v55, %v275_v34  ;;  %v408_v34 = vrot.slane %v4495_v52, 4  ;;  %v1828_v6 = vmul.f32 %v4696_v13, %v1826_v43  ;;  %v1829_v37 = vmul.f32 %v4707_v14, %v1826_v43 }
 0x273   :  { %v4982_v22 = vpop.permute.xlu1 %1330 }
 0x274   :  { %v331_v58 = vadd.f32 %v327_v23, %v303_v30  ;;  %v411_v47 = vsel %vm410_vm12, %v4495_v52, %v408_v34  ;;  %v409_v30 = vrot.slane %v4503_v54, 4  ;;  %v439_v52 = vsel %vm438_vm13, %v4512_v46, %v436_v38 }
 0x275   :  { %1748 = vrot.lane.b32.xlu1 %v1744_v63, %s6766_s27  ;;  %v297_v63 = vrot.slane %v4446_v20, 4  ;;  %v464_v23 = vrot.slane %v4527_v18, 4  ;;  %v492_v46 = vrot.slane %v4543_v16, 4 }
 0x276   :  { %v359_v3 = vadd.f32 %v355_v32, %v331_v58  ;;  %v465_v32 = vrot.slane %v4533_v17, 4 }
 0x277   :  { %v4994_v48 = vpop.permute.xlu1 %1356  ;;  %v300_v1 = vsel %vm298_vm8, %v4446_v20, %v297_v63  ;;  %v353_v20 = vrot.slane %v4473_v59, 4  ;;  %v1854_v63 = vrot.slane %v4809_v12, %v4219_v25  ;;  %vm746_vm8 = vcmask 842752  }
 0x278   :  { %v304_v35 = vadd.f32 %v300_v1, %v276_v21  ;;  %v387_v62 = vadd.f32 %v383_v27, %v359_v3  ;;  %v1882_v3 = vrot.slane %v4818_v39, %v4219_v25 }
 0x279   :  { %1750 = vrot.lane.b32.xlu1 %v1745_v4, %s6766_s27  ;;  %s6770_s27 = smov 65   ;;  %v328_v4 = vsel %vm326_vm9, %v4458_v31, %v325_v57  ;;  %v356_v31 = vsel %vm354_vm10, %v4473_v59, %v353_v20  ;;  %v384_v59 = vsel %vm382_vm11, %v4488_v51, %v381_v28  ;;  %v412_v51 = vsel %vm410_vm12, %v4503_v54, %v409_v30  ;;  %v6914_v30 = vld [vmem:[#allocation8_spill] sm:$0xff] }
 0x27a   :  { %v332_v26 = vadd.f32 %v328_v4, %v304_v35  ;;  %v415_v36 = vadd.f32 %v411_v47, %v387_v62  ;;  %v1856_v58 = vmul.f32 %v4696_v13, %v1854_v63  ;;  %v467_v57 = vsel %vm466_vm14, %v4527_v18, %v464_v23 }
 0x27b   :  { %v5004_v10 = vpop.permute.xlu1 %1358  ;;  %v1857_v44 = vmul.f32 %v4707_v14, %v1854_v63  ;;  %v495_v18 = vsel %vm494_vm15, %v4543_v16, %v492_v46  ;;  %v1884_v27 = vmul.f32 %v4696_v13, %v1882_v3  ;;  %v548_v16 = vrot.slane %v4575_v0, 4 }
 0x27c   :  { %v360_v5 = vadd.f32 %v356_v31, %v332_v26  ;;  %v443_v56 = vadd.f32 %v439_v52, %v415_v36  ;;  %v493_v26 = vrot.slane %v4551_v19, 4  ;;  %v521_v28 = vrot.slane %v4567_v15, 4 }
 0x27d   :  { %1776 = vrot.lane.b32.xlu1 %v1772_v41, %s6768_s28  ;;  %v576_v36 = vrot.slane %v4593_v50, 4  ;;  %vm774_vm9 = vcmask 834560   ;;  %vm802_vm10 = vcmask 826368   ;;  %vm830_vm11 = vcmask 818176  }
 0x27e   :  { %v471_v35 = vadd.f32 %v467_v57, %v443_v56  ;;  %vm858_vm12 = vcmask 809984  }
 0x27f   :  { %v5016_v24 = vpop.permute.xlu1 %1384  ;;  %v579_v52 = vsel %vm578_vm2, %v4593_v50, %v576_v36  ;;  %v6922_v36 = vld [vmem:[#allocation16_spill] sm:$0xff] }
 0x280   :  { %v499_v43 = vadd.f32 %v495_v18, %v471_v35 }
 0x281   :  { %1778 = vrot.lane.b32.xlu1 %v1773_v53, %s6768_s28  ;;  %s6772_s28 = smov 64   ;;  %v388_v53 = vadd.f32 %v384_v59, %v360_v5  ;;  %v1910_v5 = vrot.slane %v4828_v49, %v4219_v25 }
 0x283   :  { %v5026_v61 = vpop.permute.xlu1 %1386  ;;  %v416_v12 = vadd.f32 %v412_v51, %v388_v53  ;;  %v1912_v63 = vmul.f32 %v4696_v13, %v1910_v5  ;;  %v6916_v51 = vld [vmem:[#allocation9_spill] sm:$0xff] }
 0x285   :  { %1804 = vrot.lane.b32.xlu1 %v1800_v29, %s6770_s27  ;;  %v437_v29 = vrot.slane %v4519_v40, 4 }
 0x287   :  { %v5038_v41 = vpop.permute.xlu1 %1412  ;;  %v440_v54 = vsel %vm438_vm13, %v4519_v40, %v437_v29  ;;  %v468_v40 = vsel %vm466_vm14, %v4533_v17, %v465_v32  ;;  %v496_v17 = vsel %vm494_vm15, %v4551_v19, %v493_v26  ;;  %v524_v19 = vsel %vm522_vm0, %v4567_v15, %v521_v28 }
 0x288   :  { %v444_v4 = vadd.f32 %v440_v54, %v416_v12  ;;  %v577_v29 = vrot.slane %v6916_v51, 4  ;;  %v6917_v12 = vld [vmem:[#allocation45_spill] sm:$0xff]  ;;  %v6918_v54 = vld [vmem:[#allocation12_spill] sm:$0xff]  ;;  %vm886_vm13 = vcmask 801792   ;;  %vm6809_vm14 = vcmask 793600  }
 0x289   :  { %1806 = vrot.lane.b32.xlu1 %v1801_v9, %s6770_s27  ;;  %s6774_s27 = smov 63   ;;  %v520_v9 = vrot.slane %v4560_v42, 4  ;;  %v1938_v57 = vrot.slane %v6917_v12, %v4219_v25  ;;  %v632_v32 = vrot.slane %v6918_v54, 4  ;;  %vm6806_vm15 = vcmask 785408  }
 0x28a   :  { %v472_v39 = vadd.f32 %v468_v40, %v444_v4  ;;  %v6919_v4 = vld [vmem:[#allocation11_spill] sm:$0xff] }
 0x28b   :  { %v5048_v55 = vpop.permute.xlu1 %1414  ;;  %v523_v62 = vsel %vm522_vm0, %v4560_v42, %v520_v9  ;;  %v551_v42 = vsel %vm550_vm1, %v4575_v0, %v548_v16  ;;  %v6915_v0 = vld [vmem:[#allocation10_spill] sm:$0xff]  ;;  %v605_v18 = vrot.slane %v6919_v4, 4  ;;  %v1940_v9 = vmul.f32 %v4696_v13, %v1938_v57 }
 0x28c   :  { %v527_v31 = vadd.f32 %v523_v62, %v499_v43  ;;  %v500_v47 = vadd.f32 %v496_v17, %v472_v39  ;;  %v604_v23 = vrot.slane %v6915_v0, 4  ;;  %v635_v26 = vsel %vm634_vm4, %v6918_v54, %v632_v32  ;;  %v6926_v32 = vld [vmem:[#allocation20_spill] sm:$0xff] }
 0x28d   :  { %1832 = vrot.lane.b32.xlu1 %v1828_v6, %s6772_s28  ;;  %v1885_v6 = vmul.f32 %v4707_v14, %v1882_v3  ;;  %v580_v3 = vsel %vm578_vm2, %v6916_v51, %v577_v29  ;;  %v608_v16 = vsel %vm6790_vm3, %v6919_v4, %v605_v18  ;;  %v1941_v28 = vmul.f32 %v4707_v14, %v1938_v57  ;;  %v6925_v29 = vld [vmem:[#allocation17_spill] sm:$0xff]  ;;  %v6927_v18 = vld [vmem:[#allocation19_spill] sm:$0xff] }
 0x28e   :  { %v555_v59 = vadd.f32 %v551_v42, %v527_v31  ;;  %v528_v49 = vadd.f32 %v524_v19, %v500_v47  ;;  %v607_v50 = vsel %vm6790_vm3, %v6915_v0, %v604_v23  ;;  %v6921_v31 = vld [vmem:[#allocation13_spill] sm:$0xff]  ;;  %v6924_v23 = vld [vmem:[#allocation18_spill] sm:$0xff]  ;;  %v1994_v57 = vrot.slane %v4856_v2, %v4219_v25 }
 0x28f   :  { %v5060_v21 = vpop.permute.xlu1 %1440  ;;  %v633_v17 = vrot.slane %v6921_v31, 4  ;;  %vm6791_vm0 = vcmask 777216   ;;  %vm6793_vm2 = vcmask 760832   ;;  %vm6794_vm3 = vcmask 752640  }
 0x290   :  { %v583_v56 = vadd.f32 %v579_v52, %v555_v59  ;;  %v688_v59 = vrot.slane %v6922_v36, 4 }
 0x291   :  { %1834 = vrot.lane.b32.xlu1 %v1829_v37, %s6772_s28  ;;  %s6776_s28 = smov 62   ;;  %v549_v37 = vrot.slane %v6914_v30, 4 }
 0x292   :  { %v691_v0 = vsel %vm690_vm6, %v6922_v36, %v688_v59 }
 0x293   :  { %v5070_v1 = vpop.permute.xlu1 %1442  ;;  %v552_v15 = vsel %vm550_vm1, %v6914_v30, %v549_v37  ;;  %v636_v30 = vsel %vm634_vm4, %v6921_v31, %v633_v17  ;;  %v6923_v37 = vld [vmem:[#allocation15_spill] sm:$0xff]  ;;  %v6929_v17 = vld [vmem:[#allocation21_spill] sm:$0xff]  ;;  %vm6792_vm1 = vcmask 769024  }
 0x294   :  { %v556_v46 = vadd.f32 %v552_v15, %v528_v49 }
 0x295   :  { %1860 = vrot.lane.b32.xlu1 %v1856_v58, %s6774_s27  ;;  %v1913_v58 = vmul.f32 %v4707_v14, %v1910_v5 }
 0x296   :  { %v584_v43 = vadd.f32 %v580_v3, %v556_v46 }
 0x297   :  { %v5082_v20 = vpop.permute.xlu1 %1468 }
 0x298   :  { %v612_v5 = vadd.f32 %v608_v16, %v584_v43  ;;  %v1996_v43 = vmul.f32 %v4696_v13, %v1994_v57 }
 0x299   :  { %1862 = vrot.lane.b32.xlu1 %v1857_v44, %s6774_s27  ;;  %s6778_s27 = smov 61   ;;  %v611_v44 = vadd.f32 %v607_v50, %v583_v56  ;;  %v716_v56 = vrot.slane %v6924_v23, 4 }
 0x29b   :  { %v5092_v34 = vpop.permute.xlu1 %1470  ;;  %v639_v62 = vadd.f32 %v635_v26, %v611_v44  ;;  %v719_v54 = vsel %vm718_vm7, %v6924_v23, %v716_v56  ;;  %v744_v44 = vrot.slane %v6926_v32, 4 }
 0x29d   :  { %1888 = vrot.lane.b32.xlu1 %v1884_v27, %s6776_s28  ;;  %v6920_v27 = vld [vmem:[#allocation14_spill] sm:$0xff] }
 0x29e   :  { %v660_v39 = vrot.slane %v6920_v27, 4 }
 0x29f   :  { %v5104_v38 = vpop.permute.xlu1 %1496 }
 0x2a0   :  { %v663_v42 = vsel %vm662_vm5, %v6920_v27, %v660_v39  ;;  %v747_v27 = vsel %vm746_vm8, %v6926_v32, %v744_v44  ;;  %v6928_v39 = vld [vmem:[#allocation22_spill] sm:$0xff] }
 0x2a1   :  { %1890 = vrot.lane.b32.xlu1 %v1885_v6, %s6776_s28  ;;  %s6780_s28 = smov 60   ;;  %v1966_v6 = vrot.slane %v4847_v8, %v4219_v25  ;;  %v667_v19 = vadd.f32 %v663_v42, %v639_v62  ;;  %v640_v8 = vadd.f32 %v636_v30, %v612_v5  ;;  %v772_v62 = vrot.slane %v6928_v39, 4 }
 0x2a2   :  { %v2022_v5 = vrot.slane %v4866_v11, %v4219_v25 }
 0x2a3   :  { %v5114_v53 = vpop.permute.xlu1 %1498  ;;  %v1968_v49 = vmul.f32 %v4696_v13, %v1966_v6  ;;  %v695_v15 = vadd.f32 %v691_v0, %v667_v19  ;;  %v1969_v12 = vmul.f32 %v4707_v14, %v1966_v6  ;;  %v1997_v6 = vmul.f32 %v4707_v14, %v1994_v57  ;;  %v6930_v19 = vld [vmem:[#allocation24_spill] sm:$0xff] }
 0x2a4   :  { %v775_v59 = vsel %vm774_vm9, %v6928_v39, %v772_v62  ;;  %v800_v30 = vrot.slane %v6930_v19, 4  ;;  %v2024_v0 = vmul.f32 %v4696_v13, %v2022_v5 }
 0x2a5   :  { %1916 = vrot.lane.b32.xlu1 %v1912_v63, %s6778_s27  ;;  %v661_v63 = vrot.slane %v6923_v37, 4  ;;  %v723_v3 = vadd.f32 %v719_v54, %v695_v15  ;;  %v6932_v15 = vld [vmem:[#allocation26_spill] sm:$0xff]  ;;  %v6934_v54 = vld [vmem:[#allocation52_spill] sm:$0xff] }
 0x2a6   :  { %v803_v56 = vsel %vm802_vm10, %v6930_v19, %v800_v30  ;;  %v2050_v32 = vrot.slane %v6934_v54, %v4219_v25 }
 0x2a7   :  { %v5126_v35 = vpop.permute.xlu1 %1524  ;;  %v664_v51 = vsel %vm662_vm5, %v6923_v37, %v661_v63  ;;  %v751_v16 = vadd.f32 %v747_v27, %v723_v3  ;;  %v6936_v27 = vld [vmem:[#allocation27_spill] sm:$0xff] }
 0x2a8   :  { %v668_v46 = vadd.f32 %v664_v51, %v640_v8  ;;  %v828_v51 = vrot.slane %v6932_v15, 4  ;;  %v829_v39 = vrot.slane %v6936_v27, 4  ;;  %v2052_v62 = vmul.f32 %v4696_v13, %v2050_v32 }
 0x2a9   :  { %1918 = vrot.lane.b32.xlu1 %v1913_v58, %s6778_s27  ;;  %s6782_s27 = smov 59   ;;  %v689_v58 = vrot.slane %v6925_v29, 4  ;;  %v779_v37 = vadd.f32 %v775_v59, %v751_v16  ;;  %v6938_v59 = vld [vmem:[#allocation29_spill] sm:$0xff]  ;;  %v2053_v30 = vmul.f32 %v4707_v14, %v2050_v32  ;;  %v6942_v32 = vld [vmem:[#allocation34_spill] sm:$0xff] }
 0x2aa   :  { %v857_v19 = vrot.slane %v6938_v59, 4 }
 0x2ab   :  { %v5136_v40 = vpop.permute.xlu1 %1526  ;;  %v692_v4 = vsel %vm690_vm6, %v6925_v29, %v689_v58  ;;  %v807_v29 = vadd.f32 %v803_v56, %v779_v37  ;;  %v6939_v37 = vld [vmem:[#allocation54_spill] sm:$0xff] }
 0x2ac   :  { %v696_v2 = vadd.f32 %v692_v4, %v668_v46  ;;  %v2025_v46 = vmul.f32 %v4707_v14, %v2022_v5  ;;  %v831_v4 = vsel %vm830_vm11, %v6932_v15, %v828_v51  ;;  %v860_v51 = vsel %vm858_vm12, %v6938_v59, %v857_v19  ;;  %v3935_v59 = vld [vmem:[#allocation2] sm:$0xff] }
 0x2ad   :  { %1944 = vrot.lane.b32.xlu1 %v1940_v9, %s6780_s28  ;;  %v717_v9 = vrot.slane %v6927_v18, 4 }
 0x2af   :  { %v5148_v47 = vpop.permute.xlu1 %1552  ;;  %v720_v31 = vsel %vm718_vm7, %v6927_v18, %v717_v9  ;;  %v6935_v18 = vld [vmem:[#allocation28_spill] sm:$0xff] }
 0x2b0   :  { %v724_v42 = vadd.f32 %v720_v31, %v696_v2  ;;  %v856_v9 = vrot.slane %v6935_v18, 4 }
 0x2b1   :  { %1946 = vrot.lane.b32.xlu1 %v1941_v28, %s6780_s28  ;;  %s6784_s28 = smov 58   ;;  %v745_v28 = vrot.slane %v6929_v17, 4 }
 0x2b3   :  { %v5158_v52 = vpop.permute.xlu1 %1554  ;;  %v748_v63 = vsel %vm746_vm8, %v6929_v17, %v745_v28  ;;  %v859_v17 = vsel %vm858_vm12, %v6935_v18, %v856_v9  ;;  %v6937_v28 = vld [vmem:[#allocation30_spill] sm:$0xff]  ;;  %v6943_v9 = vld [vmem:[#allocation33_spill] sm:$0xff] }
 0x2b4   :  { %v752_v11 = vadd.f32 %v748_v63, %v724_v42  ;;  %v832_v42 = vsel %vm830_vm11, %v6936_v27, %v829_v39  ;;  %v2078_v63 = vrot.slane %v6939_v37, %v4219_v25 }
 0x2b5   :  { %1972 = vrot.lane.b32.xlu1 %v1968_v49, %s6782_s27  ;;  %v6931_v49 = vld [vmem:[#allocation23_spill] sm:$0xff] }
 0x2b6   :  { %v773_v8 = vrot.slane %v6931_v49, 4 }
 0x2b7   :  { %v5170_v50 = vpop.permute.xlu1 %1580 }
 0x2b8   :  { %v776_v58 = vsel %vm774_vm9, %v6931_v49, %v773_v8 }
 0x2b9   :  { %1974 = vrot.lane.b32.xlu1 %v1969_v12, %s6782_s27  ;;  %s6786_s27 = smov 57   ;;  %v6933_v12 = vld [vmem:[#allocation25_spill] sm:$0xff]  ;;  %v780_v44 = vadd.f32 %v776_v58, %v752_v11  ;;  %v6940_v11 = vld [vmem:[#allocation32_spill] sm:$0xff] }
 0x2ba   :  { %v801_v57 = vrot.slane %v6933_v12, 4  ;;  %v912_v56 = vrot.slane %v6940_v11, 4 }
 0x2bb   :  { %v5180_v26 = vpop.permute.xlu1 %1582 }
 0x2bc   :  { %v804_v2 = vsel %vm802_vm10, %v6933_v12, %v801_v57  ;;  %v2080_v12 = vmul.f32 %v4696_v13, %v2078_v63  ;;  %v915_v54 = vsel %vm6809_vm14, %v6940_v11, %v912_v56  ;;  %v2081_v13 = vmul.f32 %v4707_v14, %v2078_v63 }
 0x2bd   :  { %2000 = vrot.lane.b32.xlu1 %v1996_v43, %s6784_s28  ;;  %v835_v43 = vadd.f32 %v831_v4, %v807_v29  ;;  %v808_v16 = vadd.f32 %v804_v2, %v780_v44  ;;  %v6941_v29 = vld [vmem:[#allocation31_spill] sm:$0xff]  ;;  %v940_v44 = vrot.slane %v6942_v32, 4  ;;  %v6944_v2 = vld [vmem:[#allocation57_spill] sm:$0xff] }
 0x2be   :  { %v885_v58 = vrot.slane %v6941_v29, 4  ;;  %v2106_v27 = vrot.slane %v6944_v2, %v4219_v25 }
 0x2bf   :  { %v5192_v36 = vpop.permute.xlu1 %1608  ;;  %v863_v5 = vadd.f32 %v859_v17, %v835_v43  ;;  %v836_v49 = vadd.f32 %v832_v42, %v808_v16  ;;  %v913_v43 = vrot.slane %v6943_v9, 4  ;;  %v943_v16 = vsel %vm6806_vm15, %v6942_v32, %v940_v44  ;;  %v6945_v17 = vld [vmem:[#allocation36_spill] sm:$0xff]  ;;  %v6946_v42 = vld [vmem:[#allocation35_spill] sm:$0xff] }
 0x2c0   :  { %v888_v18 = vsel %vm886_vm13, %v6941_v29, %v885_v58  ;;  %v941_v14 = vrot.slane %v6946_v42, 4  ;;  %v2108_v19 = vmul.f32 %v3935_v59, %v2106_v27  ;;  %v3936_v29 = vld [vmem:[#allocation2 + $0x8] sm:$0xff]  ;;  %v6949_v32 = vld [vmem:[#allocation40_spill] sm:$0xff] }
 0x2c1   :  { %2002 = vrot.lane.b32.xlu1 %v1997_v6, %s6784_s28  ;;  %v884_v6 = vrot.slane %v6937_v28, 4  ;;  %s6788_s28 = smov 56   ;;  %v864_v57 = vadd.f32 %v860_v51, %v836_v49  ;;  %v6947_v49 = vld [vmem:[#allocation38_spill] sm:$0xff]  ;;  %v2109_v58 = vmul.f32 %v3936_v29, %v2106_v27  ;;  %v1024_v44 = vrot.slane %v6949_v32, 4  ;;  %v6955_v29 = vld [vmem:[#allocation47_spill] sm:$0xff] }
 0x2c2   :  { %v944_v56 = vsel %vm6806_vm15, %v6946_v42, %v941_v14  ;;  %vm6811_vm15 = vcmask 621568  }
 0x2c3   :  { %v5202_v23 = vpop.permute.xlu1 %1610  ;;  %v892_v39 = vadd.f32 %v888_v18, %v864_v57  ;;  %v1027_v27 = vsel %vm6793_vm2, %v6949_v32, %v1024_v44  ;;  %v6956_v32 = vld [vmem:[#allocation46_spill] sm:$0xff] }
 0x2c4   :  { %v1081_v44 = vrot.slane %v6956_v32, 4 }
 0x2c5   :  { %2028 = vrot.lane.b32.xlu1 %v2024_v0, %s6786_s27  ;;  %v887_v0 = vsel %vm886_vm13, %v6937_v28, %v884_v6  ;;  %v968_v28 = vrot.slane %v6945_v17, 4 }
 0x2c6   :  { %v891_v15 = vadd.f32 %v887_v0, %v863_v5  ;;  %v916_v5 = vsel %vm6809_vm14, %v6943_v9, %v913_v43  ;;  %v996_v0 = vrot.slane %v6947_v49, 4  ;;  %v6950_v9 = vld [vmem:[#allocation39_spill] sm:$0xff]  ;;  %vm6814_vm14 = vcmask 596992  }
 0x2c7   :  { %v5214_v3 = vpop.permute.xlu1 %1636  ;;  %v971_v63 = vsel %vm6791_vm0, %v6945_v17, %v968_v28  ;;  %v997_v43 = vrot.slane %v6950_v9, 4 }
 0x2c8   :  { %v919_v4 = vadd.f32 %v915_v54, %v891_v15  ;;  %v6948_v15 = vld [vmem:[#allocation37_spill] sm:$0xff]  ;;  %v999_v54 = vsel %vm6792_vm1, %v6947_v49, %v996_v0  ;;  %v6954_v0 = vld [vmem:[#allocation43_spill] sm:$0xff] }
 0x2c9   :  { %2030 = vrot.lane.b32.xlu1 %v2025_v46, %s6786_s27  ;;  %s6833_s27 = smov 55   ;;  %v969_v51 = vrot.slane %v6948_v15, 4  ;;  %v1000_v28 = vsel %vm6792_vm1, %v6950_v9, %v997_v43  ;;  %vm6796_vm1 = vcmask 736256   ;;  %v6957_v43 = vld [vmem:[#allocation49_spill] sm:$0xff] }
 0x2ca   :  { %v947_v6 = vadd.f32 %v943_v16, %v919_v4 }
 0x2cb   :  { %v5224_v31 = vpop.permute.xlu1 %1638  ;;  %v972_v18 = vsel %vm6791_vm0, %v6948_v15, %v969_v51  ;;  %vm6795_vm0 = vcmask 744448  }
 0x2cc   :  { %v975_v11 = vadd.f32 %v971_v63, %v947_v6  ;;  %v6952_v6 = vld [vmem:[#allocation41_spill] sm:$0xff] }
 0x2cd   :  { %2056 = vrot.lane.b32.xlu1 %v2052_v62, %s6788_s28 }
 0x2ce   :  { %v1003_v4 = vadd.f32 %v999_v54, %v975_v11  ;;  %v1053_v11 = vrot.slane %v6954_v0, 4 }
 0x2cf   :  { %v5236_v8 = vpop.permute.xlu1 %1664 }
 0x2d0   :  { %v1031_v17 = vadd.f32 %v1027_v27, %v1003_v4  ;;  %v1056_v54 = vsel %vm6794_vm3, %v6954_v0, %v1053_v11 }
 0x2d1   :  { %2058 = vrot.lane.b32.xlu1 %v2053_v30, %s6788_s28  ;;  %v920_v30 = vadd.f32 %v916_v5, %v892_v39  ;;  %s6831_s28 = smov 54   ;;  %v6951_v39 = vld [vmem:[#allocation42_spill] sm:$0xff]  ;;  %v1025_v5 = vrot.slane %v6952_v6, 4 }
 0x2d2   :  { %v1052_v16 = vrot.slane %v6951_v39, 4 }
 0x2d3   :  { %v5246_v46 = vpop.permute.xlu1 %1666  ;;  %v1028_v49 = vsel %vm6793_vm2, %v6952_v6, %v1025_v5  ;;  %vm6797_vm2 = vcmask 728064  }
 0x2d4   :  { %v1055_v59 = vsel %vm6794_vm3, %v6951_v39, %v1052_v16  ;;  %v1084_v39 = vsel %vm6795_vm0, %v6956_v32, %v1081_v44  ;;  %v6958_v16 = vld [vmem:[#allocation48_spill] sm:$0xff]  ;;  %vm6798_vm3 = vcmask 719872  }
 0x2d5   :  { %2084 = vrot.lane.b32.xlu1 %v2080_v12, %s6833_s27  ;;  %v948_v12 = vadd.f32 %v944_v56, %v920_v30  ;;  %v1059_v63 = vadd.f32 %v1055_v59, %v1031_v17  ;;  %v1109_v17 = vrot.slane %v6958_v16, 4 }
 0x2d7   :  { %v5258_v62 = vpop.permute.xlu1 %1692 }
 0x2d9   :  { %2086 = vrot.lane.b32.xlu1 %v2081_v13, %s6833_s27  ;;  %v976_v13 = vadd.f32 %v972_v18, %v948_v12  ;;  %s7080_s27 = smov 75  }
 0x2db   :  { %v5267_v37 = vpop.permute.xlu1 %1694  ;;  %v1004_v42 = vadd.f32 %v1000_v28, %v976_v13  ;;  %v1136_v13 = vrot.slane %v6957_v43, 4 }
 0x2dd   :  { %2112 = vrot.lane.b32.xlu1 %v2108_v19, %s6831_s28  ;;  %v6953_v19 = vld [vmem:[#allocation44_spill] sm:$0xff]  ;;  %v1032_v56 = vadd.f32 %v1028_v49, %v1004_v42  ;;  %v1139_v5 = vsel %vm6797_vm2, %v6957_v43, %v1136_v13  ;;  %v6959_v42 = vld [vmem:[#allocation51_spill] sm:$0xff]  ;;  %v6963_v43 = vld [vmem:[#allocation58_spill] sm:$0xff] }
 0x2de   :  { %v1080_v30 = vrot.slane %v6953_v19, 4  ;;  %v1164_v59 = vrot.slane %v6959_v42, 4  ;;  %v1220_v13 = vrot.slane %v6963_v43, 4 }
 0x2df   :  { %v5276_v57 = vpop.permute.xlu1 %1720  ;;  %v1060_v4 = vadd.f32 %v1056_v54, %v1032_v56  ;;  %v6962_v54 = vld [vmem:[#allocation53_spill] sm:$0xff] }
 0x2e0   :  { %v1083_v51 = vsel %vm6795_vm0, %v6953_v19, %v1080_v30  ;;  %v1112_v30 = vsel %vm6796_vm1, %v6958_v16, %v1109_v17  ;;  %v1167_v56 = vsel %vm6798_vm3, %v6959_v42, %v1164_v59  ;;  %vm6799_vm0 = vcmask 711680   ;;  %v6964_v16 = vld [vmem:[#allocation56_spill] sm:$0xff] }
 0x2e1   :  { %2114 = vrot.lane.b32.xlu1 %v2109_v58, %s6831_s28  ;;  %v1108_v58 = vrot.slane %v6955_v29, 4  ;;  %v1087_v12 = vadd.f32 %v1083_v51, %v1059_v63  ;;  %v1088_v28 = vadd.f32 %v1084_v39, %v1060_v4  ;;  %v6960_v63 = vld [vmem:[#allocation50_spill] sm:$0xff]  ;;  %v6961_v51 = vld [vmem:[#allocation55_spill] sm:$0xff]  ;;  %v1165_v32 = vrot.slane %v6962_v54, 4  ;;  %v6965_v59 = vld [vmem:[#allocation60_spill] sm:$0xff] }
 0x2e2   :  { %v1137_v49 = vrot.slane %v6960_v63, 4  ;;  %v1193_v17 = vrot.slane %v6964_v16, 4 }
 0x2e3   :  { %v5285_v2 = vpop.permute.xlu1 %1722  ;;  %v1111_v9 = vsel %vm6796_vm1, %v6955_v29, %v1108_v58  ;;  %v1116_v0 = vadd.f32 %v1112_v30, %v1088_v28  ;;  %v1192_v29 = vrot.slane %v6961_v51, 4  ;;  %vm6800_vm1 = vcmask 703488  }
 0x2e4   :  { %v1115_v27 = vadd.f32 %v1111_v9, %v1087_v12  ;;  %v1140_v12 = vsel %vm6797_vm2, %v6960_v63, %v1137_v49  ;;  %v1168_v39 = vsel %vm6798_vm3, %v6962_v54, %v1165_v32  ;;  %v1223_v42 = vsel %vm6800_vm1, %v6963_v43, %v1220_v13  ;;  %v6966_v49 = vld [vmem:[#allocation59_spill] sm:$0xff] }
 0x2e5   :  { %v1144_v44 = vadd.f32 %v1140_v12, %v1116_v0  ;;  %v1195_v9 = vsel %vm6799_vm0, %v6961_v51, %v1192_v29  ;;  %vm6801_vm2 = vcmask 695296   ;;  %v1196_v63 = vsel %vm6799_vm0, %v6964_v16, %v1193_v17 }
 0x2e6   :  { %v1143_v19 = vadd.f32 %v1139_v5, %v1115_v27  ;;  %v1221_v0 = vrot.slane %v6966_v49, 4  ;;  %vm6802_vm3 = vcmask 687104   ;;  %vm6803_vm0 = vcmask 678912  }
 0x2e7   :  { %v5293_v14 = vpop.permute.xlu1 %1748  ;;  %v1172_v28 = vadd.f32 %v1168_v39, %v1144_v44  ;;  %v6968_v44 = vld [vmem:[#allocation61_spill] sm:$0xff]  ;;  %v1304_v39 = vrot.slane %v4950_v45, 4 }
 0x2e8   :  { %v1171_v58 = vadd.f32 %v1167_v56, %v1143_v19  ;;  %v1248_v19 = vrot.slane %v6965_v59, 4  ;;  %v1224_v32 = vsel %vm6800_vm1, %v6966_v49, %v1221_v0  ;;  %vm6804_vm1 = vcmask 670720  }
 0x2e9   :  { %v1200_v56 = vadd.f32 %v1196_v63, %v1172_v28  ;;  %v1277_v28 = vrot.slane %v4938_v7, 4  ;;  %v1305_v0 = vrot.slane %v4960_v33, 4 }
 0x2ea   :  { %v1199_v27 = vadd.f32 %v1195_v9, %v1171_v58  ;;  %v1251_v29 = vsel %vm6801_vm2, %v6965_v59, %v1248_v19  ;;  %v6967_v58 = vld [vmem:[#allocation62_spill] sm:$0xff]  ;;  %v1249_v9 = vrot.slane %v6968_v44, 4  ;;  %v1307_v19 = vsel %vm6803_vm0, %v4950_v45, %v1304_v39 }
 0x2eb   :  { %v5301_v15 = vpop.permute.xlu1 %1750  ;;  %v1276_v12 = vrot.slane %v6967_v58, 4  ;;  %v1228_v43 = vadd.f32 %v1224_v32, %v1200_v56  ;;  %v1280_v49 = vsel %vm6802_vm3, %v4938_v7, %v1277_v28  ;;  %v1308_v45 = vsel %vm6803_vm0, %v4960_v33, %v1305_v0 }
 0x2ec   :  { %v1227_v30 = vadd.f32 %v1223_v42, %v1199_v27  ;;  %v1252_v17 = vsel %vm6801_vm2, %v6968_v44, %v1249_v9  ;;  %vm6805_vm2 = vcmask 662528   ;;  %v1333_v32 = vrot.slane %v4982_v22, 4 }
 0x2ed   :  { %v1279_v27 = vsel %vm6802_vm3, %v6967_v58, %v1276_v12  ;;  %v1256_v42 = vadd.f32 %v1252_v17, %v1228_v43  ;;  %v1360_v12 = vrot.slane %v4994_v48, 4  ;;  %v1388_v43 = vrot.slane %v5016_v24, 4 }
 0x2ee   :  { %v1255_v54 = vadd.f32 %v1251_v29, %v1227_v30  ;;  %v1332_v30 = vrot.slane %v4972_v60, 4  ;;  %vm6807_vm3 = vcmask 654336   ;;  %v1361_v39 = vrot.slane %v5004_v10, 4 }
 0x2ef   :  { %v5309_v18 = vpop.permute.xlu1 %1776  ;;  %v1284_v56 = vadd.f32 %v1280_v49, %v1256_v42  ;;  %v1363_v7 = vsel %vm6805_vm2, %v4994_v48, %v1360_v12  ;;  %v1391_v33 = vsel %vm6807_vm3, %v5016_v24, %v1388_v43  ;;  %v1416_v28 = vrot.slane %v5038_v41, 4 }
 0x2f0   :  { %v1283_v16 = vadd.f32 %v1279_v27, %v1255_v54  ;;  %v1335_v58 = vsel %vm6804_vm1, %v4972_v60, %v1332_v30  ;;  %v1336_v60 = vsel %vm6804_vm1, %v4982_v22, %v1333_v32  ;;  %vm6808_vm0 = vcmask 646144  }
 0x2f1   :  { %v1312_v44 = vadd.f32 %v1308_v45, %v1284_v56  ;;  %v1364_v48 = vsel %vm6805_vm2, %v5004_v10, %v1361_v39  ;;  %v1419_v22 = vsel %vm6808_vm0, %v5038_v41, %v1416_v28  ;;  %v1444_v49 = vrot.slane %v5060_v21, 4 }
 0x2f2   :  { %v1311_v63 = vadd.f32 %v1307_v19, %v1283_v16  ;;  %v1389_v19 = vrot.slane %v5026_v61, 4  ;;  %vm1446_vm1 = vcmask 637952   ;;  %v1417_v56 = vrot.slane %v5048_v55, 4 }
 0x2f3   :  { %v5317_v6 = vpop.permute.xlu1 %1778  ;;  %v1340_v16 = vadd.f32 %v1336_v60, %v1312_v44  ;;  %v1447_v10 = vsel %vm1446_vm1, %v5060_v21, %v1444_v49  ;;  %v1500_v45 = vrot.slane %v5104_v38, 4  ;;  %v1445_v32 = vrot.slane %v5070_v1, 4 }
 0x2f4   :  { %v1339_v54 = vadd.f32 %v1335_v58, %v1311_v63  ;;  %v1392_v24 = vsel %vm6807_vm3, %v5026_v61, %v1389_v19  ;;  %vm6810_vm2 = vcmask 629760   ;;  %v1420_v61 = vsel %vm6808_vm0, %v5048_v55, %v1417_v56 }
 0x2f5   :  { %v1368_v30 = vadd.f32 %v1364_v48, %v1340_v16  ;;  %v1473_v44 = vrot.slane %v5092_v34, 4  ;;  %vm6812_vm3 = vcmask 613376   ;;  %v1503_v60 = vsel %vm6811_vm15, %v5104_v38, %v1500_v45 }
 0x2f6   :  { %v1367_v27 = vadd.f32 %v1363_v7, %v1339_v54  ;;  %v1472_v54 = vrot.slane %v5082_v20, 4  ;;  %v1528_v7 = vrot.slane %v5126_v35, 4  ;;  %v1501_v39 = vrot.slane %v5114_v53, 4 }
 0x2f7   :  { %v5325_v11 = vpop.permute.xlu1 %1804  ;;  %v1396_v58 = vadd.f32 %v1392_v24, %v1368_v30  ;;  %v1556_v16 = vrot.slane %v5148_v47, 4  ;;  %v1448_v55 = vsel %vm1446_vm1, %v5070_v1, %v1445_v32  ;;  %vm6813_vm0 = vcmask 605184  }
 0x2f8   :  { %v1395_v42 = vadd.f32 %v1391_v33, %v1367_v27  ;;  %v1475_v21 = vsel %vm6810_vm2, %v5082_v20, %v1472_v54  ;;  %v1476_v28 = vsel %vm6810_vm2, %v5092_v34, %v1473_v44  ;;  %v1529_v20 = vrot.slane %v5136_v40, 4 }
 0x2f9   :  { %v1424_v43 = vadd.f32 %v1420_v61, %v1396_v58  ;;  %v1584_v48 = vrot.slane %v5170_v50, 4  ;;  %v1504_v1 = vsel %vm6811_vm15, %v5114_v53, %v1501_v39  ;;  %v1557_v34 = vrot.slane %v5158_v52, 4 }
 0x2fa   :  { %v1423_v0 = vadd.f32 %v1419_v22, %v1395_v42  ;;  %v1531_v42 = vsel %vm6812_vm3, %v5126_v35, %v1528_v7  ;;  %v1559_v22 = vsel %vm6813_vm0, %v5148_v47, %v1556_v16  ;;  %v1612_v49 = vrot.slane %v5192_v36, 4 }
 0x2fb   :  { %v5333_v4 = vpop.permute.xlu1 %1806  ;;  %v1452_v38 = vadd.f32 %v1448_v55, %v1424_v43  ;;  %vm6815_vm2 = vcmask 588800   ;;  %v1532_v24 = vsel %vm6812_vm3, %v5136_v40, %v1529_v20  ;;  %v1587_v56 = vsel %vm6814_vm14, %v5170_v50, %v1584_v48 }
 0x2fc   :  { %v1451_v41 = vadd.f32 %v1447_v10, %v1423_v0  ;;  %v1585_v58 = vrot.slane %v5180_v26, 4  ;;  %v1640_v53 = vrot.slane %v5214_v3, 4  ;;  %vm6816_vm15 = vcmask 580608  }
 0x2fd   :  { %v1480_v35 = vadd.f32 %v1476_v28, %v1452_v38  ;;  %v1560_v45 = vsel %vm6813_vm0, %v5158_v52, %v1557_v34  ;;  %v1613_v40 = vrot.slane %v5202_v23, 4  ;;  %v1668_v32 = vrot.slane %v5236_v8, 4 }
 0x2fe   :  { %v1479_v33 = vadd.f32 %v1475_v21, %v1451_v41  ;;  %v1615_v41 = vsel %vm6815_vm2, %v5192_v36, %v1612_v49  ;;  %vm6817_vm3 = vcmask 572416   ;;  %v1588_v44 = vsel %vm6814_vm14, %v5180_v26, %v1585_v58 }
 0x2ff   :  { %v5341_v5 = vpop.permute.xlu1 %1832  ;;  %v1508_v10 = vadd.f32 %v1504_v1, %v1480_v35  ;;  %v1643_v7 = vsel %vm6816_vm15, %v5214_v3, %v1640_v53  ;;  %v1641_v43 = vrot.slane %v5224_v31, 4  ;;  %v1696_v52 = vrot.slane %v5258_v62, 4 }
 0x300   :  { %v1507_v19 = vadd.f32 %v1503_v60, %v1479_v33  ;;  %vm6818_vm0 = vcmask 564224   ;;  %v1616_v39 = vsel %vm6815_vm2, %v5202_v23, %v1613_v40  ;;  %v1671_v16 = vsel %vm6817_vm3, %v5236_v8, %v1668_v32 }
 0x301   :  { %v1536_v50 = vadd.f32 %v1532_v24, %v1508_v10  ;;  %v1669_v26 = vrot.slane %v5246_v46, 4  ;;  %v1724_v55 = vrot.slane %v5276_v57, 4  ;;  %vm6819_vm14 = vcmask 556032  }
 0x302   :  { %v1535_v0 = vadd.f32 %v1531_v42, %v1507_v19  ;;  %v1644_v28 = vsel %vm6816_vm15, %v5224_v31, %v1641_v43  ;;  %v1699_v42 = vsel %vm6818_vm0, %v5258_v62, %v1696_v52  ;;  %v1697_v20 = vrot.slane %v5267_v37, 4 }
 0x303   :  { %v5349_v51 = vpop.permute.xlu1 %1834  ;;  %v1564_v21 = vadd.f32 %v1560_v45, %v1536_v50  ;;  %v1752_v23 = vrot.slane %v5293_v14, 4  ;;  %vm6820_vm2 = vcmask 547840   ;;  %v1672_v19 = vsel %vm6817_vm3, %v5246_v46, %v1669_v26 }
 0x304   :  { %v1563_v54 = vadd.f32 %v1559_v22, %v1535_v0  ;;  %v1727_v1 = vsel %vm6819_vm14, %v5276_v57, %v1724_v55  ;;  %v1725_v31 = vrot.slane %v5285_v2, 4  ;;  %v1780_v22 = vrot.slane %v5309_v18, 4 }
 0x305   :  { %v1592_v3 = vadd.f32 %v1588_v44, %v1564_v21  ;;  %vm6821_vm15 = vcmask 539648   ;;  %v1700_v49 = vsel %vm6818_vm0, %v5267_v37, %v1697_v20  ;;  %v1755_v35 = vsel %vm6820_vm2, %v5293_v14, %v1752_v23 }
 0x306   :  { %v1591_v61 = vadd.f32 %v1587_v56, %v1563_v54  ;;  %v1753_v0 = vrot.slane %v5301_v15, 4  ;;  %v1808_v46 = vrot.slane %v5325_v11, 4  ;;  %vm6822_vm3 = vcmask 531456  }
 0x307   :  { %v5357_v13 = vpop.permute.xlu1 %1860  ;;  %v1620_v48 = vadd.f32 %v1616_v39, %v1592_v3  ;;  %v1728_v58 = vsel %vm6819_vm14, %v5285_v2, %v1725_v31  ;;  %v1783_v53 = vsel %vm6821_vm15, %v5309_v18, %v1780_v22  ;;  %v1781_v37 = vrot.slane %v5317_v6, 4 }
 0x308   :  { %v1619_v60 = vadd.f32 %v1615_v41, %v1591_v61  ;;  %v1836_v10 = vrot.slane %v5341_v5, 4  ;;  %vm6823_vm0 = vcmask 523264   ;;  %v1756_v45 = vsel %vm6820_vm2, %v5301_v15, %v1753_v0 }
 0x309   :  { %v1648_v62 = vadd.f32 %v1644_v28, %v1620_v48  ;;  %v1811_v41 = vsel %vm6822_vm3, %v5325_v11, %v1808_v46  ;;  %v1809_v40 = vrot.slane %v5333_v4, 4  ;;  %v1864_v2 = vrot.slane %v5357_v13, 4 }
 0x30a   :  { %v1647_v33 = vadd.f32 %v1643_v7, %v1619_v60  ;;  %vm6824_vm14 = vcmask 515072   ;;  %v1784_v61 = vsel %vm6821_vm15, %v5317_v6, %v1781_v37  ;;  %v1839_v44 = vsel %vm6823_vm0, %v5341_v5, %v1836_v10 }
 0x30b   :  { %v5365_v59 = vpop.permute.xlu1 %1862  ;;  %v1676_v24 = vadd.f32 %v1672_v19, %v1648_v62  ;;  %v1837_v15 = vrot.slane %v5349_v51, 4  ;;  %vm6825_vm2 = vcmask 506880   ;;  %v1812_v52 = vsel %vm6822_vm3, %v5333_v4, %v1809_v40 }
 0x30c   :  { %v1675_v38 = vadd.f32 %v1671_v16, %v1647_v33  ;;  %v1867_v21 = vsel %vm6824_vm14, %v5357_v13, %v1864_v2  ;;  %v1865_v60 = vrot.slane %v5365_v59, 4  ;;  %vm6826_vm15 = vcmask 498688  }
 0x30d   :  { %v1704_v14 = vadd.f32 %v1700_v49, %v1676_v24  ;;  %v1840_v26 = vsel %vm6823_vm0, %v5349_v51, %v1837_v15  ;;  %vm6827_vm3 = vcmask 490496   ;;  %vm6828_vm0 = vcmask 482304  }
 0x30e   :  { %v1703_v34 = vadd.f32 %v1699_v42, %v1675_v38  ;;  %v1868_v28 = vsel %vm6824_vm14, %v5365_v59, %v1865_v60  ;;  %vm6830_vm14 = vcmask 474112  }
 0x30f   :  { %v5373_v29 = vpop.permute.xlu1 %1888  ;;  %v1732_v32 = vadd.f32 %v1728_v58, %v1704_v14 }
 0x310   :  { %v1731_v56 = vadd.f32 %v1727_v1, %v1703_v34  ;;  %v1892_v7 = vrot.slane %v5373_v29, 4 }
 0x311   :  { %v1760_v11 = vadd.f32 %v1756_v45, %v1732_v32 }
 0x312   :  { %v1759_v54 = vadd.f32 %v1755_v35, %v1731_v56  ;;  %v1895_v55 = vsel %vm6825_vm2, %v5373_v29, %v1892_v7 }
 0x313   :  { %v5381_v9 = vpop.permute.xlu1 %1890  ;;  %v1788_v39 = vadd.f32 %v1784_v61, %v1760_v11 }
 0x314   :  { %v1787_v50 = vadd.f32 %v1783_v53, %v1759_v54  ;;  %v1893_v3 = vrot.slane %v5381_v9, 4 }
 0x315   :  { %v1816_v33 = vadd.f32 %v1812_v52, %v1788_v39 }
 0x316   :  { %v1815_v43 = vadd.f32 %v1811_v41, %v1787_v50  ;;  %v1896_v38 = vsel %vm6825_vm2, %v5381_v9, %v1893_v3  ;;  %vm6829_vm2 = vcmask 465920  }
 0x317   :  { %v5389_v17 = vpop.permute.xlu1 %1916  ;;  %v1844_v23 = vadd.f32 %v1840_v26, %v1816_v33 }
 0x318   :  { %v1920_v6 = vrot.slane %v5389_v17, 4  ;;  %v1843_v16 = vadd.f32 %v1839_v44, %v1815_v43 }
 0x319   :  { %v1872_v31 = vadd.f32 %v1868_v28, %v1844_v23  ;;  %v6969_v23 = vmov 4  }
 0x31a   :  { %v1871_v13 = vadd.f32 %v1867_v21, %v1843_v16  ;;  %v1923_v42 = vsel %vm6826_vm15, %v5389_v17, %v1920_v6 }
 0x31b   :  { %v5397_v63 = vpop.permute.xlu1 %1918  ;;  %v1900_v49 = vadd.f32 %v1896_v38, %v1872_v31  ;;  %v6972_v38 = vmov 7   ;;  %v6976_v31 = vmov 11  }
 0x31c   :  { %v1921_v20 = vrot.slane %v5397_v63, 4  ;;  %v1899_v48 = vadd.f32 %v1895_v55, %v1871_v13 }
 0x31e   :  { %v1927_v17 = vadd.f32 %v1923_v42, %v1899_v48  ;;  %v1924_v22 = vsel %vm6826_vm15, %v5397_v63, %v1921_v20  ;;  %vm2062_vm15 = vcmask 457728   ;;  %v6970_v48 = vmov 5  }
 0x31f   :  { %v5405_v12 = vpop.permute.xlu1 %1944  ;;  %v1928_v56 = vadd.f32 %v1924_v22, %v1900_v49  ;;  %v6978_v22 = vmov 13  }
 0x320   :  { %v1948_v4 = vrot.slane %v5405_v12, 4 }
 0x322   :  { %v1951_v19 = vsel %vm6827_vm3, %v5405_v12, %v1948_v4 }
 0x323   :  { %v5416_v27 = vpop.permute.xlu1 %1946  ;;  %v1955_v35 = vadd.f32 %v1951_v19, %v1927_v17  ;;  %v6973_v19 = vmov 8   ;;  %v6977_v17 = vmov 12  }
 0x324   :  { %v1949_v1 = vrot.slane %v5416_v27, 4 }
 0x326   :  { %v1952_v0 = vsel %vm6827_vm3, %v5416_v27, %v1949_v1  ;;  %vm2090_vm3 = vcmask 449536   ;;  %v6974_v1 = vmov 9  }
 0x327   :  { %v5432_v30 = vpop.permute.xlu1 %1972  ;;  %v1956_v14 = vadd.f32 %v1952_v0, %v1928_v56 }
 0x328   :  { %v1976_v51 = vrot.slane %v5432_v30, 4 }
 0x32a   :  { %v1979_v62 = vsel %vm6828_vm0, %v5432_v30, %v1976_v51  ;;  %v5567_v51 = vld [vmem:[%s6570_s2] sm:$0xf] }
 0x32b   :  { %v5446_v47 = vpop.permute.xlu1 %1974  ;;  %v1983_v58 = vadd.f32 %v1979_v62, %v1955_v35 }
 0x32c   :  { %v1977_v34 = vrot.slane %v5446_v47, 4 }
 0x32e   :  { %v1980_v30 = vsel %vm6828_vm0, %v5446_v47, %v1977_v34  ;;  %vm2118_vm0 = vcmask 441344  }
 0x32f   :  { %v5460_v36 = vpop.permute.xlu1 %2000  ;;  %v1984_v40 = vadd.f32 %v1980_v30, %v1956_v14  ;;  %v6979_v14 = vmov 2  }
 0x330   :  { %v2004_v59 = vrot.slane %v5460_v36, 4 }
 0x332   :  { %v2007_v46 = vsel %vm6830_vm14, %v5460_v36, %v2004_v59  ;;  %v6975_v59 = vmov 10  }
 0x333   :  { %v5474_v8 = vpop.permute.xlu1 %2002  ;;  %v2011_v27 = vadd.f32 %v2007_v46, %v1983_v58 }
 0x334   :  { %v2005_v24 = vrot.slane %v5474_v8, 4 }
 0x336   :  { %v2008_v36 = vsel %vm6830_vm14, %v5474_v8, %v2005_v24  ;;  %vm2133_vm14 = vcmask 437248  }
 0x337   :  { %v5488_v57 = vpop.permute.xlu1 %2028  ;;  %v2012_v50 = vadd.f32 %v2008_v36, %v1984_v40 }
 0x338   :  { %v2032_v9 = vrot.slane %v5488_v57, 4 }
 0x33a   :  { %v2035_v53 = vsel %vm6829_vm2, %v5488_v57, %v2032_v9 }
 0x33b   :  { %v5502_v18 = vpop.permute.xlu1 %2030  ;;  %v2039_v2 = vadd.f32 %v2035_v53, %v2011_v27  ;;  %v6980_v27 = vmov 3  }
 0x33c   :  { %v2033_v37 = vrot.slane %v5502_v18, 4 }
 0x33e   :  { %v2036_v47 = vsel %vm6829_vm2, %v5502_v18, %v2033_v37  ;;  %vm2131_vm2 = vcmask 1043456  }
 0x33f   :  { %v2057_v5 = vpop.permute.xlu1 %2056  ;;  %v2040_v11 = vadd.f32 %v2036_v47, %v2012_v50 }
 0x340   :  { %v2060_v63 = vrot.slane %v2057_v5, 4 }
 0x342   :  { %v2063_v45 = vsel %vm2062_vm15, %v2057_v5, %v2060_v63 }
 0x343   :  { %v2059_v29 = vpop.permute.xlu1 %2058  ;;  %v2067_v61 = vadd.f32 %v2063_v45, %v2039_v2 }
 0x344   :  { %v2061_v41 = vrot.slane %v2059_v29, 4 }
 0x346   :  { %v2064_v15 = vsel %vm2062_vm15, %v2059_v29, %v2061_v41  ;;  %v6971_v29 = vmov 6  }
 0x347   :  { %v2085_v12 = vpop.permute.xlu1 %2084  ;;  %v2068_v21 = vadd.f32 %v2064_v15, %v2040_v11 }
 0x348   :  { %v2088_v10 = vrot.slane %v2085_v12, 4 }
 0x34a   :  { %v2091_v57 = vsel %vm2090_vm3, %v2085_v12, %v2088_v10 }
 0x34b   :  { %v2087_v54 = vpop.permute.xlu1 %2086  ;;  %v2095_v8 = vadd.f32 %v2091_v57, %v2067_v61 }
 0x34c   :  { %v2089_v32 = vrot.slane %v2087_v54, 4 }
 0x34e   :  { %v2092_v43 = vsel %vm2090_vm3, %v2087_v54, %v2089_v32  ;;  %v6981_v54 = vmov 54  }
 0x34f   :  { %v2113_v44 = vpop.permute.xlu1 %2112  ;;  %v2096_v39 = vadd.f32 %v2092_v43, %v2068_v21 }
 0x350   :  { %v2116_v7 = vrot.slane %v2113_v44, 4 }
 0x352   :  { %v2119_v52 = vsel %vm2118_vm0, %v2113_v44, %v2116_v7 }
 0x353   :  { %v2123_v60 = vadd.f32 %v2119_v52, %v2095_v8  ;;  %v2115_v6 = vpop.permute.xlu1 %2114  ;;  %v6982_v52 = vmov 14  }
 0x354   :  { %v2117_v18 = vrot.slane %v2115_v6, 4 }
 0x355   :  { %v2127_v16 = vcombine.high %v2123_v60, %v2123_v60  ;;  %v2132_v55 = vsel %vm2131_vm2, %v2123_v60, 0.0 }
 0x356   :  { %v2120_v5 = vsel %vm2118_vm0, %v2115_v6, %v2117_v18  ;;  %v6983_v6 = vmov 15  }
 0x357   :  { %v2124_v26 = vadd.f32 %v2120_v5, %v2096_v39  ;;  %v2134_v3 = vsel %vm2133_vm14, %v2127_v16, 0.0  ;;  %v6984_v16 = vmov 16  }
 0x358   :  { %v2135_v4 = vadd.f32 %v2134_v3, %v2132_v55  ;;  %v6985_v55 = vmov 17  }
 0x359   :  { %v2128_v33 = vcombine.high %v2124_v26, %v2124_v26  ;;  %v2136_v13 = vsel %vm2131_vm2, %v2124_v26, 0.0 }
 0x35a   :  { %v2137_v28 = vadd.f32 %v2136_v13, %v2135_v4 }
 0x35b   :  { %v2138_v42 = vsel %vm2133_vm14, %v2128_v33, 0.0  ;;  %v6986_v33 = vmov 18  }
 0x35c   :  { %v2139_v20 = vadd.f32 %v2138_v42, %v2137_v28  ;;  %v6987_v42 = vmov 19  }
 0x35e   :  { %2140 = vadd.xlane.f32.xlu0 %v2139_v20 }
 0x374   :  { %2190 = vperm.xlu0 %3854, %v5567_v51  }
 0x378   :  { %3858 = vset.pattern.permute.xlu0 %v6969_v23  ;;  %v6988_v23 = vmov 20  }
 0x379   :  { %2246 = vperm.xlu0 %3858, %v5567_v51  }
 0x37d   :  { %3859 = vset.pattern.permute.xlu0 %v6970_v48 }
 0x37e   :  { %2262 = vperm.xlu0 %3859, %v5567_v51  }
 0x382   :  { %3860 = vset.pattern.permute.xlu0 %v6971_v29 }
 0x383   :  { %2278 = vperm.xlu0 %3860, %v5567_v51  }
 0x387   :  { %3861 = vset.pattern.permute.xlu0 %v6972_v38  ;;  %v6989_v38 = vmov 21  }
 0x388   :  { %2294 = vperm.xlu0 %3861, %v5567_v51  }
 0x38c   :  { %3862 = vset.pattern.permute.xlu0 %v6973_v19 }
 0x38d   :  { %2310 = vperm.xlu0 %3862, %v5567_v51  }
 0x391   :  { %3863 = vset.pattern.permute.xlu0 %v6974_v1 }
 0x392   :  { %2326 = vperm.xlu0 %3863, %v5567_v51  }
 0x396   :  { %3864 = vset.pattern.permute.xlu0 %v6975_v59 }
 0x397   :  { %2342 = vperm.xlu0 %3864, %v5567_v51  }
 0x39b   :  { %3865 = vset.pattern.permute.xlu0 %v6976_v31  ;;  %v6990_v31 = vmov 22  }
 0x39c   :  { %2358 = vperm.xlu0 %3865, %v5567_v51  }
 0x3a0   :  { %3866 = vset.pattern.permute.xlu0 %v6977_v17 }
 0x3a1   :  { %2374 = vperm.xlu0 %3866, %v5567_v51  }
 0x3a5   :  { %3867 = vset.pattern.permute.xlu0 %v6978_v22  ;;  %v6991_v22 = vmov 23  }
 0x3eb   :  { %v2141_v62 = vpop.xlane.xlu0 %2140 }
 0x3ec   :  { %v2143_v34 = vmul.f32 0.0027472528, %v2141_v62 }
 0x3ee   :  { %v2151_v9 = vrot.slane %v2143_v34, %v4219_v25 }
 0x3f0   :  { %v2153_v49 = vsub.f32 %v2123_v60, %v2151_v9  ;;  %v2154_v35 = vsub.f32 %v2124_v26, %v2151_v9  ;;  %v6992_v9 = vmov 24  }
 0x3f2   :  { %v2155_v12 = vmul.f32 %v2153_v49, %v2153_v49  ;;  %v2156_v0 = vmul.f32 %v2154_v35, %v2154_v35 }
 0x3f3   :  { %v5618_v21 = vpop.permute.xlu0 %2190 }
 0x3f4   :  { %v2159_v46 = vcombine.high %v2155_v12, %v2155_v12  ;;  %v2160_v24 = vcombine.high %v2156_v0, %v2156_v0  ;;  %v2163_v63 = vsel %vm2131_vm2, %v2155_v12, 0.0  ;;  %v2166_v30 = vsel %vm2131_vm2, %v2156_v0, 0.0 }
 0x3f5   :  { %v6993_v12 = vmov 25  }
 0x3f6   :  { %v2164_v56 = vsel %vm2133_vm14, %v2159_v46, 0.0  ;;  %v2168_v37 = vsel %vm2133_vm14, %v2160_v24, 0.0  ;;  %v6994_v24 = vmov 26   ;;  %vm7125_vm14 = vcmask 752640  }
 0x3f7   :  { %v2165_v58 = vadd.f32 %v2164_v56, %v2163_v63  ;;  %vm7126_vm2 = vmmov %vm7125_vm14 }
 0x3f8   :  { %v2247_v18 = vpop.permute.xlu0 %2246 }
 0x3f9   :  { %v2167_v53 = vadd.f32 %v2166_v30, %v2165_v58  ;;  %v6995_v58 = vmov 27  }
 0x3fb   :  { %v2169_v10 = vadd.f32 %v2168_v37, %v2167_v53  ;;  %v6996_v37 = vmov 28  }
 0x3fd   :  { %2170 = vadd.xlane.f32.xlu1 %v2169_v10  ;;  %v2263_v26 = vpop.permute.xlu0 %2262 }
 0x402   :  { %v2279_v13 = vpop.permute.xlu0 %2278 }
 0x407   :  { %v2295_v48 = vpop.permute.xlu0 %2294 }
 0x40c   :  { %v2311_v1 = vpop.permute.xlu0 %2310 }
 0x40e   :  { %2198 = vperm.xlu1 %3855, %v5567_v51  }
 0x411   :  { %v2327_v62 = vpop.permute.xlu0 %2326 }
 0x412   :  { %3856 = vset.pattern.permute.xlu1 %v6979_v14  ;;  %v6997_v14 = vmov 29  }
 0x413   :  { %2214 = vperm.xlu1 %3856, %v5567_v51  }
 0x417   :  { %3857 = vset.pattern.permute.xlu1 %v6980_v27 }
 0x418   :  { %2230 = vperm.xlu1 %3857, %v5567_v51  }
 0x41c   :  { %3908 = vset.pattern.permute.xlu1 %v6981_v54  ;;  %v6998_v54 = vmov 30  }
 0x48a   :  { %v2171_v36 = vpop.xlane.xlu1 %2170 }
 0x48b   :  { %v2172_v45 = vmul.f32 0.0027472528, %v2171_v36  ;;  %v6999_v36 = vmov 31  }
 0x48d   :  { %v2173_v41 = vadd.f32 1e-05, %v2172_v45  ;;  %v7000_v45 = vmov 32  }
 0x48e   :  { %v2199_v40 = vpop.permute.xlu1 %2198 }
 0x48f   :  { %3930 = vrsqrt.f32 %v2173_v41  ;;  %v7001_v41 = vmov 33  }
 0x492   :  { %v2215_v32 = vpop.permute.xlu1 %2214 }
 0x497   :  { %v2231_v44 = vpop.permute.xlu1 %2230 }
 0x499   :  { %v3931_v2 = vpop.eup %3930 }
 0x49a   :  { %v2182_v47 = vrot.slane %v3931_v2, %v4219_v25 }
 0x49c   :  { %v2184_v57 = vmul.f32 %v2182_v47, %v2153_v49  ;;  %v2185_v50 = vmul.f32 %v2182_v47, %v2154_v35  ;;  %v2343_v35 = vpop.permute.xlu0 %2342  ;;  %v7003_v47 = vmov 35  }
 0x49e   :  { %v5601_v61 = vand.u32 2147483647, %v2184_v57  ;;  %v5603_v15 = vand.u32 2147483647, %v2185_v50  ;;  %v7004_v57 = vmov 36   ;;  %v7005_v50 = vmov 37  }
 0x4a0   :  { %v2201_v7 = vmul.f32 %v2199_v40, %v5601_v61  ;;  %v2233_v11 = vmul.f32 %v2231_v44, %v5601_v61  ;;  %v2202_v8 = vmul.f32 %v2199_v40, %v5603_v15  ;;  %v2217_v25 = vmul.f32 %v2215_v32, %v5601_v61  ;;  %v2359_v63 = vpop.permute.xlu0 %2358 }
 0x4a1   :  { %v2218_v43 = vmul.f32 %v2215_v32, %v5603_v15  ;;  %v2234_v60 = vmul.f32 %v2231_v44, %v5603_v15  ;;  %v2249_v39 = vmul.f32 %v2247_v18, %v5601_v61  ;;  %v2250_v5 = vmul.f32 %v2247_v18, %v5603_v15 }
 0x4a2   :  { %2205 = vrot.lane.b32.xlu1 %v2201_v7, %s4010_s5  ;;  %2237 = vrot.lane.b32.xlu0 %v2233_v11, %s4012_s6  ;;  %v2265_v3 = vmul.f32 %v2263_v26, %v5601_v61  ;;  %v2266_v4 = vmul.f32 %v2263_v26, %v5603_v15  ;;  %v2281_v28 = vmul.f32 %v2279_v13, %v5601_v61  ;;  %v7002_v40 = vmov 34  }
 0x4a3   :  { %v2282_v20 = vmul.f32 %v2279_v13, %v5603_v15  ;;  %v2297_v29 = vmul.f32 %v2295_v48, %v5601_v61  ;;  %v2298_v19 = vmul.f32 %v2295_v48, %v5603_v15  ;;  %v2313_v59 = vmul.f32 %v2311_v1, %v5601_v61 }
 0x4a4   :  { %v2314_v17 = vmul.f32 %v2311_v1, %v5603_v15  ;;  %v2329_v34 = vmul.f32 %v2327_v62, %v5601_v61  ;;  %v2330_v49 = vmul.f32 %v2327_v62, %v5603_v15  ;;  %v2345_v0 = vmul.f32 %v2343_v35, %v5601_v61  ;;  %v2375_v53 = vpop.permute.xlu0 %2374 }
 0x4a5   :  { %v2346_v46 = vmul.f32 %v2343_v35, %v5603_v15  ;;  %v2361_v56 = vmul.f32 %v2359_v63, %v5601_v61  ;;  %v2362_v30 = vmul.f32 %v2359_v63, %v5603_v15  ;;  %v2377_v10 = vmul.f32 %v2375_v53, %v5601_v61 }
 0x4a6   :  { %2207 = vrot.lane.b32.xlu1 %v2202_v8, %s4010_s5  ;;  %2390 = vperm.xlu0 %3867, %v5567_v51   ;;  %v2378_v27 = vmul.f32 %v2375_v53, %v5603_v15  ;;  %v7006_v11 = vmov 38   ;;  %v7009_v26 = vmov 41   ;;  %v7010_v13 = vmov 42   ;;  %s7028_s5 = smov 103  }
 0x4a7   :  { %v7014_v62 = vmov 46   ;;  %v7015_v35 = vmov 47  }
 0x4aa   :  { %2221 = vrot.lane.b32.xlu1 %v2217_v25, %s4009_s0  ;;  %3868 = vset.pattern.permute.xlu0 %v6982_v52  ;;  %v7007_v52 = vmov 39  }
 0x4ab   :  { %2406 = vperm.xlu0 %3868, %v5567_v51  }
 0x4ae   :  { %2223 = vrot.lane.b32.xlu1 %v2218_v43, %s4009_s0  ;;  %s7025_s0 = smov 104  }
 0x4af   :  { %3869 = vset.pattern.permute.xlu0 %v6983_v6 }
 0x4b0   :  { %2422 = vperm.xlu0 %3869, %v5567_v51  }
 0x4b2   :  { %2239 = vrot.lane.b32.xlu1 %v2234_v60, %s4012_s6  ;;  %s7031_s6 = smov 102  }
 0x4b4   :  { %3870 = vset.pattern.permute.xlu0 %v6984_v16 }
 0x4b5   :  { %2438 = vperm.xlu0 %3870, %v5567_v51  }
 0x4b6   :  { %2253 = vrot.lane.b32.xlu1 %v2249_v39, %s4015_s7  ;;  %v7008_v39 = vmov 40  }
 0x4b9   :  { %3871 = vset.pattern.permute.xlu0 %v6985_v55 }
 0x4ba   :  { %2255 = vrot.lane.b32.xlu1 %v2250_v5, %s4015_s7  ;;  %2454 = vperm.xlu0 %3871, %v5567_v51   ;;  %s7033_s7 = smov 101  }
 0x4be   :  { %2269 = vrot.lane.b32.xlu1 %v2265_v3, %s4018_s8  ;;  %3872 = vset.pattern.permute.xlu0 %v6986_v33 }
 0x4bf   :  { %2470 = vperm.xlu0 %3872, %v5567_v51  }
 0x4c2   :  { %2271 = vrot.lane.b32.xlu1 %v2266_v4, %s4018_s8  ;;  %s7034_s8 = smov 100  }
 0x4c3   :  { %3873 = vset.pattern.permute.xlu0 %v6987_v42 }
 0x4c4   :  { %2486 = vperm.xlu0 %3873, %v5567_v51  }
 0x4c6   :  { %2285 = vrot.lane.b32.xlu1 %v2281_v28, %s4020_s9 }
 0x4c8   :  { %3874 = vset.pattern.permute.xlu0 %v6988_v23 }
 0x4c9   :  { %2502 = vperm.xlu0 %3874, %v5567_v51  }
 0x4ca   :  { %2287 = vrot.lane.b32.xlu1 %v2282_v20, %s4020_s9  ;;  %v7011_v20 = vmov 43   ;;  %s7035_s9 = smov 99  }
 0x4cd   :  { %3875 = vset.pattern.permute.xlu0 %v6989_v38 }
 0x4ce   :  { %2301 = vrot.lane.b32.xlu1 %v2297_v29, %s4023_s10  ;;  %2518 = vperm.xlu0 %3875, %v5567_v51   ;;  %v7012_v29 = vmov 44  }
 0x4d2   :  { %2303 = vrot.lane.b32.xlu1 %v2298_v19, %s4023_s10  ;;  %3876 = vset.pattern.permute.xlu0 %v6990_v31  ;;  %s7036_s10 = smov 98  }
 0x4d3   :  { %2538 = vperm.xlu0 %3876, %v5567_v51  }
 0x4d6   :  { %2317 = vrot.lane.b32.xlu1 %v2313_v59, %s4025_s11  ;;  %v7013_v59 = vmov 45  }
 0x4d7   :  { %3877 = vset.pattern.permute.xlu0 %v6991_v22 }
 0x4d8   :  { %2558 = vperm.xlu0 %3877, %v5567_v51  }
 0x4da   :  { %2319 = vrot.lane.b32.xlu1 %v2314_v17, %s4025_s11  ;;  %s7037_s11 = smov 97  }
 0x4dc   :  { %3878 = vset.pattern.permute.xlu0 %v6992_v9 }
 0x4dd   :  { %2578 = vperm.xlu0 %3878, %v5567_v51  }
 0x4de   :  { %2333 = vrot.lane.b32.xlu1 %v2329_v34, %s4028_s12 }
 0x4e1   :  { %3879 = vset.pattern.permute.xlu0 %v6993_v12 }
 0x4e2   :  { %2335 = vrot.lane.b32.xlu1 %v2330_v49, %s4028_s12  ;;  %2598 = vperm.xlu0 %3879, %v5567_v51   ;;  %s7038_s12 = smov 96  }
 0x4e6   :  { %2349 = vrot.lane.b32.xlu1 %v2345_v0, %s4031_s13  ;;  %3880 = vset.pattern.permute.xlu0 %v6994_v24  ;;  %v7016_v24 = vmov 48  }
 0x4e7   :  { %2618 = vperm.xlu0 %3880, %v5567_v51  }
 0x4ea   :  { %2351 = vrot.lane.b32.xlu1 %v2346_v46, %s4031_s13  ;;  %s7039_s13 = smov 95  }
 0x4eb   :  { %3881 = vset.pattern.permute.xlu0 %v6995_v58 }
 0x4ec   :  { %2638 = vperm.xlu0 %3881, %v5567_v51  }
 0x4ee   :  { %2365 = vrot.lane.b32.xlu1 %v2361_v56, %s4033_s14  ;;  %v7017_v56 = vmov 49  }
 0x4f0   :  { %3882 = vset.pattern.permute.xlu0 %v6996_v37 }
 0x4f1   :  { %2658 = vperm.xlu0 %3882, %v5567_v51  }
 0x4f2   :  { %2367 = vrot.lane.b32.xlu1 %v2362_v30, %s4033_s14  ;;  %s7040_s14 = smov 91  }
 0x4f5   :  { %3883 = vset.pattern.permute.xlu0 %v6997_v14 }
 0x4f6   :  { %2381 = vrot.lane.b32.xlu1 %v2377_v10, %s4036_s15  ;;  %2678 = vperm.xlu0 %3883, %v5567_v51   ;;  %v7018_v10 = vmov 50  }
 0x4fa   :  { %2383 = vrot.lane.b32.xlu1 %v2378_v27, %s4036_s15  ;;  %3884 = vset.pattern.permute.xlu0 %v6998_v54  ;;  %s7041_s15 = smov 90  }
 0x4fb   :  { %2698 = vperm.xlu0 %3884, %v5567_v51  }
 0x4ff   :  { %3885 = vset.pattern.permute.xlu0 %v6999_v36  ;;  %v7019_v36 = vmov 51  }
 0x500   :  { %2718 = vperm.xlu0 %3885, %v5567_v51  }
 0x504   :  { %3886 = vset.pattern.permute.xlu0 %v7000_v45 }
 0x505   :  { %2738 = vperm.xlu0 %3886, %v5567_v51  }
 0x509   :  { %3887 = vset.pattern.permute.xlu0 %v7001_v41 }
 0x50a   :  { %2758 = vperm.xlu0 %3887, %v5567_v51  }
 0x50e   :  { %3888 = vset.pattern.permute.xlu0 %v7002_v40  ;;  %v7020_v40 = vmov 52  }
 0x50f   :  { %2778 = vperm.xlu0 %3888, %v5567_v51  }
 0x513   :  { %3889 = vset.pattern.permute.xlu0 %v7003_v47 }
 0x514   :  { %v5698_v2 = vpop.permute.xlu1 %2205  ;;  %2798 = vperm.xlu0 %3889, %v5567_v51   ;;  %v5710_v7 = vpop.permute.xlu0 %2237 }
 0x518   :  { %3890 = vset.pattern.permute.xlu0 %v7004_v57  ;;  %v5703_v32 = vpop.permute.xlu1 %2207 }
 0x519   :  { %2818 = vperm.xlu0 %3890, %v5567_v51  }
 0x51c   :  { %v5707_v44 = vpop.permute.xlu1 %2221 }
 0x51d   :  { %3891 = vset.pattern.permute.xlu0 %v7005_v50 }
 0x51e   :  { %2838 = vperm.xlu0 %3891, %v5567_v51  }
 0x520   :  { %v5714_v8 = vpop.permute.xlu1 %2223 }
 0x522   :  { %3892 = vset.pattern.permute.xlu0 %v7006_v11  ;;  %v7021_v11 = vmov 53  }
 0x523   :  { %2858 = vperm.xlu0 %3892, %v5567_v51  }
 0x524   :  { %v5720_v60 = vpop.permute.xlu1 %2239 }
 0x525   :  { %v2391_v25 = vpop.permute.xlu0 %2390 }
 0x526   :  { %v2393_v43 = vmul.f32 %v2391_v25, %v5601_v61  ;;  %v2394_v6 = vmul.f32 %v2391_v25, %v5603_v15 }
 0x527   :  { %3893 = vset.pattern.permute.xlu0 %v7007_v52 }
 0x528   :  { %2878 = vperm.xlu0 %3893, %v5567_v51   ;;  %2397 = vrot.lane.b32.xlu1 %v2393_v43, %s4038_s16  ;;  %v5727_v5 = vpop.permute.xlu1 %2253 }
 0x52a   :  { %v2407_v18 = vpop.permute.xlu0 %2406 }
 0x52b   :  { %v2409_v16 = vmul.f32 %v2407_v18, %v5601_v61  ;;  %v2410_v55 = vmul.f32 %v2407_v18, %v5603_v15 }
 0x52c   :  { %3894 = vset.pattern.permute.xlu0 %v7008_v39  ;;  %2399 = vrot.lane.b32.xlu1 %v2394_v6, %s4038_s16  ;;  %v5734_v4 = vpop.permute.xlu1 %2255  ;;  %v7022_v6 = vmov 55   ;;  %s7042_s16 = smov 89  }
 0x52d   :  { %2898 = vperm.xlu0 %3894, %v5567_v51  }
 0x52f   :  { %v2423_v3 = vpop.permute.xlu0 %2422 }
 0x530   :  { %2413 = vrot.lane.b32.xlu1 %v2409_v16, %s4041_s17  ;;  %v2425_v33 = vmul.f32 %v2423_v3, %v5601_v61  ;;  %v2426_v28 = vmul.f32 %v2423_v3, %v5603_v15  ;;  %v5742_v23 = vpop.permute.xlu1 %2269  ;;  %v7023_v16 = vmov 58  }
 0x531   :  { %3895 = vset.pattern.permute.xlu0 %v7009_v26 }
 0x532   :  { %2918 = vperm.xlu0 %3895, %v5567_v51  }
 0x534   :  { %2415 = vrot.lane.b32.xlu1 %v2410_v55, %s4041_s17  ;;  %v2439_v42 = vpop.permute.xlu0 %2438  ;;  %v5750_v38 = vpop.permute.xlu1 %2271  ;;  %s7045_s17 = smov 88  }
 0x535   :  { %v2441_v48 = vmul.f32 %v2439_v42, %v5601_v61  ;;  %v2442_v19 = vmul.f32 %v2439_v42, %v5603_v15  ;;  %v7026_v42 = vmov 64  }
 0x536   :  { %3896 = vset.pattern.permute.xlu0 %v7010_v13 }
 0x537   :  { %2938 = vperm.xlu0 %3896, %v5567_v51  }
 0x538   :  { %2429 = vrot.lane.b32.xlu1 %v2425_v33, %s4044_s18  ;;  %v5757_v17 = vpop.permute.xlu1 %2285  ;;  %v7024_v33 = vmov 61  }
 0x539   :  { %v2455_v1 = vpop.permute.xlu0 %2454 }
 0x53a   :  { %v2457_v31 = vmul.f32 %v2455_v1, %v5601_v61  ;;  %v2458_v22 = vmul.f32 %v2455_v1, %v5603_v15  ;;  %v7027_v1 = vmov 67  }
 0x53b   :  { %3897 = vset.pattern.permute.xlu0 %v7011_v20 }
 0x53c   :  { %2958 = vperm.xlu0 %3897, %v5567_v51   ;;  %2431 = vrot.lane.b32.xlu1 %v2426_v28, %s4044_s18  ;;  %v5764_v9 = vpop.permute.xlu1 %2287  ;;  %s7048_s18 = smov 87  }
 0x53e   :  { %v2471_v34 = vpop.permute.xlu0 %2470 }
 0x53f   :  { %v2473_v49 = vmul.f32 %v2471_v34, %v5601_v61  ;;  %v2474_v12 = vmul.f32 %v2471_v34, %v5603_v15 }
 0x540   :  { %3898 = vset.pattern.permute.xlu0 %v7012_v29  ;;  %2445 = vrot.lane.b32.xlu1 %v2441_v48, %s4046_s19  ;;  %v5771_v46 = vpop.permute.xlu1 %2301 }
 0x541   :  { %2978 = vperm.xlu0 %3898, %v5567_v51  }
 0x543   :  { %v2487_v0 = vpop.permute.xlu0 %2486 }
 0x544   :  { %2447 = vrot.lane.b32.xlu1 %v2442_v19, %s4046_s19  ;;  %v2489_v63 = vmul.f32 %v2487_v0, %v5601_v61  ;;  %v2490_v58 = vmul.f32 %v2487_v0, %v5603_v15  ;;  %v5780_v30 = vpop.permute.xlu1 %2303  ;;  %s7051_s19 = smov 86  }
 0x545   :  { %3899 = vset.pattern.permute.xlu0 %v7013_v59 }
 0x546   :  { %2998 = vperm.xlu0 %3899, %v5567_v51  }
 0x548   :  { %2461 = vrot.lane.b32.xlu1 %v2457_v31, %s4049_s20  ;;  %v2503_v53 = vpop.permute.xlu0 %2502  ;;  %v5787_v14 = vpop.permute.xlu1 %2317 }
 0x549   :  { %v2505_v37 = vmul.f32 %v2503_v53, %v5601_v61  ;;  %v2506_v27 = vmul.f32 %v2503_v53, %v5603_v15 }
 0x54a   :  { %3900 = vset.pattern.permute.xlu0 %v7014_v62  ;;  %v7029_v62 = vmov 70  }
 0x54b   :  { %3018 = vperm.xlu0 %3900, %v5567_v51  }
 0x54c   :  { %2463 = vrot.lane.b32.xlu1 %v2458_v22, %s4049_s20  ;;  %v5794_v45 = vpop.permute.xlu1 %2319  ;;  %s7054_s20 = smov 85  }
 0x54d   :  { %v2519_v54 = vpop.permute.xlu0 %2518 }
 0x54e   :  { %v2521_v41 = vmul.f32 %v2519_v54, %v5601_v61  ;;  %v2522_v47 = vmul.f32 %v2519_v54, %v5603_v15 }
 0x54f   :  { %3901 = vset.pattern.permute.xlu0 %v7015_v35  ;;  %v7030_v35 = vmov 73  }
 0x550   :  { %3038 = vperm.xlu0 %3901, %v5567_v51   ;;  %2477 = vrot.lane.b32.xlu1 %v2473_v49, %s4051_s21  ;;  %v5801_v50 = vpop.permute.xlu1 %2333 }
 0x552   :  { %v2539_v57 = vpop.permute.xlu0 %2538 }
 0x553   :  { %v2541_v25 = vmul.f32 %v2539_v57, %v5601_v61  ;;  %v2542_v43 = vmul.f32 %v2539_v57, %v5603_v15 }
 0x554   :  { %3902 = vset.pattern.permute.xlu0 %v7016_v24  ;;  %2479 = vrot.lane.b32.xlu1 %v2474_v12, %s4051_s21  ;;  %v5809_v52 = vpop.permute.xlu1 %2335  ;;  %v7032_v24 = vmov 0   ;;  %s7057_s21 = smov 84  }
 0x555   :  { %3058 = vperm.xlu0 %3902, %v5567_v51  }
 0x557   :  { %v2559_v18 = vpop.permute.xlu0 %2558 }
 0x558   :  { %2493 = vrot.lane.b32.xlu1 %v2489_v63, %s4054_s22  ;;  %v2561_v39 = vmul.f32 %v2559_v18, %v5601_v61  ;;  %v5816_v26 = vpop.permute.xlu1 %2349  ;;  %v2562_v55 = vmul.f32 %v2559_v18, %v5603_v15 }
 0x559   :  { %3903 = vset.pattern.permute.xlu0 %v7017_v56 }
 0x55a   :  { %3078 = vperm.xlu0 %3903, %v5567_v51  }
 0x55c   :  { %2495 = vrot.lane.b32.xlu1 %v2490_v58, %s4054_s22  ;;  %v2579_v3 = vpop.permute.xlu0 %2578  ;;  %v5824_v13 = vpop.permute.xlu1 %2351  ;;  %s7060_s22 = smov 83  }
 0x55d   :  { %v2581_v28 = vmul.f32 %v2579_v3, %v5601_v61  ;;  %v2582_v20 = vmul.f32 %v2579_v3, %v5603_v15 }
 0x55e   :  { %3904 = vset.pattern.permute.xlu0 %v7018_v10 }
 0x55f   :  { %3098 = vperm.xlu0 %3904, %v5567_v51  }
 0x560   :  { %2509 = vrot.lane.b32.xlu1 %v2505_v37, %s4057_s23  ;;  %v5831_v29 = vpop.permute.xlu1 %2365 }
 0x561   :  { %v2599_v48 = vpop.permute.xlu0 %2598 }
 0x562   :  { %v2601_v19 = vmul.f32 %v2599_v48, %v5601_v61  ;;  %v2602_v59 = vmul.f32 %v2599_v48, %v5603_v15 }
 0x563   :  { %3905 = vset.pattern.permute.xlu0 %v7019_v36 }
 0x564   :  { %3118 = vperm.xlu0 %3905, %v5567_v51   ;;  %2511 = vrot.lane.b32.xlu1 %v2506_v27, %s4057_s23  ;;  %v5839_v31 = vpop.permute.xlu1 %2367  ;;  %s7063_s23 = smov 82  }
 0x566   :  { %v2619_v22 = vpop.permute.xlu0 %2618 }
 0x567   :  { %v2621_v34 = vmul.f32 %v2619_v22, %v5601_v61  ;;  %v2622_v12 = vmul.f32 %v2619_v22, %v5603_v15 }
 0x568   :  { %3906 = vset.pattern.permute.xlu0 %v7020_v40  ;;  %2525 = vrot.lane.b32.xlu1 %v2521_v41, %s4059_s24  ;;  %v5845_v49 = vpop.permute.xlu1 %2381 }
 0x569   :  { %3138 = vperm.xlu0 %3906, %v5567_v51  }
 0x56b   :  { %v2639_v0 = vpop.permute.xlu0 %2638 }
 0x56c   :  { %2527 = vrot.lane.b32.xlu1 %v2522_v47, %s4059_s24  ;;  %v2641_v63 = vmul.f32 %v2639_v0, %v5601_v61  ;;  %v5854_v56 = vpop.permute.xlu1 %2383  ;;  %v2642_v58 = vmul.f32 %v2639_v0, %v5603_v15  ;;  %s7066_s24 = smov 81  }
 0x56d   :  { %3907 = vset.pattern.permute.xlu0 %v7021_v11 }
 0x56e   :  { %3158 = vperm.xlu0 %3907, %v5567_v51  }
 0x570   :  { %2545 = vrot.lane.b32.xlu1 %v2541_v25, %s4062_s25  ;;  %v2659_v37 = vpop.permute.xlu0 %2658 }
 0x571   :  { %v2661_v10 = vmul.f32 %v2659_v37, %v5601_v61  ;;  %v2662_v54 = vmul.f32 %v2659_v37, %v5603_v15 }
 0x572   :  { %3909 = vset.pattern.permute.xlu0 %v7022_v6 }
 0x573   :  { %3198 = vperm.xlu0 %3909, %v5567_v51  }
 0x574   :  { %2547 = vrot.lane.b32.xlu1 %v2542_v43, %s4062_s25  ;;  %s7069_s25 = smov 80  }
 0x575   :  { %v2679_v41 = vpop.permute.xlu0 %2678 }
 0x576   :  { %v2681_v40 = vmul.f32 %v2679_v41, %v5601_v61  ;;  %v2682_v57 = vmul.f32 %v2679_v41, %v5603_v15 }
 0x577   :  { %3912 = vset.pattern.permute.xlu0 %v7023_v16 }
 0x578   :  { %3258 = vperm.xlu0 %3912, %v5567_v51   ;;  %2565 = vrot.lane.b32.xlu1 %v2561_v39, %s4064_s26 }
 0x57a   :  { %v2699_v25 = vpop.permute.xlu0 %2698 }
 0x57b   :  { %v2701_v43 = vmul.f32 %v2699_v25, %v5601_v61  ;;  %v2702_v18 = vmul.f32 %v2699_v25, %v5603_v15 }
 0x57c   :  { %3915 = vset.pattern.permute.xlu0 %v7024_v33  ;;  %2567 = vrot.lane.b32.xlu1 %v2562_v55, %s4064_s26  ;;  %s7072_s26 = smov 79  }
 0x57d   :  { %3318 = vperm.xlu0 %3915, %v5567_v51  }
 0x57f   :  { %v2719_v16 = vpop.permute.xlu0 %2718 }
 0x580   :  { %2585 = vrot.lane.b32.xlu1 %v2581_v28, %s7025_s0  ;;  %v2721_v55 = vmul.f32 %v2719_v16, %v5601_v61  ;;  %v2722_v33 = vmul.f32 %v2719_v16, %v5603_v15 }
 0x581   :  { %3918 = vset.pattern.permute.xlu0 %v7026_v42 }
 0x582   :  { %3378 = vperm.xlu0 %3918, %v5567_v51  }
 0x584   :  { %2587 = vrot.lane.b32.xlu1 %v2582_v20, %s7025_s0  ;;  %v2739_v42 = vpop.permute.xlu0 %2738 }
 0x585   :  { %v2741_v20 = vmul.f32 %v2739_v42, %v5601_v61 }
 0x586   :  { %3921 = vset.pattern.permute.xlu0 %v7027_v1 }
 0x587   :  { %3438 = vperm.xlu0 %3921, %v5567_v51  }
 0x588   :  { %2605 = vrot.lane.b32.xlu1 %v2601_v19, %s7028_s5  ;;  %v2742_v19 = vmul.f32 %v2739_v42, %v5603_v15 }
 0x58b   :  { %3924 = vset.pattern.permute.xlu0 %v7029_v62 }
 0x58c   :  { %3498 = vperm.xlu0 %3924, %v5567_v51   ;;  %2607 = vrot.lane.b32.xlu1 %v2602_v59, %s7028_s5  ;;  %v2759_v59 = vpop.permute.xlu0 %2758  ;;  %s7162_s5 = smov 73  }
 0x58d   :  { %v2761_v22 = vmul.f32 %v2759_v59, %v5601_v61 }
 0x590   :  { %3927 = vset.pattern.permute.xlu0 %v7030_v35  ;;  %2625 = vrot.lane.b32.xlu1 %v2621_v34, %s7031_s6  ;;  %v2762_v34 = vmul.f32 %v2759_v59, %v5603_v15 }
 0x591   :  { %3558 = vperm.xlu0 %3927, %v5567_v51  }
 0x594   :  { %2627 = vrot.lane.b32.xlu1 %v2622_v12, %s7031_s6  ;;  %v2779_v12 = vpop.permute.xlu0 %2778  ;;  %s7163_s6 = smov 72  }
 0x595   :  { %3929 = vset.pattern.permute.xlu0 %v7032_v24  ;;  %v2781_v0 = vmul.f32 %v2779_v12, %v5601_v61 }
 0x598   :  { %2645 = vrot.lane.b32.xlu1 %v2641_v63, %s7033_s7  ;;  %v2782_v63 = vmul.f32 %v2779_v12, %v5603_v15  ;;  %v2799_v37 = vpop.permute.xlu0 %2798 }
 0x599   :  { %v2802_v41 = vmul.f32 %v2799_v37, %v5603_v15 }
 0x59a   :  { %v5858_v53 = vpop.permute.xlu1 %2397 }
 0x59c   :  { %2647 = vrot.lane.b32.xlu1 %v2642_v58, %s7033_s7  ;;  %s7164_s7 = smov 71  }
 0x59e   :  { %v5862_v27 = vpop.permute.xlu1 %2399 }
 0x5a0   :  { %2665 = vrot.lane.b32.xlu1 %v2661_v10, %s7034_s8  ;;  %v2801_v10 = vmul.f32 %v2799_v37, %v5601_v61 }
 0x5a2   :  { %v5866_v36 = vpop.permute.xlu1 %2413 }
 0x5a4   :  { %2667 = vrot.lane.b32.xlu1 %v2662_v54, %s7034_s8  ;;  %s7165_s8 = smov 70  }
 0x5a6   :  { %v5870_v47 = vpop.permute.xlu1 %2415 }
 0x5a8   :  { %2685 = vrot.lane.b32.xlu1 %v2681_v40, %s7035_s9 }
 0x5aa   :  { %v5874_v11 = vpop.permute.xlu1 %2429 }
 0x5ac   :  { %2687 = vrot.lane.b32.xlu1 %v2682_v57, %s7035_s9  ;;  %v2819_v57 = vpop.permute.xlu0 %2818  ;;  %s7166_s9 = smov 69  }
 0x5ad   :  { %v2821_v25 = vmul.f32 %v2819_v57, %v5601_v61 }
 0x5ae   :  { %v5878_v6 = vpop.permute.xlu1 %2431 }
 0x5b0   :  { %2705 = vrot.lane.b32.xlu1 %v2701_v43, %s7036_s10 }
 0x5b2   :  { %v5882_v39 = vpop.permute.xlu1 %2445 }
 0x5b4   :  { %2707 = vrot.lane.b32.xlu1 %v2702_v18, %s7036_s10  ;;  %v2822_v18 = vmul.f32 %v2819_v57, %v5603_v15  ;;  %s7167_s10 = smov 68  }
 0x5b6   :  { %v5886_v3 = vpop.permute.xlu1 %2447 }
 0x5b8   :  { %2725 = vrot.lane.b32.xlu1 %v2721_v55, %s7037_s11  ;;  %v2839_v55 = vpop.permute.xlu0 %2838 }
 0x5ba   :  { %v5890_v28 = vpop.permute.xlu1 %2461 }
 0x5bc   :  { %2727 = vrot.lane.b32.xlu1 %v2722_v33, %s7037_s11  ;;  %v2841_v33 = vmul.f32 %v2839_v55, %v5601_v61  ;;  %v2859_v59 = vpop.permute.xlu0 %2858  ;;  %s7168_s11 = smov 67  }
 0x5bd   :  { %v2862_v12 = vmul.f32 %v2859_v59, %v5603_v15 }
 0x5be   :  { %v5894_v48 = vpop.permute.xlu1 %2463 }
 0x5c0   :  { %2745 = vrot.lane.b32.xlu1 %v2741_v20, %s7038_s12  ;;  %v2842_v20 = vmul.f32 %v2839_v55, %v5603_v15 }
 0x5c2   :  { %v5898_v1 = vpop.permute.xlu1 %2477 }
 0x5c4   :  { %2747 = vrot.lane.b32.xlu1 %v2742_v19, %s7038_s12  ;;  %s7169_s12 = smov 66  }
 0x5c6   :  { %v5902_v62 = vpop.permute.xlu1 %2479 }
 0x5c8   :  { %2765 = vrot.lane.b32.xlu1 %v2761_v22, %s7039_s13  ;;  %v2861_v22 = vmul.f32 %v2859_v59, %v5601_v61 }
 0x5ca   :  { %v5906_v35 = vpop.permute.xlu1 %2493 }
 0x5cc   :  { %2767 = vrot.lane.b32.xlu1 %v2762_v34, %s7039_s13  ;;  %s7170_s13 = smov 65  }
 0x5ce   :  { %v5910_v24 = vpop.permute.xlu1 %2495 }
 0x5d0   :  { %2785 = vrot.lane.b32.xlu1 %v2781_v0, %s4093_s29 }
 0x5d2   :  { %v5914_v58 = vpop.permute.xlu1 %2509 }
 0x5d4   :  { %2787 = vrot.lane.b32.xlu1 %v2782_v63, %s4093_s29  ;;  %v2879_v63 = vpop.permute.xlu0 %2878  ;;  %s7075_s29 = smov 78  }
 0x5d5   :  { %v2881_v37 = vmul.f32 %v2879_v63, %v5601_v61 }
 0x5d6   :  { %v5918_v54 = vpop.permute.xlu1 %2511 }
 0x5d8   :  { %2805 = vrot.lane.b32.xlu1 %v2801_v10, %s4096_s30 }
 0x5da   :  { %v5922_v40 = vpop.permute.xlu1 %2525 }
 0x5dc   :  { %2807 = vrot.lane.b32.xlu1 %v2802_v41, %s4096_s30  ;;  %v2882_v41 = vmul.f32 %v2879_v63, %v5603_v15  ;;  %s7078_s30 = smov 77  }
 0x5de   :  { %v5926_v43 = vpop.permute.xlu1 %2527 }
 0x5e0   :  { %2825 = vrot.lane.b32.xlu1 %v2821_v25, %s4098_s1  ;;  %v2899_v25 = vpop.permute.xlu0 %2898 }
 0x5e2   :  { %v5930_v16 = vpop.permute.xlu1 %2545 }
 0x5e4   :  { %2827 = vrot.lane.b32.xlu1 %v2822_v18, %s4098_s1  ;;  %v2901_v18 = vmul.f32 %v2899_v25, %v5601_v61  ;;  %v2919_v59 = vpop.permute.xlu0 %2918  ;;  %s7079_s1 = smov 76  }
 0x5e5   :  { %v2922_v63 = vmul.f32 %v2919_v59, %v5603_v15 }
 0x5e6   :  { %v5934_v42 = vpop.permute.xlu1 %2547 }
 0x5e8   :  { %2845 = vrot.lane.b32.xlu1 %v2841_v33, %s7040_s14  ;;  %v2902_v33 = vmul.f32 %v2899_v25, %v5603_v15 }
 0x5ea   :  { %v5938_v19 = vpop.permute.xlu1 %2565 }
 0x5ec   :  { %2847 = vrot.lane.b32.xlu1 %v2842_v20, %s7040_s14  ;;  %s7171_s14 = smov 64  }
 0x5ee   :  { %v5942_v34 = vpop.permute.xlu1 %2567 }
 0x5f0   :  { %2865 = vrot.lane.b32.xlu1 %v2861_v22, %s7041_s15  ;;  %v2921_v22 = vmul.f32 %v2919_v59, %v5601_v61 }
 0x5f2   :  { %v5946_v0 = vpop.permute.xlu1 %2585 }
 0x5f4   :  { %2867 = vrot.lane.b32.xlu1 %v2862_v12, %s7041_s15  ;;  %s7172_s15 = smov 63  }
 0x5f6   :  { %v5950_v10 = vpop.permute.xlu1 %2587 }
 0x5f8   :  { %2885 = vrot.lane.b32.xlu1 %v2881_v37, %s7042_s16 }
 0x5fa   :  { %v5954_v57 = vpop.permute.xlu1 %2605 }
 0x5fb   :  { %7043 = vst [vmem:[#allocation8_spill] sm:$0xff] %v5954_v57 }
 0x5fc   :  { %2887 = vrot.lane.b32.xlu1 %v2882_v41, %s7042_s16  ;;  %v2939_v41 = vpop.permute.xlu0 %2938  ;;  %s7173_s16 = smov 62  }
 0x5fd   :  { %v2941_v25 = vmul.f32 %v2939_v41, %v5601_v61 }
 0x5fe   :  { %v5958_v55 = vpop.permute.xlu1 %2607 }
 0x5ff   :  { %7044 = vst [vmem:[#allocation10_spill] sm:$0xff] %v5958_v55 }
 0x600   :  { %2905 = vrot.lane.b32.xlu1 %v2901_v18, %s7045_s17 }
 0x602   :  { %v5962_v20 = vpop.permute.xlu1 %2625 }
 0x603   :  { %7046 = vst [vmem:[#allocation9_spill] sm:$0xff] %v5962_v20 }
 0x604   :  { %2907 = vrot.lane.b32.xlu1 %v2902_v33, %s7045_s17  ;;  %v2942_v33 = vmul.f32 %v2939_v41, %v5603_v15  ;;  %s7174_s17 = smov 61  }
 0x606   :  { %v5966_v12 = vpop.permute.xlu1 %2627 }
 0x607   :  { %7047 = vst [vmem:[#allocation45_spill] sm:$0xff] %v5966_v12  ;;  %v2959_v12 = vpop.permute.xlu0 %2958 }
 0x608   :  { %2925 = vrot.lane.b32.xlu1 %v2921_v22, %s7048_s18  ;;  %v2961_v59 = vmul.f32 %v2959_v12, %v5601_v61 }
 0x60a   :  { %v5970_v37 = vpop.permute.xlu1 %2645 }
 0x60b   :  { %7049 = vst [vmem:[#allocation12_spill] sm:$0xff] %v5970_v37 }
 0x60c   :  { %2927 = vrot.lane.b32.xlu1 %v2922_v63, %s7048_s18  ;;  %v2962_v63 = vmul.f32 %v2959_v12, %v5603_v15  ;;  %s7175_s18 = smov 60  }
 0x60e   :  { %v5974_v18 = vpop.permute.xlu1 %2647 }
 0x60f   :  { %7050 = vst [vmem:[#allocation11_spill] sm:$0xff] %v5974_v18  ;;  %v2979_v18 = vpop.permute.xlu0 %2978 }
 0x610   :  { %2945 = vrot.lane.b32.xlu1 %v2941_v25, %s7051_s19  ;;  %v2981_v41 = vmul.f32 %v2979_v18, %v5601_v61 }
 0x612   :  { %v5978_v20 = vpop.permute.xlu1 %2665 }
 0x613   :  { %7052 = vst [vmem:[#allocation14_spill] sm:$0xff] %v5978_v20 }
 0x614   :  { %2947 = vrot.lane.b32.xlu1 %v2942_v33, %s7051_s19  ;;  %v2982_v33 = vmul.f32 %v2979_v18, %v5603_v15  ;;  %s7176_s19 = smov 59  }
 0x616   :  { %v5982_v22 = vpop.permute.xlu1 %2667 }
 0x617   :  { %7053 = vst [vmem:[#allocation13_spill] sm:$0xff] %v5982_v22  ;;  %v2999_v22 = vpop.permute.xlu0 %2998 }
 0x618   :  { %2965 = vrot.lane.b32.xlu1 %v2961_v59, %s7054_s20  ;;  %v3001_v12 = vmul.f32 %v2999_v22, %v5601_v61 }
 0x61a   :  { %v5986_v37 = vpop.permute.xlu1 %2685 }
 0x61b   :  { %7055 = vst [vmem:[#allocation16_spill] sm:$0xff] %v5986_v37 }
 0x61c   :  { %2967 = vrot.lane.b32.xlu1 %v2962_v63, %s7054_s20  ;;  %v3002_v63 = vmul.f32 %v2999_v22, %v5603_v15  ;;  %s7177_s20 = smov 58  }
 0x61e   :  { %v5990_v25 = vpop.permute.xlu1 %2687 }
 0x61f   :  { %7056 = vst [vmem:[#allocation15_spill] sm:$0xff] %v5990_v25  ;;  %v3019_v25 = vpop.permute.xlu0 %3018 }
 0x620   :  { %2985 = vrot.lane.b32.xlu1 %v2981_v41, %s7057_s21  ;;  %v3021_v18 = vmul.f32 %v3019_v25, %v5601_v61 }
 0x622   :  { %v5994_v20 = vpop.permute.xlu1 %2705 }
 0x623   :  { %7058 = vst [vmem:[#allocation18_spill] sm:$0xff] %v5994_v20 }
 0x624   :  { %2987 = vrot.lane.b32.xlu1 %v2982_v33, %s7057_s21  ;;  %v3022_v33 = vmul.f32 %v3019_v25, %v5603_v15  ;;  %s7178_s21 = smov 57  }
 0x626   :  { %v5998_v59 = vpop.permute.xlu1 %2707 }
 0x627   :  { %7059 = vst [vmem:[#allocation17_spill] sm:$0xff] %v5998_v59  ;;  %v3039_v59 = vpop.permute.xlu0 %3038 }
 0x628   :  { %3005 = vrot.lane.b32.xlu1 %v3001_v12, %s7060_s22  ;;  %v3041_v22 = vmul.f32 %v3039_v59, %v5601_v61 }
 0x62a   :  { %v6002_v37 = vpop.permute.xlu1 %2725 }
 0x62b   :  { %7061 = vst [vmem:[#allocation20_spill] sm:$0xff] %v6002_v37 }
 0x62c   :  { %3007 = vrot.lane.b32.xlu1 %v3002_v63, %s7060_s22  ;;  %v3042_v63 = vmul.f32 %v3039_v59, %v5603_v15  ;;  %s7179_s22 = smov 56  }
 0x62e   :  { %v6006_v41 = vpop.permute.xlu1 %2727 }
 0x62f   :  { %7062 = vst [vmem:[#allocation19_spill] sm:$0xff] %v6006_v41  ;;  %v3059_v41 = vpop.permute.xlu0 %3058 }
 0x630   :  { %3025 = vrot.lane.b32.xlu1 %v3021_v18, %s7063_s23  ;;  %v3061_v25 = vmul.f32 %v3059_v41, %v5601_v61 }
 0x632   :  { %v6010_v20 = vpop.permute.xlu1 %2745 }
 0x633   :  { %7064 = vst [vmem:[#allocation22_spill] sm:$0xff] %v6010_v20 }
 0x634   :  { %3027 = vrot.lane.b32.xlu1 %v3022_v33, %s7063_s23  ;;  %v3062_v33 = vmul.f32 %v3059_v41, %v5603_v15  ;;  %s7180_s23 = smov 55  }
 0x636   :  { %v6014_v12 = vpop.permute.xlu1 %2747 }
 0x637   :  { %7065 = vst [vmem:[#allocation21_spill] sm:$0xff] %v6014_v12  ;;  %v3079_v12 = vpop.permute.xlu0 %3078 }
 0x638   :  { %3045 = vrot.lane.b32.xlu1 %v3041_v22, %s7066_s24  ;;  %v3081_v59 = vmul.f32 %v3079_v12, %v5601_v61 }
 0x63a   :  { %v6018_v37 = vpop.permute.xlu1 %2765 }
 0x63b   :  { %7067 = vst [vmem:[#allocation24_spill] sm:$0xff] %v6018_v37 }
 0x63c   :  { %3047 = vrot.lane.b32.xlu1 %v3042_v63, %s7066_s24  ;;  %v3082_v63 = vmul.f32 %v3079_v12, %v5603_v15 }
 0x63e   :  { %v6022_v18 = vpop.permute.xlu1 %2767 }
 0x63f   :  { %7068 = vst [vmem:[#allocation23_spill] sm:$0xff] %v6022_v18  ;;  %v3099_v18 = vpop.permute.xlu0 %3098 }
 0x640   :  { %3065 = vrot.lane.b32.xlu1 %v3061_v25, %s7069_s25  ;;  %v3101_v41 = vmul.f32 %v3099_v18, %v5601_v61 }
 0x642   :  { %v6026_v20 = vpop.permute.xlu1 %2785 }
 0x643   :  { %7070 = vst [vmem:[#allocation26_spill] sm:$0xff] %v6026_v20 }
 0x644   :  { %3067 = vrot.lane.b32.xlu1 %v3062_v33, %s7069_s25  ;;  %v3102_v33 = vmul.f32 %v3099_v18, %v5603_v15 }
 0x646   :  { %v6030_v22 = vpop.permute.xlu1 %2787 }
 0x647   :  { %7071 = vst [vmem:[#allocation25_spill] sm:$0xff] %v6030_v22  ;;  %v3119_v22 = vpop.permute.xlu0 %3118 }
 0x648   :  { %3085 = vrot.lane.b32.xlu1 %v3081_v59, %s7072_s26  ;;  %v3121_v12 = vmul.f32 %v3119_v22, %v5601_v61 }
 0x64a   :  { %v6034_v37 = vpop.permute.xlu1 %2805 }
 0x64b   :  { %7073 = vst [vmem:[#allocation52_spill] sm:$0xff] %v6034_v37  ;;  %v2194_v37 = vmul.f32 %v5618_v21, %v5603_v15 }
 0x64c   :  { %3087 = vrot.lane.b32.xlu1 %v3082_v63, %s7072_s26  ;;  %v2193_v63 = vmul.f32 %v5618_v21, %v5601_v61  ;;  %s7181_s26 = smov 54  }
 0x64e   :  { %v6038_v25 = vpop.permute.xlu1 %2807 }
 0x64f   :  { %7074 = vst [vmem:[#allocation28_spill] sm:$0xff] %v6038_v25  ;;  %v2211_v25 = vadd.f32 %v5698_v2, %v2193_v63 }
 0x650   :  { %3105 = vrot.lane.b32.xlu1 %v3101_v41, %s7075_s29  ;;  %v3122_v41 = vmul.f32 %v3119_v22, %v5603_v15 }
 0x652   :  { %v6042_v20 = vpop.permute.xlu1 %2825 }
 0x653   :  { %7076 = vst [vmem:[#allocation27_spill] sm:$0xff] %v6042_v20  ;;  %v3139_v20 = vpop.permute.xlu0 %3138 }
 0x654   :  { %3107 = vrot.lane.b32.xlu1 %v3102_v33, %s7075_s29  ;;  %v2212_v33 = vadd.f32 %v5703_v32, %v2194_v37  ;;  %v3141_v57 = vmul.f32 %v3139_v20, %v5601_v61  ;;  %v3142_v32 = vmul.f32 %v3139_v20, %v5603_v15 }
 0x656   :  { %v6046_v59 = vpop.permute.xlu1 %2827 }
 0x657   :  { %7077 = vst [vmem:[#allocation30_spill] sm:$0xff] %v6046_v59  ;;  %v2227_v59 = vadd.f32 %v5707_v44, %v2211_v25  ;;  %v6071_v63 = vpop.permute.xlu0 %3158 }
 0x658   :  { %3125 = vrot.lane.b32.xlu1 %v3121_v12, %s7078_s30  ;;  %v2228_v12 = vadd.f32 %v5714_v8, %v2212_v33 }
 0x659   :  { %v2243_v22 = vadd.f32 %v5710_v7, %v2227_v59  ;;  %v3161_v7 = vmul.f32 %v6071_v63, %v5601_v61 }
 0x65a   :  { %v6054_v18 = vpop.permute.xlu1 %2845  ;;  %v2244_v21 = vadd.f32 %v5720_v60, %v2228_v12  ;;  %v7081_v12 = vmov 56  }
 0x65b   :  { %v2259_v44 = vadd.f32 %v5727_v5, %v2243_v22 }
 0x65c   :  { %3127 = vrot.lane.b32.xlu1 %v3122_v41, %s7078_s30  ;;  %v2260_v2 = vadd.f32 %v5734_v4, %v2244_v21 }
 0x65d   :  { %v2275_v60 = vadd.f32 %v5742_v23, %v2259_v44  ;;  %v2530_v44 = vrot.slane %v5926_v43, 4 }
 0x65e   :  { %v6062_v55 = vpop.permute.xlu1 %2847  ;;  %v2276_v8 = vadd.f32 %v5750_v38, %v2260_v2 }
 0x65f   :  { %v2291_v20 = vadd.f32 %v5757_v17, %v2275_v60  ;;  %v7084_v60 = vmov 60  }
 0x660   :  { %3145 = vrot.lane.b32.xlu1 %v3141_v57, %s7079_s1  ;;  %v2292_v57 = vadd.f32 %v5764_v9, %v2276_v8 }
 0x661   :  { %v2307_v5 = vadd.f32 %v5771_v46, %v2291_v20 }
 0x662   :  { %v6069_v37 = vpop.permute.xlu1 %2865  ;;  %v2308_v25 = vadd.f32 %v5780_v30, %v2292_v57 }
 0x663   :  { %v2323_v23 = vadd.f32 %v5787_v14, %v2307_v5  ;;  %v6102_v14 = vld [vmem:[%s6570_s2] sm:$0xf]  ;;  %v2569_v5 = vrot.slane %v5938_v19, 4  ;;  %s7161_s2 = smov 74  }
 0x664   :  { %3147 = vrot.lane.b32.xlu1 %v3142_v32, %s7079_s1  ;;  %v2324_v38 = vadd.f32 %v5794_v45, %v2308_v25 }
 0x665   :  { %v2339_v41 = vadd.f32 %v5801_v50, %v2323_v23 }
 0x666   :  { %v6080_v4 = vpop.permute.xlu1 %2867  ;;  %v2340_v9 = vadd.f32 %v5809_v52, %v2324_v38 }
 0x667   :  { %v2355_v30 = vadd.f32 %v5816_v26, %v2339_v41  ;;  %v7086_v41 = vld [vmem:[#allocation10_spill] sm:$0xff] }
 0x668   :  { %3165 = vrot.lane.b32.xlu1 %v3161_v7, %s7080_s27  ;;  %v2356_v17 = vadd.f32 %v5824_v13, %v2340_v9  ;;  %v7082_v13 = vmov 57   ;;  %v7085_v9 = vmov 62  }
 0x66a   :  { %v6087_v59 = vpop.permute.xlu1 %2885  ;;  %v2372_v46 = vadd.f32 %v5839_v31, %v2356_v17  ;;  %v2610_v17 = vrot.slane %v7086_v41, 4 }
 0x66c   :  { %3178 = vperm.xlu1 %3908, %v5567_v51   ;;  %v2371_v51 = vadd.f32 %v5831_v29, %v2355_v30  ;;  %v2388_v45 = vadd.f32 %v5854_v56, %v2372_v46 }
 0x66e   :  { %v6094_v33 = vpop.permute.xlu1 %2887  ;;  %v2387_v52 = vadd.f32 %v5845_v49, %v2371_v51  ;;  %v2404_v26 = vadd.f32 %v5862_v27, %v2388_v45  ;;  %v7083_v27 = vmov 59   ;;  %v7088_v45 = vld [vmem:[#allocation45_spill] sm:$0xff] }
 0x670   :  { %3910 = vset.pattern.permute.xlu1 %v7081_v12  ;;  %v2403_v31 = vadd.f32 %v5858_v53, %v2387_v52  ;;  %v2420_v21 = vadd.f32 %v5870_v47, %v2404_v26 }
 0x671   :  { %3218 = vperm.xlu1 %3910, %v6102_v14  }
 0x672   :  { %v6107_v50 = vpop.permute.xlu1 %2905  ;;  %v2419_v29 = vadd.f32 %v5866_v36, %v2403_v31  ;;  %v2436_v56 = vadd.f32 %v5878_v6, %v2420_v21  ;;  %v2612_v31 = vsel %vm746_vm8, %v7086_v41, %v2610_v17  ;;  %v7089_v21 = vld [vmem:[#allocation9_spill] sm:$0xff] }
 0x674   :  { %v2435_v2 = vadd.f32 %v5874_v11, %v2419_v29  ;;  %v2452_v49 = vadd.f32 %v5886_v3, %v2436_v56  ;;  %v2529_v11 = vrot.slane %v5922_v40, 4  ;;  %v2550_v3 = vrot.slane %v5934_v42, 4  ;;  %v7090_v56 = vld [vmem:[#allocation11_spill] sm:$0xff] }
 0x675   :  { %3911 = vset.pattern.permute.xlu1 %v7082_v13  ;;  %v2629_v29 = vrot.slane %v7089_v21, 4 }
 0x676   :  { %v6114_v22 = vpop.permute.xlu1 %2907  ;;  %3238 = vperm.xlu1 %3911, %v6102_v14   ;;  %v2451_v53 = vadd.f32 %v5882_v39, %v2435_v2  ;;  %v2468_v47 = vadd.f32 %v5894_v48, %v2452_v49  ;;  %v2532_v48 = vsel %vm634_vm4, %v5926_v43, %v2530_v44  ;;  %v2590_v43 = vrot.slane %v5950_v10, 4 }
 0x677   :  { %v2650_v2 = vrot.slane %v7090_v56, 4 }
 0x678   :  { %v2467_v36 = vadd.f32 %v5890_v28, %v2451_v53  ;;  %v2484_v6 = vadd.f32 %v5902_v62, %v2468_v47  ;;  %v2549_v28 = vrot.slane %v5930_v16, 4  ;;  %v2570_v62 = vrot.slane %v5942_v34, 4  ;;  %v7092_v47 = vld [vmem:[#allocation12_spill] sm:$0xff] }
 0x679   :  { %v2592_v12 = vsel %vm718_vm7, %v5950_v10, %v2590_v43  ;;  %v2649_v44 = vrot.slane %v7092_v47, 4 }
 0x67a   :  { %v6121_v32 = vpop.permute.xlu1 %2925  ;;  %3913 = vset.pattern.permute.xlu1 %v7083_v27  ;;  %v2483_v57 = vadd.f32 %v5898_v1, %v2467_v36  ;;  %v2500_v39 = vadd.f32 %v5910_v24, %v2484_v6  ;;  %v2531_v1 = vsel %vm634_vm4, %v5922_v40, %v2529_v11  ;;  %v2552_v24 = vsel %vm662_vm5, %v5934_v42, %v2550_v3  ;;  %v7093_v36 = vld [vmem:[#allocation13_spill] sm:$0xff] }
 0x67b   :  { %3278 = vperm.xlu1 %3913, %v6102_v14   ;;  %v2589_v40 = vrot.slane %v5946_v0, 4  ;;  %v2670_v6 = vrot.slane %v7093_v36, 4  ;;  %vm7104_vm4 = vcmask 793600  }
 0x67c   :  { %v2499_v7 = vadd.f32 %v5906_v35, %v2483_v57  ;;  %v2516_v20 = vadd.f32 %v5918_v54, %v2500_v39  ;;  %v2551_v35 = vsel %vm662_vm5, %v5930_v16, %v2549_v28  ;;  %v2572_v54 = vsel %vm690_vm6, %v5942_v34, %v2570_v62  ;;  %v7087_v16 = vld [vmem:[#allocation8_spill] sm:$0xff]  ;;  %v7094_v39 = vld [vmem:[#allocation14_spill] sm:$0xff]  ;;  %v7095_v28 = vld [vmem:[#allocation15_spill] sm:$0xff] }
 0x67d   :  { %v2609_v51 = vrot.slane %v7087_v16, 4  ;;  %v2630_v34 = vrot.slane %v7088_v45, 4  ;;  %v2591_v13 = vsel %vm718_vm7, %v5946_v0, %v2589_v40  ;;  %v2652_v57 = vsel %vm802_vm10, %v7090_v56, %v2650_v2  ;;  %vm7107_vm5 = vmmov %vm7104_vm4 }
 0x67e   :  { %v6130_v8 = vpop.permute.xlu1 %2927  ;;  %v2515_v38 = vadd.f32 %v5914_v58, %v2499_v7  ;;  %v2536_v23 = vadd.f32 %v2532_v48, %v2516_v20  ;;  %v2571_v58 = vsel %vm690_vm6, %v5938_v19, %v2569_v5  ;;  %v7091_v19 = vmov 63  }
 0x67f   :  { %3914 = vset.pattern.permute.xlu1 %v7084_v60  ;;  %v2611_v53 = vsel %vm746_vm8, %v7087_v16, %v2609_v51  ;;  %v2632_v0 = vsel %vm774_vm9, %v7088_v45, %v2630_v34  ;;  %v2631_v60 = vsel %vm774_vm9, %v7089_v21, %v2629_v29  ;;  %v2669_v48 = vrot.slane %v7094_v39, 4 }
 0x680   :  { %3298 = vperm.xlu1 %3914, %v6102_v14   ;;  %v2535_v42 = vadd.f32 %v2531_v1, %v2515_v38  ;;  %v2556_v30 = vadd.f32 %v2552_v24, %v2536_v23  ;;  %v2690_v62 = vrot.slane %v7095_v28, 4  ;;  %v7096_v24 = vmov 65   ;;  %v7097_v38 = vld [vmem:[#allocation16_spill] sm:$0xff] }
 0x681   :  { %v2651_v5 = vsel %vm802_vm10, %v7092_v47, %v2649_v44  ;;  %v2672_v43 = vsel %vm830_vm11, %v7093_v36, %v2670_v6  ;;  %v2689_v23 = vrot.slane %v7097_v38, 4  ;;  %v2671_v41 = vsel %vm830_vm11, %v7094_v39, %v2669_v48  ;;  %v7110_v39 = vld [vmem:[#allocation25_spill] sm:$0xff] }
 0x682   :  { %v6144_v25 = vpop.permute.xlu1 %2945  ;;  %v2555_v52 = vadd.f32 %v2551_v35, %v2535_v42  ;;  %v2576_v26 = vadd.f32 %v2572_v54, %v2556_v30  ;;  %v2692_v17 = vsel %vm858_vm12, %v7095_v28, %v2690_v62  ;;  %v7099_v42 = vld [vmem:[#allocation18_spill] sm:$0xff]  ;;  %v7103_v29 = vmov 66  }
 0x683   :  { %v2709_v30 = vrot.slane %v7099_v42, 4  ;;  %v2691_v34 = vsel %vm858_vm12, %v7097_v38, %v2689_v23  ;;  %vm7108_vm6 = vcmask 785408   ;;  %v2790_v48 = vrot.slane %v7110_v39, 4  ;;  %v7115_v38 = vld [vmem:[#allocation28_spill] sm:$0xff] }
 0x684   :  { %3916 = vset.pattern.permute.xlu1 %v7085_v9  ;;  %v2575_v49 = vadd.f32 %v2571_v58, %v2555_v52  ;;  %v2596_v10 = vadd.f32 %v2592_v12, %v2576_v26  ;;  %v7098_v9 = vld [vmem:[#allocation17_spill] sm:$0xff]  ;;  %v7100_v58 = vld [vmem:[#allocation19_spill] sm:$0xff]  ;;  %v7101_v26 = vld [vmem:[#allocation20_spill] sm:$0xff]  ;;  %vm7113_vm8 = vcmask 777216   ;;  %v2810_v23 = vrot.slane %v7115_v38, 4 }
 0x685   :  { %3338 = vperm.xlu1 %3916, %v6102_v14   ;;  %v2710_v35 = vrot.slane %v7098_v9, 4  ;;  %v2730_v12 = vrot.slane %v7100_v58, 4  ;;  %vm7112_vm7 = vmmov %vm7108_vm6  ;;  %vm7117_vm10 = vcmask 769024   ;;  %vm7121_vm12 = vcmask 760832  }
 0x686   :  { %v6161_v46 = vpop.permute.xlu1 %2947  ;;  %v2595_v11 = vadd.f32 %v2591_v13, %v2575_v49  ;;  %v2616_v3 = vadd.f32 %v2612_v31, %v2596_v10  ;;  %v2729_v13 = vrot.slane %v7101_v26, 4  ;;  %v7102_v31 = vld [vmem:[#allocation21_spill] sm:$0xff]  ;;  %v7105_v10 = vld [vmem:[#allocation22_spill] sm:$0xff]  ;;  %vm7116_vm9 = vmmov %vm7113_vm8 }
 0x687   :  { %v2712_v52 = vsel %vm886_vm13, %v7098_v9, %v2710_v35  ;;  %v2750_v21 = vrot.slane %v7102_v31, 4  ;;  %v2732_v49 = vsel %vm7104_vm4, %v7100_v58, %v2730_v12  ;;  %vm7120_vm11 = vmmov %vm7117_vm10  ;;  %vm7127_vm4 = vcmask 744448  }
 0x688   :  { %v2615_v7 = vadd.f32 %v2611_v53, %v2595_v11  ;;  %v2636_v20 = vadd.f32 %v2632_v0, %v2616_v3  ;;  %v2749_v53 = vrot.slane %v7105_v10, 4  ;;  %v7106_v0 = vld [vmem:[#allocation23_spill] sm:$0xff]  ;;  %v2731_v11 = vsel %vm7107_vm5, %v7101_v26, %v2729_v13  ;;  %vm7129_vm5 = vmmov %vm7127_vm4 }
 0x689   :  { %3917 = vset.pattern.permute.xlu1 %v7091_v19  ;;  %v2711_v19 = vsel %vm886_vm13, %v7099_v42, %v2709_v30  ;;  %v2770_v47 = vrot.slane %v7106_v0, 4  ;;  %v2752_v3 = vsel %vm7108_vm6, %v7102_v31, %v2750_v21  ;;  %v7119_v30 = vld [vmem:[#allocation30_spill] sm:$0xff]  ;;  %v2850_v13 = vrot.slane %v6062_v55, 4  ;;  %vm7124_vm13 = vmmov %vm7121_vm12 }
 0x68a   :  { %v6176_v27 = vpop.permute.xlu1 %2965  ;;  %3358 = vperm.xlu1 %3917, %v6102_v14   ;;  %v2635_v54 = vadd.f32 %v2631_v60, %v2615_v7  ;;  %v2656_v40 = vadd.f32 %v2652_v57, %v2636_v20  ;;  %v7109_v60 = vld [vmem:[#allocation24_spill] sm:$0xff]  ;;  %v7111_v7 = vmov 68   ;;  %v2751_v20 = vsel %vm7112_vm7, %v7105_v10, %v2749_v53 }
 0x68b   :  { %v2769_v57 = vrot.slane %v7109_v60, 4  ;;  %v2830_v58 = vrot.slane %v7119_v30, 4  ;;  %v7123_v31 = vmov 69   ;;  %v2870_v10 = vrot.slane %v6080_v4, 4 }
 0x68c   :  { %v2655_v16 = vadd.f32 %v2651_v5, %v2635_v54  ;;  %v2676_v51 = vadd.f32 %v2672_v43, %v2656_v40  ;;  %v7114_v5 = vld [vmem:[#allocation26_spill] sm:$0xff]  ;;  %vm7130_vm6 = vcmask 736256  }
 0x68d   :  { %v2789_v43 = vrot.slane %v7114_v5, 4  ;;  %v2771_v40 = vsel %vm7116_vm9, %v7109_v60, %v2769_v57  ;;  %vm7131_vm7 = vmmov %vm7130_vm6 }
 0x68e   :  { %v6191_v1 = vpop.permute.xlu1 %2967  ;;  %3919 = vset.pattern.permute.xlu1 %v7096_v24  ;;  %v2675_v56 = vadd.f32 %v2671_v41, %v2655_v16  ;;  %v2696_v2 = vadd.f32 %v2692_v17, %v2676_v51  ;;  %v2772_v24 = vsel %vm7113_vm8, %v7106_v0, %v2770_v47  ;;  %v2792_v41 = vsel %vm7117_vm10, %v7110_v39, %v2790_v48  ;;  %v7118_v17 = vld [vmem:[#allocation52_spill] sm:$0xff] }
 0x68f   :  { %3398 = vperm.xlu1 %3919, %v6102_v14   ;;  %v2809_v42 = vrot.slane %v7118_v17, 4  ;;  %v2791_v51 = vsel %vm7120_vm11, %v7114_v5, %v2789_v43  ;;  %v7128_v39 = vmov 71   ;;  %vm7132_vm8 = vcmask 728064  }
 0x690   :  { %v2695_v44 = vadd.f32 %v2691_v34, %v2675_v56  ;;  %v2716_v36 = vadd.f32 %v2712_v52, %v2696_v2  ;;  %v2812_v34 = vsel %vm7121_vm12, %v7115_v38, %v2810_v23  ;;  %v7122_v52 = vld [vmem:[#allocation27_spill] sm:$0xff]  ;;  %v2909_v43 = vrot.slane %v6107_v50, 4  ;;  %vm7133_vm9 = vmmov %vm7132_vm8 }
 0x691   :  { %v2829_v26 = vrot.slane %v7122_v52, 4  ;;  %v2811_v2 = vsel %vm7124_vm13, %v7118_v17, %v2809_v42  ;;  %vm7134_vm10 = vcmask 719872   ;;  %vm7137_vm12 = vcmask 711680  }
 0x692   :  { %v6207_v45 = vpop.permute.xlu1 %2985  ;;  %v2715_v28 = vadd.f32 %v2711_v19, %v2695_v44  ;;  %v2736_v62 = vadd.f32 %v2732_v49, %v2716_v36  ;;  %v2832_v19 = vsel %vm7125_vm14, %v7119_v30, %v2830_v58  ;;  %v2849_v49 = vrot.slane %v6054_v18, 4  ;;  %vm7136_vm11 = vmmov %vm7134_vm10 }
 0x693   :  { %3920 = vset.pattern.permute.xlu1 %v7103_v29  ;;  %v2831_v47 = vsel %vm7126_vm2, %v7122_v52, %v2829_v26  ;;  %v2852_v44 = vsel %vm7127_vm4, %v6062_v55, %v2850_v13  ;;  %v2869_v36 = vrot.slane %v6069_v37, 4  ;;  %v2910_v55 = vrot.slane %v6114_v22, 4  ;;  %vm7138_vm13 = vmmov %vm7137_vm12 }
 0x694   :  { %3418 = vperm.xlu1 %3920, %v6102_v14   ;;  %v2735_v9 = vadd.f32 %v2731_v11, %v2715_v28  ;;  %v2756_v35 = vadd.f32 %v2752_v3, %v2736_v62  ;;  %v2890_v11 = vrot.slane %v6094_v33, 4  ;;  %v2851_v48 = vsel %vm7129_vm5, %v6054_v18, %v2849_v49 }
 0x695   :  { %v2872_v28 = vsel %vm7130_vm6, %v6080_v4, %v2870_v10  ;;  %v2889_v62 = vrot.slane %v6087_v59, 4  ;;  %v2930_v18 = vrot.slane %v6130_v8, 4  ;;  %v2911_v42 = vsel %vm7136_vm11, %v6107_v50, %v2909_v43 }
 0x696   :  { %v6223_v6 = vpop.permute.xlu1 %2987  ;;  %v2755_v12 = vadd.f32 %v2751_v20, %v2735_v9  ;;  %v2776_v16 = vadd.f32 %v2772_v24, %v2756_v35  ;;  %v2871_v24 = vsel %vm7131_vm7, %v6069_v37, %v2869_v36  ;;  %v2892_v5 = vsel %vm7132_vm8, %v6094_v33, %v2890_v11 }
 0x697   :  { %v2891_v9 = vsel %vm7133_vm9, %v6087_v59, %v2889_v62  ;;  %v2912_v35 = vsel %vm7134_vm10, %v6114_v22, %v2910_v55  ;;  %v2950_v37 = vrot.slane %v6161_v46, 4  ;;  %v2932_v30 = vsel %vm7137_vm12, %v6130_v8, %v2930_v18 }
 0x698   :  { %3922 = vset.pattern.permute.xlu1 %v7111_v7  ;;  %v2775_v21 = vadd.f32 %v2771_v40, %v2755_v12  ;;  %v2796_v29 = vadd.f32 %v2792_v41, %v2776_v16  ;;  %v2929_v40 = vrot.slane %v6121_v32, 4  ;;  %v7135_v41 = vmov 72  }
 0x699   :  { %3458 = vperm.xlu1 %3922, %v6102_v14   ;;  %v2949_v59 = vrot.slane %v6144_v25, 4  ;;  %v2970_v22 = vrot.slane %v6191_v1, 4  ;;  %vm7139_vm14 = vcmask 703488   ;;  %v2969_v52 = vrot.slane %v6176_v27, 4 }
 0x69a   :  { %v6239_v54 = vpop.permute.xlu1 %3005  ;;  %v2795_v53 = vadd.f32 %v2791_v51, %v2775_v21  ;;  %v2816_v0 = vadd.f32 %v2812_v34, %v2796_v29  ;;  %v2931_v51 = vsel %vm7138_vm13, %v6121_v32, %v2929_v40  ;;  %v2952_v34 = vsel %vm7139_vm14, %v6161_v46, %v2950_v37  ;;  %vm7141_vm2 = vmmov %vm7139_vm14 }
 0x69b   :  { %v2990_v50 = vrot.slane %v6223_v6, 4  ;;  %v7140_v8 = vmov 74   ;;  %vm7142_vm4 = vcmask 695296   ;;  %v2989_v29 = vrot.slane %v6207_v45, 4 }
 0x69c   :  { %v2815_v3 = vadd.f32 %v2811_v2, %v2795_v53  ;;  %v2836_v60 = vadd.f32 %v2832_v19, %v2816_v0  ;;  %v2972_v21 = vsel %vm7142_vm4, %v6191_v1, %v2970_v22  ;;  %v3162_v46 = vmul.f32 %v6071_v63, %v5603_v15  ;;  %vm7143_vm5 = vmmov %vm7142_vm4 }
 0x69d   :  { %3923 = vset.pattern.permute.xlu1 %v7123_v31  ;;  %v2951_v31 = vsel %vm7141_vm2, %v6144_v25, %v2949_v59  ;;  %v2971_v10 = vsel %vm7143_vm5, %v6176_v27, %v2969_v52  ;;  %vm7144_vm6 = vcmask 687104   ;;  %v3009_v1 = vrot.slane %v6239_v54, 4 }
 0x69e   :  { %v6254_v56 = vpop.permute.xlu1 %3007  ;;  %3478 = vperm.xlu1 %3923, %v6102_v14   ;;  %v2835_v7 = vadd.f32 %v2831_v47, %v2815_v3  ;;  %v2856_v20 = vadd.f32 %v2852_v44, %v2836_v60  ;;  %v2992_v25 = vsel %vm7144_vm6, %v6223_v6, %v2990_v50  ;;  %vm7145_vm7 = vmmov %vm7144_vm6  ;;  %vm7146_vm8 = vcmask 678912  }
 0x69f   :  { %v3010_v32 = vrot.slane %v6254_v56, 4  ;;  %vm7147_vm9 = vmmov %vm7146_vm8  ;;  %vm7148_vm10 = vcmask 670720   ;;  %vm7150_vm12 = vcmask 662528   ;;  %vm7152_vm14 = vcmask 654336  }
 0x6a0   :  { %v2855_v38 = vadd.f32 %v2851_v48, %v2835_v7  ;;  %v2876_v4 = vadd.f32 %v2872_v28, %v2856_v20  ;;  %v3011_v6 = vsel %vm7147_vm9, %v6239_v54, %v3009_v1  ;;  %vm7149_vm11 = vmmov %vm7148_vm10  ;;  %vm7154_vm4 = vcmask 646144  }
 0x6a1   :  { %v3012_v63 = vsel %vm7146_vm8, %v6254_v56, %v3010_v32  ;;  %vm7151_vm13 = vmmov %vm7150_vm12  ;;  %vm7156_vm6 = vcmask 629760   ;;  %vm7158_vm8 = vcmask 621568  }
 0x6a2   :  { %v6269_v57 = vpop.permute.xlu1 %3025  ;;  %3925 = vset.pattern.permute.xlu1 %v7128_v39  ;;  %v2875_v33 = vadd.f32 %v2871_v24, %v2855_v38  ;;  %v2896_v17 = vadd.f32 %v2892_v5, %v2876_v4  ;;  %vm7153_vm2 = vmmov %vm7152_vm14 }
 0x6a3   :  { %3518 = vperm.xlu1 %3925, %v6102_v14   ;;  %v3029_v44 = vrot.slane %v6269_v57, 4  ;;  %vm7155_vm5 = vmmov %vm7154_vm4 }
 0x6a4   :  { %v2895_v58 = vadd.f32 %v2891_v9, %v2875_v33  ;;  %v2916_v12 = vadd.f32 %v2912_v35, %v2896_v17  ;;  %vm7159_vm9 = vmmov %vm7158_vm8 }
 0x6a6   :  { %v3028_v23 = vpop.permute.xlu1 %3027  ;;  %v2915_v26 = vadd.f32 %v2911_v42, %v2895_v58  ;;  %v2936_v13 = vadd.f32 %v2932_v30, %v2916_v12 }
 0x6a7   :  { %3926 = vset.pattern.permute.xlu1 %v7135_v41  ;;  %v3030_v53 = vrot.slane %v3028_v23, 4 }
 0x6a8   :  { %3538 = vperm.xlu1 %3926, %v6102_v14   ;;  %v2935_v2 = vadd.f32 %v2931_v51, %v2915_v26  ;;  %v2956_v19 = vadd.f32 %v2952_v34, %v2936_v13 }
 0x6a9   :  { %v3032_v60 = vsel %vm7148_vm10, %v3028_v23, %v3030_v53 }
 0x6aa   :  { %v3046_v16 = vpop.permute.xlu1 %3045  ;;  %v2955_v0 = vadd.f32 %v2951_v31, %v2935_v2  ;;  %v2976_v47 = vadd.f32 %v2972_v21, %v2956_v19 }
 0x6ab   :  { %v3049_v39 = vrot.slane %v3046_v16, 4 }
 0x6ac   :  { %3928 = vset.pattern.permute.xlu1 %v7140_v8  ;;  %v2975_v27 = vadd.f32 %v2971_v10, %v2955_v0  ;;  %v2996_v11 = vadd.f32 %v2992_v25, %v2976_v47 }
 0x6ad   :  { %3578 = vperm.xlu1 %3928, %v6102_v14   ;;  %v2991_v14 = vsel %vm7145_vm7, %v6207_v45, %v2989_v29  ;;  %v3031_v45 = vsel %vm7149_vm11, %v6269_v57, %v3029_v44  ;;  %v3051_v24 = vsel %vm7151_vm13, %v3046_v16, %v3049_v39  ;;  %vm7157_vm7 = vmmov %vm7156_vm6  ;;  %vm7183_vm11 = vcmask 605184  }
 0x6ae   :  { %v3048_v49 = vpop.permute.xlu1 %3047  ;;  %v2995_v48 = vadd.f32 %v2991_v14, %v2975_v27  ;;  %v3016_v28 = vadd.f32 %v3012_v63, %v2996_v11  ;;  %v3199_v27 = vpop.permute.xlu0 %3198  ;;  %vm7185_vm13 = vcmask 596992  }
 0x6af   :  { %v3050_v36 = vrot.slane %v3048_v49, 4  ;;  %v3201_v11 = vmul.f32 %v3199_v27, %v5601_v61 }
 0x6b0   :  { %v3015_v55 = vadd.f32 %v3011_v6, %v2995_v48  ;;  %v3036_v7 = vadd.f32 %v3032_v60, %v3016_v28 }
 0x6b1   :  { %3167 = vrot.lane.b32.xlu1 %v3162_v46, %s7080_s27  ;;  %v3052_v56 = vsel %vm7150_vm12, %v3048_v49, %v3050_v36  ;;  %vm7184_vm12 = vmmov %vm7183_vm11 }
 0x6b2   :  { %v3066_v3 = vpop.permute.xlu1 %3065  ;;  %v3035_v43 = vadd.f32 %v3031_v45, %v3015_v55  ;;  %v3056_v18 = vadd.f32 %v3052_v56, %v3036_v7  ;;  %v3259_v56 = vpop.permute.xlu0 %3258 }
 0x6b3   :  { %v3069_v62 = vrot.slane %v3066_v3, 4  ;;  %v3261_v55 = vmul.f32 %v3259_v56, %v5601_v61  ;;  %v3262_v7 = vmul.f32 %v3259_v56, %v5603_v15 }
 0x6b4   :  { %v3055_v4 = vadd.f32 %v3051_v24, %v3035_v43 }
 0x6b5   :  { %v3071_v54 = vsel %vm7152_vm14, %v3066_v3, %v3069_v62  ;;  %v3202_v3 = vmul.f32 %v3199_v27, %v5603_v15  ;;  %vm7186_vm14 = vmmov %vm7185_vm13 }
 0x6b6   :  { %v3068_v20 = vpop.permute.xlu1 %3067  ;;  %v3075_v57 = vadd.f32 %v3071_v54, %v3055_v4  ;;  %v3319_v54 = vpop.permute.xlu0 %3318 }
 0x6b7   :  { %v3070_v5 = vrot.slane %v3068_v20, 4  ;;  %v3321_v4 = vmul.f32 %v3319_v54, %v5601_v61 }
 0x6b9   :  { %v3072_v38 = vsel %vm7153_vm2, %v3068_v20, %v3070_v5  ;;  %vm7187_vm2 = vcmask 588800  }
 0x6ba   :  { %v3076_v23 = vadd.f32 %v3072_v38, %v3056_v18  ;;  %v3086_v9 = vpop.permute.xlu1 %3085 }
 0x6bb   :  { %v3089_v35 = vrot.slane %v3086_v9, 4 }
 0x6bd   :  { %v3091_v40 = vsel %vm7154_vm4, %v3086_v9, %v3089_v35  ;;  %vm7188_vm4 = vmmov %vm7187_vm2 }
 0x6be   :  { %v3095_v37 = vadd.f32 %v3091_v40, %v3075_v57  ;;  %v3088_v41 = vpop.permute.xlu1 %3087 }
 0x6bf   :  { %v3090_v33 = vrot.slane %v3088_v41, 4 }
 0x6c1   :  { %v3092_v17 = vsel %vm7155_vm5, %v3088_v41, %v3090_v33  ;;  %v3379_v41 = vpop.permute.xlu0 %3378  ;;  %vm7189_vm5 = vcmask 580608  }
 0x6c2   :  { %v3096_v42 = vadd.f32 %v3092_v17, %v3076_v23  ;;  %v3106_v30 = vpop.permute.xlu1 %3105  ;;  %v3322_v23 = vmul.f32 %v3319_v54, %v5603_v15  ;;  %v3381_v17 = vmul.f32 %v3379_v41, %v5601_v61 }
 0x6c3   :  { %v3109_v59 = vrot.slane %v3106_v30, 4 }
 0x6c5   :  { %v3111_v22 = vsel %vm1446_vm1, %v3106_v30, %v3109_v59 }
 0x6c6   :  { %v3115_v58 = vadd.f32 %v3111_v22, %v3095_v37  ;;  %v3108_v12 = vpop.permute.xlu1 %3107 }
 0x6c7   :  { %v3110_v16 = vrot.slane %v3108_v12, 4 }
 0x6c9   :  { %v3112_v51 = vsel %vm1446_vm1, %v3108_v12, %v3110_v16  ;;  %vm7160_vm1 = vcmask 613376   ;;  %v3439_v16 = vpop.permute.xlu0 %3438 }
 0x6ca   :  { %v3116_v34 = vadd.f32 %v3112_v51, %v3096_v42  ;;  %v3126_v52 = vpop.permute.xlu1 %3125  ;;  %v3382_v42 = vmul.f32 %v3379_v41, %v5603_v15  ;;  %vm7182_vm10 = vmmov %vm7160_vm1 }
 0x6cb   :  { %v3129_v50 = vrot.slane %v3126_v52, 4 }
 0x6cd   :  { %v3131_v26 = vsel %vm7156_vm6, %v3126_v52, %v3129_v50  ;;  %v3442_v52 = vmul.f32 %v3439_v16, %v5603_v15  ;;  %vm7190_vm6 = vmmov %vm7189_vm5 }
 0x6ce   :  { %v3135_v13 = vadd.f32 %v3131_v26, %v3115_v58  ;;  %v3128_v8 = vpop.permute.xlu1 %3127 }
 0x6cf   :  { %v3130_v31 = vrot.slane %v3128_v8, 4 }
 0x6d1   :  { %v3132_v21 = vsel %vm7157_vm7, %v3128_v8, %v3130_v31  ;;  %vm7191_vm7 = vcmask 572416  }
 0x6d2   :  { %v3136_v29 = vadd.f32 %v3132_v21, %v3116_v34  ;;  %v3146_v32 = vpop.permute.xlu1 %3145  ;;  %v3441_v34 = vmul.f32 %v3439_v16, %v5601_v61  ;;  %v3499_v21 = vpop.permute.xlu0 %3498 }
 0x6d3   :  { %v3149_v46 = vrot.slane %v3146_v32, 4 }
 0x6d5   :  { %v3151_v2 = vsel %vm7158_vm8, %v3146_v32, %v3149_v46  ;;  %v3501_v32 = vmul.f32 %v3499_v21, %v5601_v61  ;;  %v3502_v46 = vmul.f32 %v3499_v21, %v5603_v15  ;;  %vm7192_vm8 = vmmov %vm7191_vm7 }
 0x6d6   :  { %v3155_v19 = vadd.f32 %v3151_v2, %v3135_v13  ;;  %v3148_v49 = vpop.permute.xlu1 %3147 }
 0x6d7   :  { %v3150_v10 = vrot.slane %v3148_v49, 4 }
 0x6d9   :  { %v3152_v25 = vsel %vm7159_vm9, %v3148_v49, %v3150_v10  ;;  %vm7193_vm9 = vcmask 564224  }
 0x6da   :  { %v6343_v1 = vadd.f32 %v3152_v25, %v3136_v29  ;;  %v3166_v53 = vpop.permute.xlu1 %3165 }
 0x6db   :  { %v3169_v0 = vrot.slane %v3166_v53, 4 }
 0x6dd   :  { %v3171_v47 = vsel %vm7160_vm1, %v3166_v53, %v3169_v0  ;;  %v3559_v53 = vpop.permute.xlu0 %3558  ;;  %vm7194_vm1 = vmmov %vm7193_vm9 }
 0x6de   :  { %v6346_v14 = vadd.f32 %v3171_v47, %v3155_v19  ;;  %v3561_v0 = vmul.f32 %v3559_v53, %v5601_v61  ;;  %v3562_v47 = vmul.f32 %v3559_v53, %v5603_v15 }
 0x6eb   :  { %v3179_v63 = vpop.permute.xlu1 %3178 }
 0x6ec   :  { %v3181_v44 = vmul.f32 %v3179_v63, %v5601_v61  ;;  %v3182_v36 = vmul.f32 %v3179_v63, %v5603_v15 }
 0x6ee   :  { %3187 = vrot.lane.b32.xlu1 %v3182_v36, %s7161_s2  ;;  %3185 = vrot.lane.b32.xlu0 %v3181_v44, %s7161_s2  ;;  %v36_v44 = vld [vmem:[%s6571_s3] sm:$0xf]  ;;  %s4139_s3 = smov [#allocation5]  }
 0x6ef   :  { %s3613_s29 = sshll.u32 %s4139_s3, 4  ;;  %s3614_s29 = int_to_ptr.vmem [resolvable:$true] %s3613_s29 }
 0x6f0   :  { %v3219_v6 = vpop.permute.xlu1 %3218  ;;  %s3960_s30 = scalar_lea.vmem %s3614_s29, 128  ;;  %p3965_p9 = scmp.lt.s32.totalorder %s3614_s29, %s3614_s29 }
 0x6f1   :  { %v3221_v60 = vmul.f32 %v3219_v6, %v5601_v61  ;;  %v3222_v39 = vmul.f32 %v3219_v6, %v5603_v15  ;;  %p3961_p8 = scmp.ne.s32.totalorder %s3614_s29, %s3960_s30  ;;  %p3966_p10 = scmp.lt.s32.totalorder %s3960_s30, %s3960_s30 }
 0x6f2   :  { %3207 = vrot.lane.b32.xlu1 %v3202_v3, %s7162_s5  ;;  %3205 = vrot.lane.b32.xlu0 %v3201_v11, %s7162_s5 }
 0x6f3   :  { %p3967_p11 = por %p3966_p10, %p3965_p9 }
 0x6f5   :  { %v3239_v48 = vpop.permute.xlu1 %3238  ;;  %p3968_p12 = pnand %p3967_p11, %p3961_p8 }
 0x6f6   :  { %3227 = vrot.lane.b32.xlu1 %v3222_v39, %s7163_s6  ;;  %3225 = vrot.lane.b32.xlu0 %v3221_v60, %s7163_s6  ;;  %v3241_v28 = vmul.f32 %v3239_v48, %v5601_v61  ;;  %v3242_v45 = vmul.f32 %v3239_v48, %v5603_v15 }
 0x6fa   :  { %3247 = vrot.lane.b32.xlu1 %v3242_v45, %s7164_s7  ;;  %3245 = vrot.lane.b32.xlu0 %v3241_v28, %s7164_s7  ;;  %v3279_v62 = vpop.permute.xlu1 %3278 }
 0x6fb   :  { %v3281_v20 = vmul.f32 %v3279_v62, %v5601_v61  ;;  %v3282_v24 = vmul.f32 %v3279_v62, %v5603_v15 }
 0x6fe   :  { %3267 = vrot.lane.b32.xlu1 %v3262_v7, %s7165_s8  ;;  %3265 = vrot.lane.b32.xlu0 %v3261_v55, %s7165_s8 }
 0x6ff   :  { %v3299_v5 = vpop.permute.xlu1 %3298 }
 0x700   :  { %v3301_v43 = vmul.f32 %v3299_v5, %v5601_v61  ;;  %v3302_v18 = vmul.f32 %v3299_v5, %v5603_v15 }
 0x702   :  { %3287 = vrot.lane.b32.xlu1 %v3282_v24, %s7166_s9  ;;  %3285 = vrot.lane.b32.xlu0 %v3281_v20, %s7166_s9 }
 0x704   :  { %v3339_v38 = vpop.permute.xlu1 %3338 }
 0x705   :  { %v3341_v9 = vmul.f32 %v3339_v38, %v5601_v61  ;;  %v3342_v35 = vmul.f32 %v3339_v38, %v5603_v15 }
 0x706   :  { %3307 = vrot.lane.b32.xlu1 %v3302_v18, %s7167_s10  ;;  %3305 = vrot.lane.b32.xlu0 %v3301_v43, %s7167_s10 }
 0x709   :  { %v3359_v57 = vpop.permute.xlu1 %3358 }
 0x70a   :  { %3327 = vrot.lane.b32.xlu1 %v3322_v23, %s7168_s11  ;;  %3325 = vrot.lane.b32.xlu0 %v3321_v4, %s7168_s11  ;;  %v3361_v40 = vmul.f32 %v3359_v57, %v5601_v61  ;;  %v3362_v37 = vmul.f32 %v3359_v57, %v5603_v15 }
 0x70e   :  { %3347 = vrot.lane.b32.xlu1 %v3342_v35, %s7169_s12  ;;  %3345 = vrot.lane.b32.xlu0 %v3341_v9, %s7169_s12  ;;  %v3399_v33 = vpop.permute.xlu1 %3398 }
 0x70f   :  { %v3401_v30 = vmul.f32 %v3399_v33, %v5601_v61  ;;  %v3402_v59 = vmul.f32 %v3399_v33, %v5603_v15 }
 0x712   :  { %3367 = vrot.lane.b32.xlu1 %v3362_v37, %s7170_s13  ;;  %3365 = vrot.lane.b32.xlu0 %v3361_v40, %s7170_s13 }
 0x713   :  { %v3419_v22 = vpop.permute.xlu1 %3418 }
 0x714   :  { %v3421_v58 = vmul.f32 %v3419_v22, %v5601_v61  ;;  %v3422_v12 = vmul.f32 %v3419_v22, %v5603_v15 }
 0x716   :  { %3387 = vrot.lane.b32.xlu1 %v3382_v42, %s7171_s14  ;;  %3385 = vrot.lane.b32.xlu0 %v3381_v17, %s7171_s14 }
 0x718   :  { %v3459_v51 = vpop.permute.xlu1 %3458 }
 0x719   :  { %v3461_v50 = vmul.f32 %v3459_v51, %v5601_v61  ;;  %v3462_v26 = vmul.f32 %v3459_v51, %v5603_v15 }
 0x71a   :  { %3407 = vrot.lane.b32.xlu1 %v3402_v59, %s7172_s15  ;;  %3405 = vrot.lane.b32.xlu0 %v3401_v30, %s7172_s15 }
 0x71d   :  { %v3479_v13 = vpop.permute.xlu1 %3478 }
 0x71e   :  { %3427 = vrot.lane.b32.xlu1 %v3422_v12, %s7173_s16  ;;  %3425 = vrot.lane.b32.xlu0 %v3421_v58, %s7173_s16  ;;  %v3481_v8 = vmul.f32 %v3479_v13, %v5601_v61  ;;  %v3482_v31 = vmul.f32 %v3479_v13, %v5603_v15 }
 0x722   :  { %3447 = vrot.lane.b32.xlu1 %v3442_v52, %s7174_s17  ;;  %3445 = vrot.lane.b32.xlu0 %v3441_v34, %s7174_s17  ;;  %v3519_v29 = vpop.permute.xlu1 %3518 }
 0x723   :  { %v3521_v2 = vmul.f32 %v3519_v29, %v5601_v61  ;;  %v3522_v19 = vmul.f32 %v3519_v29, %v5603_v15 }
 0x726   :  { %3467 = vrot.lane.b32.xlu1 %v3462_v26, %s7175_s18  ;;  %3465 = vrot.lane.b32.xlu0 %v3461_v50, %s7175_s18 }
 0x727   :  { %v3539_v49 = vpop.permute.xlu1 %3538 }
 0x728   :  { %v3541_v10 = vmul.f32 %v3539_v49, %v5601_v61  ;;  %v3542_v25 = vmul.f32 %v3539_v49, %v5603_v15 }
 0x72a   :  { %3487 = vrot.lane.b32.xlu1 %v3482_v31, %s7176_s19  ;;  %3485 = vrot.lane.b32.xlu0 %v3481_v8, %s7176_s19 }
 0x72c   :  { %v3579_v63 = vpop.permute.xlu1 %3578 }
 0x72d   :  { %v3581_v36 = vmul.f32 %v3579_v63, %v5601_v61  ;;  %v3582_v27 = vmul.f32 %v3579_v63, %v5603_v15 }
 0x72e   :  { %3507 = vrot.lane.b32.xlu1 %v3502_v46, %s7177_s20  ;;  %3505 = vrot.lane.b32.xlu0 %v3501_v32, %s7177_s20 }
 0x730   :  { %v3168_v11 = vpop.permute.xlu1 %3167 }
 0x731   :  { %v3170_v9 = vrot.slane %v3168_v11, 4 }
 0x732   :  { %3527 = vrot.lane.b32.xlu1 %v3522_v19, %s7178_s21  ;;  %3525 = vrot.lane.b32.xlu0 %v3521_v2, %s7178_s21 }
 0x733   :  { %v3172_v41 = vsel %vm7182_vm10, %v3168_v11, %v3170_v9  ;;  %vm7195_vm10 = vcmask 556032  }
 0x734   :  { %v3176_v16 = vadd.f32 %v3172_v41, %v6343_v1 }
 0x736   :  { %3547 = vrot.lane.b32.xlu1 %v3542_v25, %s7179_s22  ;;  %3545 = vrot.lane.b32.xlu0 %v3541_v10, %s7179_s22 }
 0x73a   :  { %3567 = vrot.lane.b32.xlu1 %v3562_v47, %s7180_s23  ;;  %3565 = vrot.lane.b32.xlu0 %v3561_v0, %s7180_s23 }
 0x73e   :  { %3585 = vrot.lane.b32.xlu1 %v3581_v36, %s7181_s26  ;;  %3599 = vperm.xlu0 %3929, %v36_v44  }
 0x742   :  { %3587 = vrot.lane.b32.xlu1 %v3582_v27, %s7181_s26 }
 0x760   :  { %v3188_v3 = vpop.permute.xlu1 %3187  ;;  %v3186_v6 = vpop.permute.xlu0 %3185 }
 0x761   :  { %v3190_v40 = vrot.slane %v3188_v3, 4  ;;  %v3189_v37 = vrot.slane %v3186_v6, 4 }
 0x763   :  { %v3192_v59 = vsel %vm7183_vm11, %v3188_v3, %v3190_v40  ;;  %v3191_v22 = vsel %vm7184_vm12, %v3186_v6, %v3189_v37  ;;  %vm7196_vm11 = vmmov %vm7195_vm10  ;;  %vm7197_vm12 = vcmask 547840  }
 0x764   :  { %v3208_v60 = vpop.permute.xlu1 %3207  ;;  %v3206_v39 = vpop.permute.xlu0 %3205  ;;  %v3196_v26 = vadd.f32 %v3192_v59, %v3176_v16  ;;  %v3195_v13 = vadd.f32 %v3191_v22, %v6346_v14 }
 0x765   :  { %v3210_v33 = vrot.slane %v3208_v60, 4  ;;  %v3209_v17 = vrot.slane %v3206_v39, 4 }
 0x767   :  { %v3212_v51 = vsel %vm7185_vm13, %v3208_v60, %v3210_v33  ;;  %v3211_v34 = vsel %vm7186_vm14, %v3206_v39, %v3209_v17  ;;  %vm7198_vm13 = vmmov %vm7197_vm12  ;;  %vm7199_vm14 = vcmask 539648  }
 0x768   :  { %v3228_v48 = vpop.permute.xlu1 %3227  ;;  %v3226_v28 = vpop.permute.xlu0 %3225  ;;  %v3216_v1 = vadd.f32 %v3212_v51, %v3196_v26  ;;  %v3215_v2 = vadd.f32 %v3211_v34, %v3195_v13 }
 0x769   :  { %v3230_v58 = vrot.slane %v3228_v48, 4  ;;  %v3229_v12 = vrot.slane %v3226_v28, 4 }
 0x76b   :  { %v3232_v21 = vsel %vm7187_vm2, %v3228_v48, %v3230_v58  ;;  %v3231_v29 = vsel %vm7188_vm4, %v3226_v28, %v3229_v12  ;;  %vm7200_vm2 = vmmov %vm7199_vm14  ;;  %vm7201_vm4 = vcmask 531456  }
 0x76c   :  { %v3248_v45 = vpop.permute.xlu1 %3247  ;;  %v3246_v56 = vpop.permute.xlu0 %3245  ;;  %v3236_v53 = vadd.f32 %v3232_v21, %v3216_v1  ;;  %v3235_v14 = vadd.f32 %v3231_v29, %v3215_v2 }
 0x76d   :  { %v3250_v52 = vrot.slane %v3248_v45, 4  ;;  %v3249_v50 = vrot.slane %v3246_v56, 4 }
 0x76f   :  { %v3252_v19 = vsel %vm7189_vm5, %v3248_v45, %v3250_v52  ;;  %v3251_v49 = vsel %vm7190_vm6, %v3246_v56, %v3249_v50  ;;  %vm7202_vm5 = vmmov %vm7201_vm4  ;;  %vm7203_vm6 = vcmask 523264  }
 0x770   :  { %v3268_v62 = vpop.permute.xlu1 %3267  ;;  %v3266_v55 = vpop.permute.xlu0 %3265  ;;  %v3256_v11 = vadd.f32 %v3252_v19, %v3236_v53  ;;  %v3255_v3 = vadd.f32 %v3251_v49, %v3235_v14 }
 0x771   :  { %v3270_v32 = vrot.slane %v3268_v62, 4  ;;  %v3269_v46 = vrot.slane %v3266_v55, 4 }
 0x773   :  { %v3272_v63 = vsel %vm7191_vm7, %v3268_v62, %v3270_v32  ;;  %v3271_v44 = vsel %vm7192_vm8, %v3266_v55, %v3269_v46  ;;  %vm7204_vm7 = vmmov %vm7203_vm6  ;;  %vm7205_vm8 = vcmask 515072  }
 0x774   :  { %v3288_v7 = vpop.permute.xlu1 %3287  ;;  %v3286_v61 = vpop.permute.xlu0 %3285  ;;  %v3276_v28 = vadd.f32 %v3272_v63, %v3256_v11  ;;  %v3275_v45 = vadd.f32 %v3271_v44, %v3255_v3 }
 0x775   :  { %v3290_v10 = vrot.slane %v3288_v7, 4  ;;  %v3289_v25 = vrot.slane %v3286_v61, 4 }
 0x777   :  { %v3292_v6 = vsel %vm7193_vm9, %v3288_v7, %v3290_v10  ;;  %v3291_v60 = vsel %vm7194_vm1, %v3286_v61, %v3289_v25  ;;  %vm7206_vm9 = vmmov %vm7205_vm8  ;;  %vm7207_vm1 = vcmask 506880  }
 0x778   :  { %v3308_v20 = vpop.permute.xlu1 %3307  ;;  %v3306_v24 = vpop.permute.xlu0 %3305  ;;  %v3296_v37 = vadd.f32 %v3292_v6, %v3276_v28  ;;  %v3295_v61 = vadd.f32 %v3291_v60, %v3275_v45 }
 0x779   :  { %v3310_v36 = vrot.slane %v3308_v20, 4  ;;  %v3309_v27 = vrot.slane %v3306_v24, 4 }
 0x77b   :  { %v3312_v62 = vsel %vm7195_vm10, %v3308_v20, %v3310_v36  ;;  %v3311_v55 = vsel %vm7196_vm11, %v3306_v24, %v3309_v27  ;;  %vm7208_vm10 = vmmov %vm7207_vm1  ;;  %vm7209_vm11 = vcmask 498688  }
 0x77c   :  { %v6435_v5 = vpop.permute.xlu1 %3327  ;;  %v6437_v15 = vpop.permute.xlu0 %3325  ;;  %v3316_v22 = vadd.f32 %v3312_v62, %v3296_v37  ;;  %v3315_v20 = vadd.f32 %v3311_v55, %v3295_v61 }
 0x77d   :  { %v3330_v39 = vrot.slane %v6435_v5, 4  ;;  %v3329_v48 = vrot.slane %v6437_v15, 4 }
 0x77f   :  { %v3332_v41 = vsel %vm7197_vm12, %v6435_v5, %v3330_v39  ;;  %v3331_v33 = vsel %vm7198_vm13, %v6437_v15, %v3329_v48  ;;  %vm7210_vm12 = vmmov %vm7209_vm11  ;;  %vm7211_vm13 = vcmask 490496  }
 0x780   :  { %v6439_v43 = vpop.permute.xlu1 %3347  ;;  %v6441_v18 = vpop.permute.xlu0 %3345  ;;  %v3336_v34 = vadd.f32 %v3332_v41, %v3316_v22  ;;  %v3335_v15 = vadd.f32 %v3331_v33, %v3315_v20 }
 0x781   :  { %v3350_v40 = vrot.slane %v6439_v43, 4  ;;  %v3349_v7 = vrot.slane %v6441_v18, 4 }
 0x783   :  { %v3352_v12 = vsel %vm7199_vm14, %v6439_v43, %v3350_v40  ;;  %v3351_v16 = vsel %vm7200_vm2, %v6441_v18, %v3349_v7  ;;  %vm7212_vm14 = vmmov %vm7211_vm13  ;;  %vm7213_vm2 = vcmask 482304  }
 0x784   :  { %v6443_v54 = vpop.permute.xlu1 %3367  ;;  %v6445_v38 = vpop.permute.xlu0 %3365  ;;  %v3356_v43 = vadd.f32 %v3352_v12, %v3336_v34  ;;  %v3355_v21 = vadd.f32 %v3351_v16, %v3335_v15 }
 0x785   :  { %v3370_v17 = vrot.slane %v6443_v54, 4  ;;  %v3369_v59 = vrot.slane %v6445_v38, 4 }
 0x787   :  { %v3372_v52 = vsel %vm7201_vm4, %v6443_v54, %v3370_v17  ;;  %v3371_v50 = vsel %vm7202_vm5, %v6445_v38, %v3369_v59  ;;  %vm7214_vm4 = vmmov %vm7213_vm2  ;;  %vm7215_vm5 = vcmask 474112  }
 0x788   :  { %v6447_v4 = vpop.permute.xlu1 %3387  ;;  %v6449_v23 = vpop.permute.xlu0 %3385  ;;  %v3376_v2 = vadd.f32 %v3372_v52, %v3356_v43  ;;  %v3375_v38 = vadd.f32 %v3371_v50, %v3355_v21 }
 0x789   :  { %v3390_v51 = vrot.slane %v6447_v4, 4  ;;  %v3389_v5 = vrot.slane %v6449_v23, 4 }
 0x78b   :  { %v3392_v32 = vsel %vm7203_vm6, %v6447_v4, %v3390_v51  ;;  %v3391_v46 = vsel %vm7204_vm7, %v6449_v23, %v3389_v5  ;;  %vm7216_vm6 = vmmov %vm7215_vm5  ;;  %vm7217_vm7 = vcmask 465920  }
 0x78c   :  { %v6451_v35 = vpop.permute.xlu1 %3407  ;;  %v6453_v57 = vpop.permute.xlu0 %3405  ;;  %v3396_v4 = vadd.f32 %v3392_v32, %v3376_v2  ;;  %v3395_v53 = vadd.f32 %v3391_v46, %v3375_v38 }
 0x78d   :  { %v3410_v26 = vrot.slane %v6451_v35, 4  ;;  %v3409_v13 = vrot.slane %v6453_v57, 4 }
 0x78f   :  { %v3412_v19 = vsel %vm7205_vm8, %v6451_v35, %v3410_v26  ;;  %v3411_v49 = vsel %vm7206_vm9, %v6453_v57, %v3409_v13  ;;  %vm7218_vm8 = vmmov %vm7217_vm7 }
 0x790   :  { %v6456_v42 = vpop.permute.xlu1 %3427  ;;  %v6458_v30 = vpop.permute.xlu0 %3425  ;;  %v3416_v36 = vadd.f32 %v3412_v19, %v3396_v4  ;;  %v3415_v27 = vadd.f32 %v3411_v49, %v3395_v53 }
 0x791   :  { %v3430_v1 = vrot.slane %v6456_v42, 4  ;;  %v3429_v54 = vrot.slane %v6458_v30, 4 }
 0x793   :  { %v3432_v23 = vsel %vm7207_vm1, %v6456_v42, %v3430_v1  ;;  %v3431_v63 = vsel %vm7208_vm10, %v6458_v30, %v3429_v54 }
 0x794   :  { %v6466_v8 = vpop.permute.xlu1 %3447  ;;  %v6468_v31 = vpop.permute.xlu0 %3445  ;;  %v3436_v60 = vadd.f32 %v3432_v23, %v3416_v36  ;;  %v3435_v39 = vadd.f32 %v3431_v63, %v3415_v27 }
 0x795   :  { %v3450_v10 = vrot.slane %v6466_v8, 4  ;;  %v3449_v25 = vrot.slane %v6468_v31, 4 }
 0x797   :  { %v3452_v11 = vsel %vm7209_vm11, %v6466_v8, %v3450_v10  ;;  %v3451_v3 = vsel %vm7210_vm12, %v6468_v31, %v3449_v25 }
 0x798   :  { %v6474_v0 = vpop.permute.xlu1 %3467  ;;  %v6476_v47 = vpop.permute.xlu0 %3465  ;;  %v3456_v55 = vadd.f32 %v3452_v11, %v3436_v60  ;;  %v3455_v8 = vadd.f32 %v3451_v3, %v3435_v39 }
 0x799   :  { %v3470_v44 = vrot.slane %v6474_v0, 4  ;;  %v3469_v35 = vrot.slane %v6476_v47, 4 }
 0x79b   :  { %v3472_v48 = vsel %vm7211_vm13, %v6474_v0, %v3470_v44  ;;  %v3471_v28 = vsel %vm7212_vm14, %v6476_v47, %v3469_v35 }
 0x79c   :  { %v6484_v56 = vpop.permute.xlu1 %3487  ;;  %v6486_v9 = vpop.permute.xlu0 %3485  ;;  %v3476_v61 = vadd.f32 %v3472_v48, %v3456_v55  ;;  %v3475_v41 = vadd.f32 %v3471_v28, %v3455_v8 }
 0x79d   :  { %v3490_v6 = vrot.slane %v6484_v56, 4  ;;  %v3489_v42 = vrot.slane %v6486_v9, 4 }
 0x79f   :  { %v3492_v31 = vsel %vm7213_vm2, %v6484_v56, %v3490_v6  ;;  %v3491_v40 = vsel %vm7214_vm4, %v6486_v9, %v3489_v42 }
 0x7a0   :  { %v3508_v58 = vpop.permute.xlu1 %3507  ;;  %v3506_v24 = vpop.permute.xlu0 %3505  ;;  %v3496_v20 = vadd.f32 %v3492_v31, %v3476_v61  ;;  %v3495_v12 = vadd.f32 %v3491_v40, %v3475_v41 }
 0x7a1   :  { %v3510_v45 = vrot.slane %v3508_v58, 4  ;;  %v3509_v62 = vrot.slane %v3506_v24, 4 }
 0x7a3   :  { %v3512_v0 = vsel %vm7215_vm5, %v3508_v58, %v3510_v45  ;;  %v3511_v47 = vsel %vm7216_vm6, %v3506_v24, %v3509_v62 }
 0x7a4   :  { %v3528_v29 = vpop.permute.xlu1 %3527  ;;  %v3526_v18 = vpop.permute.xlu0 %3525  ;;  %v3516_v5 = vadd.f32 %v3512_v0, %v3496_v20  ;;  %v3515_v34 = vadd.f32 %v3511_v47, %v3495_v12 }
 0x7a5   :  { %v3530_v7 = vrot.slane %v3528_v29, 4  ;;  %v3529_v37 = vrot.slane %v3526_v18, 4 }
 0x7a7   :  { %v3532_v16 = vsel %vm7217_vm7, %v3528_v29, %v3530_v7  ;;  %v3531_v56 = vsel %vm7218_vm8, %v3526_v18, %v3529_v37 }
 0x7a8   :  { %v3548_v14 = vpop.permute.xlu1 %3547  ;;  %v3546_v57 = vpop.permute.xlu0 %3545  ;;  %v3536_v24 = vadd.f32 %v3532_v16, %v3516_v5  ;;  %v3535_v13 = vadd.f32 %v3531_v56, %v3515_v34 }
 0x7a9   :  { %v3550_v59 = vrot.slane %v3548_v14, 4  ;;  %v3549_v22 = vrot.slane %v3546_v57, 4 }
 0x7ab   :  { %v3552_v52 = vsel %vm2062_vm15, %v3548_v14, %v3550_v59  ;;  %v3551_v50 = vsel %vm2062_vm15, %v3546_v57, %v3549_v22  ;;  %vm7219_vm15 = vcmask 883712  }
 0x7ac   :  { %v3568_v30 = vpop.permute.xlu1 %3567  ;;  %v3566_v33 = vpop.permute.xlu0 %3565  ;;  %v3556_v29 = vadd.f32 %v3552_v52, %v3536_v24  ;;  %v3555_v32 = vadd.f32 %v3551_v50, %v3535_v13  ;;  %vm7220_vm9 = vmmov %vm7219_vm15 }
 0x7ad   :  { %v3570_v51 = vrot.slane %v3568_v30, 4  ;;  %v3569_v9 = vrot.slane %v3566_v33, 4 }
 0x7af   :  { %v3572_v43 = vsel %vm2090_vm3, %v3568_v30, %v3570_v51  ;;  %v3571_v21 = vsel %vm2090_vm3, %v3566_v33, %v3569_v9 }
 0x7b0   :  { %v3586_v17 = vpop.permute.xlu1 %3585  ;;  %v3576_v1 = vadd.f32 %v3572_v43, %v3556_v29  ;;  %v3575_v54 = vadd.f32 %v3571_v21, %v3555_v32 }
 0x7b1   :  { %v3589_v58 = vrot.slane %v3586_v17, 4 }
 0x7b3   :  { %v3591_v18 = vsel %vm2118_vm0, %v3586_v17, %v3589_v58 }
 0x7b4   :  { %v3588_v15 = vpop.permute.xlu1 %3587  ;;  %v3595_v2 = vadd.f32 %v3591_v18, %v3575_v54 }
 0x7b5   :  { %v3590_v26 = vrot.slane %v3588_v15, 4 }
 0x7b7   :  { %v3592_v46 = vsel %vm2118_vm0, %v3588_v15, %v3590_v26 }
 0x7b8   :  { %v3596_v38 = vadd.f32 %v3592_v46, %v3576_v1 }
 0x7bd   :  { %v3600_v19 = vpop.permute.xlu0 %3599 }
 0x7be   :  { %v3602_v49 = vadd.f32 %v3600_v19, %v3595_v2  ;;  %v3603_v10 = vadd.f32 %v3600_v19, %v3596_v38 }
 0x7c0   :  { %v3604_v25 = vsel %vm7219_vm15, %v3602_v49, 0.0  ;;  %v3605_v4 = vsel %vm7220_vm9, %v3603_v10, 0.0 }
 0x7c1   :  { %3606 = vst [vmem:[#allocation5] sm:$0xf] %v3604_v25  ;;  %3607 = vst [vmem:[#allocation5 + $0x4] sm:$0xf] %v3605_v4 }
 0x7c2   :  { %3971 = shalt.err (!%p3968_p12)
}
 0x7c3   :  { %s3972_s28 = scalar_lea.hbm %s6572_s4, 128 }
 0x7c4   :  { %p3973_p13 = scmp.ne.s32.totalorder %s6572_s4, %s3972_s28  ;;  %p3976_p0 = scmp.lt.u32.totalorder %s3972_s28, %s6572_s4 }
 0x7c6   :  { %p3978_p1 = pnand %p3976_p0, %p3973_p13 }
 0x7c8   :  { %3981 = shalt.err (!%p3978_p1)
}
 0x7c9   :  { %s4140_s7 = smov 4  }
 0x7ca   :  { %3619 = dma.vmem_to_hbm [thread:$0]  %s3614_s29, 128, %s6572_s4, [#allocation4], %s7171_s14, %s7171_s14, %s4140_s7  }
 0x7cb   :  { %3984 = dma.done.wait [#allocation4], 128  }
 0x7cc   :  { %3985 = vsyncadd [#allocation4], 4294967168 }
 0x7cd   :  { %3623 = vsyncpa [#allocation3], 1 }
 0x7ce   :  { %3624 = vsyncpa [#allocation4], 1 }

</bundles_post_ra>
